<compile_context>
chip_gen: v7x
topology: tpu7x:2x2x1
jax: 0.10.0
libtpu: 0.0.40
codegen_flags: <defaults>
</compile_context>

<pallas_src>
import jax
import jax.numpy as jnp
from jax import lax
from jax.experimental import pallas as pl
from jax.experimental.pallas import tpu as pltpu

GP = 128   # per-gate padded lane width (one vreg lane span)
HP = 128   # padded [h_fwd | h_bwd] state width (>= 2H)
CP = 8     # padded CRF tag count (>= num_crf_class)


# ----------------------------------------------------------------------------
# The single fused kernel: char-CNN -> BiLSTM -> classifier -> CRF llh + Viterbi
# ----------------------------------------------------------------------------
def fused_bilstm_cnn_crf(word_x, char_x, tags, mask,
                         conv_wband, conv_bias,
                         wih_w, wih_c, b_gates, whh, dirsel,
                         wcls_f, wcls_b, cls_b_pad,
                         trans_pad, transT_pad, start_pad, end_pad,
                         *, T, B):
    """word_x:(T*B,Dw) char_x:(T*B,L*Cd) tags/mask:(T*B,1)  -> (llh (B,1), decoded (B,T))."""
    TB = word_x.shape[0]
    assert TB == T * B
    assert char_x.shape[0] == TB and char_x.shape[1] == conv_wband.shape[0]
    CF = conv_bias.shape[1]
    P = conv_wband.shape[1] // CF          # number of conv output positions
    G = b_gates.shape[1]                   # 4 * GP
    f32 = jnp.float32

    def kernel(word_ref, char_ref, tags_ref, mask_ref,
               wband_ref, cb_ref,
               wihw_ref, wihc_ref, bg_ref, whh_ref, dir_ref,
               wcf_ref, wcb_ref, cbias_ref,
               trans_ref, transT_ref, start_ref, end_ref,
               llh_ref, dec_ref,
               gx_ref, hf_ref, hb_ref):
        # ---- 1) char CNN: ONE banded matmul, then max over the P position groups ----
        y = jnp.dot(char_ref[...], wband_ref[...], preferred_element_type=f32)  # (TB, P*CF)
        pooled = y[:, 0:CF]
        for p in range(1, P):                                   # static, tiny
            pooled = jnp.maximum(pooled, y[:, p * CF:(p + 1) * CF])
        pooled = pooled + cb_ref[...]        # bias after max == max(conv+bias); no nonlinearity in ref

        # ---- 2) hoisted input->gate projection for BOTH directions (one pass) ----
        gx_ref[...] = (jnp.dot(word_ref[...], wihw_ref[...], preferred_element_type=f32)
                       + jnp.dot(pooled, wihc_ref[...], preferred_element_type=f32)
                       + bg_ref[...])                                            # (TB, G)

        whh_v = whh_ref[...]                 # (HP, G), loaded once
        fwd_cols = dir_ref[...] > 0.0        # (1, G): forward-direction columns

        # ---- 3) serial BiLSTM recurrence (fully unrolled, f32, 128-aligned slices) ----
        h = jnp.zeros((B, HP), f32)          # [h_fwd | h_bwd | 0-pad]
        c = jnp.zeros((B, HP), f32)
        for t in range(T):
            tb = T - 1 - t
            gh = jnp.dot(h, whh_v, preferred_element_type=f32)                   # (B, G)
            g = jnp.where(fwd_cols,
                          gx_ref[t * B:(t + 1) * B, :],
                          gx_ref[tb * B:(tb + 1) * B, :]) + gh
            i_g = 1.0 / (1.0 + jnp.exp(-g[:, 0 * GP:1 * GP]))
            f_g = 1.0 / (1.0 + jnp.exp(-g[:, 1 * GP:2 * GP]))
            g_g = jnp.tanh(g[:, 2 * GP:3 * GP])
            o_g = 1.0 / (1.0 + jnp.exp(-g[:, 3 * GP:4 * GP]))
            c = f_g * c + i_g * g_g
            h = o_g * jnp.tanh(c)
            hf_ref[t * B:(t + 1) * B, :] = h                    # full-width 128-lane stores
            hb_ref[tb * B:(tb + 1) * B, :] = h

        # ---- 4) classification epilogue (emissions stay in VMEM; pad cols = -1e30) ----
        em = (jnp.dot(hf_ref[...], wcf_ref[...], preferred_element_type=f32)
              + jnp.dot(hb_ref[...], wcb_ref[...], preferred_element_type=f32)
              + cbias_ref[...])                                                  # (TB, CP)

        # ---- 5) CRF: hoisted / vectorized pieces ----
        iota_r = lax.broadcasted_iota(jnp.int32, (TB, CP), 1)
        oh_all = (tags_ref[...] == iota_r).astype(f32)                           # (TB, CP)
        m_all = mask_ref[...]                                                    # (TB, 1)
        e_pick = jnp.sum(em * oh_all, axis=-1, keepdims=True) * m_all            # masked em picks
        trans = trans_ref[...]
        transT = transT_ref[...]
        start = start_ref[...]
        end = end_ref[...]
        tr_rows = jnp.dot(oh_all, trans, preferred_element_type=f32)             # trans[tag_t, :]
        expT = jnp.exp(trans)                                                    # for log-partition
        iota_b = lax.broadcasted_iota(jnp.int32, (B, CP), 1).astype(f32)
        iota_3 = lax.broadcasted_iota(jnp.int32, (B, CP, CP), 2).astype(f32)

        # ---- 6) t = 0 init ----
        em0 = em[0:B, :]
        oh0 = oh_all[0:B, :]
        gold = jnp.sum(start * oh0, axis=-1, keepdims=True) + e_pick[0:B, :]
        alpha = start + em0                                                      # log-partition
        vscore = start + em0                                                     # Viterbi
        last_oh = oh0
        history = []

        # ---- 7) unrolled CRF / Viterbi forward recursion ----
        for t in range(1, T):
            em_t = em[t * B:(t + 1) * B, :]
            oh_t = oh_all[t * B:(t + 1) * B, :]
            m_t = m_all[t * B:(t + 1) * B, :]

            # gold path: 2-D picks only (no rank-3 two-hot select)
            tr_pick = jnp.sum(tr_rows[(t - 1) * B:t * B, :] * oh_t,
                              axis=-1, keepdims=True)
            gold = gold + e_pick[t * B:(t + 1) * B, :] + tr_pick * m_t
            last_oh = jnp.where(m_t > 0.0, oh_t, last_oh)

            # log-partition recursion (exp-matmul form)
            mx = jnp.max(alpha, axis=-1, keepdims=True)
            q = jnp.dot(jnp.exp(alpha - mx), expT, preferred_element_type=f32)
            alpha = jnp.where(m_t > 0.0, em_t + jnp.log(q) + mx, alpha)

            # Viterbi max-plus + backpointers (first-argmax tie-break)
            tmp = vscore[:, None, :] + transT[None, :, :]                        # tmp[b, j, i]
            best = jnp.max(tmp, axis=-1)                                         # (B, CP)
            eq = tmp == jnp.max(tmp, axis=-1, keepdims=True)
            bp = jnp.min(jnp.where(eq, iota_3, jnp.float32(CP)), axis=-1)        # (B, CP)
            vscore = jnp.where(m_t > 0.0, best + em_t, vscore)
            history.append((bp, m_t))

        # ---- 8) log-likelihood ----
        gold = gold + jnp.sum(end * last_oh, axis=-1, keepdims=True)
        a_end = alpha + end
        mx2 = jnp.max(a_end, axis=-1, keepdims=True)
        denom = mx2 + jnp.log(jnp.sum(jnp.exp(a_end - mx2), axis=-1, keepdims=True))
        llh_ref[...] = gold - denom

        # ---- 9) Viterbi backtrack (unrolled one-hot gathers) ----
        v_end = vscore + end
        mxv = jnp.max(v_end, axis=-1, keepdims=True)
        cur = jnp.min(jnp.where(v_end == mxv, iota_b, jnp.float32(CP)),
                      axis=-1, keepdims=True)                                    # (B, 1)
        cols = [None] * T
        cols[T - 1] = cur
        for t in range(T - 1, 0, -1):
            bp, m_t = history[t - 1]
            prev = jnp.sum(jnp.where(iota_b == cur, bp, 0.0), axis=-1, keepdims=True)
            cur = jnp.where(m_t > 0.0, prev, cur)
            cols[t - 1] = cur
        dec_ref[...] = jnp.concatenate(cols, axis=1).astype(jnp.int32)           # (B, T)

    return pl.pallas_call(
        kernel,
        out_shape=(jax.ShapeDtypeStruct((B, 1), jnp.float32),
                   jax.ShapeDtypeStruct((B, T), jnp.int32)),
        scratch_shapes=[pltpu.VMEM((TB, G), jnp.float32),    # cached input->gate projections
                        pltpu.VMEM((TB, HP), jnp.float32),   # fwd-time-indexed h states
                        pltpu.VMEM((TB, HP), jnp.float32)],  # bwd-time-indexed h states
    )(word_x, char_x, tags, mask, conv_wband, conv_bias,
      wih_w, wih_c, b_gates, whh, dirsel,
      wcls_f, wcls_b, cls_b_pad, trans_pad, transT_pad, start_pad, end_pad)


# ----------------------------------------------------------------------------
# Parameter init (deterministic, synthetic; PyTorch-like layouts)
# ----------------------------------------------------------------------------
def init_params(key, cfg):
    ks = jax.random.split(key, 16)
    Dw = cfg["word_embedding_dim"]
    Cd = cfg["char_embedding_dim"]
    F = cfg["filter_num"]
    W = cfg["char_window_size"]
    H = cfg["lstm_hidden_dim"]
    Cn = cfg["num_crf_class"]
    Din = Dw + Cd * F

    def u(k, shape, a):
        return jax.random.uniform(k, shape, jnp.float32, -a, a)

    word_emb = jax.random.normal(ks[0], (cfg["vocab_size"], Dw), jnp.float32)
    char_emb = jax.random.normal(ks[1], (cfg["char_size"], Cd), jnp.float32)
    char_emb = char_emb.at[0].set(0.0)                       # padding_idx=0

    conv_bound = 1.0 / jnp.sqrt(1.0 * W)
    conv_w = u(ks[2], (Cd * F, 1, W), conv_bound)            # (out_ch, in_ch/groups, W)
    conv_b = u(ks[3], (Cd * F,), conv_bound)

    s = 1.0 / jnp.sqrt(float(H))
    wih_f = u(ks[4], (4 * H, Din), s); whh_f = u(ks[5], (4 * H, H), s)
    bih_f = u(ks[6], (4 * H,), s);     bhh_f = u(ks[7], (4 * H,), s)
    wih_b = u(ks[8], (4 * H, Din), s); whh_b = u(ks[9], (4 * H, H), s)
    bih_b = u(ks[10], (4 * H,), s);    bhh_b = u(ks[11], (4 * H,), s)

    lin_bound = 1.0 / jnp.sqrt(2.0 * H)
    cls_w = u(ks[12], (Cn, 2 * H), lin_bound)
    cls_b = u(ks[13], (Cn,), lin_bound)

    crf_start = u(ks[14], (Cn,), 0.1)
    crf_end = u(ks[15], (Cn,), 0.1)
    crf_trans = u(jax.random.fold_in(key, 99), (Cn, Cn), 0.1)

    return dict(word_emb=word_emb, char_emb=char_emb,
                conv_w=conv_w, conv_b=conv_b,
                wih_f=wih_f, whh_f=whh_f, b_f=bih_f + bhh_f,
                wih_b=wih_b, whh_b=whh_b, b_b=bih_b + bhh_b,
                cls_w=cls_w, cls_b=cls_b,
                crf_start=crf_start, crf_end=crf_end, crf_trans=crf_trans)


# ----------------------------------------------------------------------------
# One-time weight re-layout (hoisted out of forward(): banded conv weight,
# padded/interleaved gate weights, padded classifier and CRF tensors)
# ----------------------------------------------------------------------------
def prepare_params(params, cfg, char_len):
    Dw = cfg["word_embedding_dim"]
    Cd = cfg["char_embedding_dim"]
    F = cfg["filter_num"]
    W = cfg["char_window_size"]
    H = cfg["lstm_hidden_dim"]
    C = cfg["num_crf_class"]
    L = char_len
    CF = Cd * F
    P = L - W + 1
    G = 4 * GP
    f32 = jnp.float32
    assert 2 * H <= GP and 2 * H <= HP and C <= CP and P >= 1

    # banded grouped-conv weight: Wband[l*Cd + c, p*CF + o] = conv_w[o,0,l-p] iff c == o//F
    r = jnp.arange(L * Cd); li = r // Cd; ci = r % Cd
    q = jnp.arange(P * CF); pi = q // CF; oi = q % CF; gi_ = oi // F
    wofs = li[:, None] - pi[None, :]
    conv_k = params["conv_w"][:, 0, :]                              # (CF, W)
    vals = conv_k[oi[None, :], jnp.clip(wofs, 0, W - 1)]
    valid = (wofs >= 0) & (wofs < W) & (ci[:, None] == gi_[None, :])
    conv_wband = jnp.where(valid, vals, 0.0).astype(f32)            # (L*Cd, P*CF)
    conv_bias = params["conv_b"][None, :].astype(f32)               # (1, CF)

    # gate-padded columns: group gi occupies [gi*GP, gi*GP+GP); fwd at [0,H), bwd at [H,2H)
    def gate_pad_cols(wf, wb):
        out = jnp.zeros((wf.shape[0], G), f32)
        for gi in range(4):
            out = out.at[:, gi * GP:gi * GP + H].set(wf[:, gi * H:(gi + 1) * H])
            out = out.at[:, gi * GP + H:gi * GP + 2 * H].set(wb[:, gi * H:(gi + 1) * H])
        return out

    wih_all = gate_pad_cols(params["wih_f"].T, params["wih_b"].T)   # (Din, G)
    wih_w = wih_all[:Dw, :]                                         # word-embedding rows
    wih_c = wih_all[Dw:, :]                                         # char-CNN rows
    b_gates = gate_pad_cols(params["b_f"][None, :], params["b_b"][None, :])   # (1, G)

    whh = jnp.zeros((HP, G), f32)
    whh_f_T = params["whh_f"].T
    whh_b_T = params["whh_b"].T
    for gi in range(4):
        whh = whh.at[0:H, gi * GP:gi * GP + H].set(whh_f_T[:, gi * H:(gi + 1) * H])
        whh = whh.at[H:2 * H, gi * GP + H:gi * GP + 2 * H].set(whh_b_T[:, gi * H:(gi + 1) * H])

    col = jnp.arange(G)
    dirsel = ((col % GP) < H).astype(f32)[None, :]                  # 1.0 -> forward columns

    # classifier padded to (HP, CP); padded class columns forced to -1e30 via the bias
    wcls_f = jnp.zeros((HP, CP), f32).at[0:H, 0:C].set(params["cls_w"][:, 0:H].T)
    wcls_b = jnp.zeros((HP, CP), f32).at[H:2 * H, 0:C].set(params["cls_w"][:, H:2 * H].T)
    cls_b_pad = jnp.full((1, CP), -1e30, f32).at[0, 0:C].set(params["cls_b"])

    trans_pad = jnp.zeros((CP, CP), f32).at[0:C, 0:C].set(params["crf_trans"])
    start_pad = jnp.zeros((1, CP), f32).at[0, 0:C].set(params["crf_start"])
    end_pad = jnp.zeros((1, CP), f32).at[0, 0:C].set(params["crf_end"])

    return dict(word_emb=params["word_emb"], char_emb=params["char_emb"],
                conv_wband=conv_wband, conv_bias=conv_bias,
                wih_w=wih_w, wih_c=wih_c, b_gates=b_gates, whh=whh, dirsel=dirsel,
                wcls_f=wcls_f, wcls_b=wcls_b, cls_b_pad=cls_b_pad,
                trans_pad=trans_pad, transT_pad=trans_pad.T,
                start_pad=start_pad, end_pad=end_pad)


# ----------------------------------------------------------------------------
# Full forward pass (== BiLSTM_CNN_CRF.forward with labels, pack_unpack=False,
# eval-mode dropout).  Returns (loss, decoded_tags).
# ----------------------------------------------------------------------------
@jax.jit
def forward(prep, token_ids, char_token_ids, labels, attention_masks):
    B, S = token_ids.shape
    L = char_token_ids.shape[2]

    word = prep["word_emb"][token_ids]                        # (B, S, Dw)  gather glue
    char = prep["char_emb"][char_token_ids]                   # (B, S, L, Cd)
    Dw = word.shape[-1]
    Cd = char.shape[-1]

    # time-major flatten (row index = t*B + b)
    word_tm = jnp.transpose(word, (1, 0, 2)).reshape(S * B, Dw)
    char_tm = jnp.transpose(char, (1, 0, 2, 3)).reshape(S * B, L * Cd)
    tags_tm = jnp.transpose(labels.astype(jnp.int32), (1, 0)).reshape(S * B, 1)
    mask_tm = jnp.transpose(attention_masks.astype(jnp.float32), (1, 0)).reshape(S * B, 1)

    llh, decoded = fused_bilstm_cnn_crf(
        word_tm, char_tm, tags_tm, mask_tm,
        prep["conv_wband"], prep["conv_bias"],
        prep["wih_w"], prep["wih_c"], prep["b_gates"], prep["whh"], prep["dirsel"],
        prep["wcls_f"], prep["wcls_b"], prep["cls_b_pad"],
        prep["trans_pad"], prep["transT_pad"], prep["start_pad"], prep["end_pad"],
        T=S, B=B)

    loss = -jnp.mean(llh)                                     # torchcrf reduction='mean'
    return loss, decoded


# ----------------------------------------------------------------------------
if __name__ == "__main__":
    cfg = dict(
        vocab_size=50, word_embedding_dim=16,
        char_size=30, char_embedding_dim=8,
        filter_num=3, char_window_size=3,
        lstm_hidden_dim=32, num_bilstm_layers=1,
        num_crf_class=5, dropout_prob=0.1,
    )
    B, S, L = 2, 8, 6

    key = jax.random.PRNGKey(0)
    kp, k1, k2, k3 = jax.random.split(key, 4)
    params = init_params(kp, cfg)
    prep = prepare_params(params, cfg, char_len=L)            # one-time weight re-layout

    token_ids = jax.random.randint(k1, (B, S), 0, cfg["vocab_size"], jnp.int32)
    char_token_ids = jax.random.randint(k2, (B, S, L), 0, cfg["char_size"], jnp.int32)
    labels = jax.random.randint(k3, (B, S), 0, cfg["num_crf_class"], jnp.int32)
    lengths = jnp.array([S, 5], dtype=jnp.int32)
    attention_masks = (jnp.arange(S)[None, :] < lengths[:, None]).astype(jnp.float32)

    loss, decoded = forward(prep, token_ids, char_token_ids, labels, attention_masks)
    loss = jax.block_until_ready(loss)
    decoded = jax.block_until_ready(decoded)

    assert jnp.isfinite(loss)
    assert float(loss) >= 0.0                                 # -mean(llh), llh <= 0 always
    assert decoded.shape == (B, S)
    assert bool(jnp.all((decoded >= 0) & (decoded < cfg["num_crf_class"])))
    print("KERNEL_OK")
</pallas_src>

<mosaic_0001>
module attributes {stable_mosaic.version = 11 : i64} {
  func.func @kernel(%arg0: memref<16x16xf32, #tpu.memory_space<vmem>>, %arg1: memref<16x48xf32, #tpu.memory_space<vmem>>, %arg2: memref<16x1xi32, #tpu.memory_space<vmem>>, %arg3: memref<16x1xf32, #tpu.memory_space<vmem>>, %arg4: memref<48x96xf32, #tpu.memory_space<vmem>>, %arg5: memref<1x24xf32, #tpu.memory_space<vmem>>, %arg6: memref<16x512xf32, #tpu.memory_space<vmem>>, %arg7: memref<24x512xf32, #tpu.memory_space<vmem>>, %arg8: memref<1x512xf32, #tpu.memory_space<vmem>>, %arg9: memref<128x512xf32, #tpu.memory_space<vmem>>, %arg10: memref<1x512xf32, #tpu.memory_space<vmem>>, %arg11: memref<128x8xf32, #tpu.memory_space<vmem>>, %arg12: memref<128x8xf32, #tpu.memory_space<vmem>>, %arg13: memref<1x8xf32, #tpu.memory_space<vmem>>, %arg14: memref<8x8xf32, #tpu.memory_space<vmem>>, %arg15: memref<8x8xf32, #tpu.memory_space<vmem>>, %arg16: memref<1x8xf32, #tpu.memory_space<vmem>>, %arg17: memref<1x8xf32, #tpu.memory_space<vmem>>, %arg18: memref<2x1xf32, #tpu.memory_space<vmem>>, %arg19: memref<2x8xi32, #tpu.memory_space<vmem>>, %arg20: memref<16x512xf32, #tpu.memory_space<vmem>>, %arg21: memref<16x128xf32, #tpu.memory_space<vmem>>, %arg22: memref<16x128xf32, #tpu.memory_space<vmem>>) attributes {dimension_semantics = [], scalar_prefetch = 0 : i64, scratch_operands = 3 : i64, tpu.core_type = #tpu.core_type<tc>} {
    %c0 = arith.constant 0 : index
    %c0_0 = arith.constant 0 : index
    %0 = vector.load %arg1[%c0, %c0_0] : memref<16x48xf32, #tpu.memory_space<vmem>>, vector<16x48xf32>
    %c0_1 = arith.constant 0 : index
    %c0_2 = arith.constant 0 : index
    %1 = vector.load %arg4[%c0_1, %c0_2] : memref<48x96xf32, #tpu.memory_space<vmem>>, vector<48x96xf32>
    %cst = arith.constant dense<0.000000e+00> : vector<16x96xf32>
    %2 = tpu.matmul %0, %1, %cst {dimension_numbers = #tpu.dot_dimension_numbers<[1], [0], [0], [1], [0, 0, 1, 1], [], []>} : vector<16x48xf32>, vector<48x96xf32>, vector<16x96xf32> -> vector<16x96xf32>
    %3 = vector.extract_strided_slice %2 {offsets = [0, 0], sizes = [16, 24], strides = [1, 1]} : vector<16x96xf32> to vector<16x24xf32>
    %4 = vector.extract_strided_slice %2 {offsets = [0, 24], sizes = [16, 24], strides = [1, 1]} : vector<16x96xf32> to vector<16x24xf32>
    %5 = arith.maximumf %3, %4 : vector<16x24xf32>
    %6 = vector.extract_strided_slice %2 {offsets = [0, 48], sizes = [16, 24], strides = [1, 1]} : vector<16x96xf32> to vector<16x24xf32>
    %7 = arith.maximumf %5, %6 : vector<16x24xf32>
    %8 = vector.extract_strided_slice %2 {offsets = [0, 72], sizes = [16, 24], strides = [1, 1]} : vector<16x96xf32> to vector<16x24xf32>
    %9 = arith.maximumf %7, %8 : vector<16x24xf32>
    %c0_3 = arith.constant 0 : index
    %c0_4 = arith.constant 0 : index
    %10 = vector.load %arg5[%c0_3, %c0_4] : memref<1x24xf32, #tpu.memory_space<vmem>>, vector<1x24xf32>
    %11 = vector.broadcast %10 : vector<1x24xf32> to vector<16x24xf32>
    %12 = arith.addf %9, %11 : vector<16x24xf32>
    %c0_5 = arith.constant 0 : index
    %c0_6 = arith.constant 0 : index
    %13 = vector.load %arg0[%c0_5, %c0_6] : memref<16x16xf32, #tpu.memory_space<vmem>>, vector<16x16xf32>
    %c0_7 = arith.constant 0 : index
    %c0_8 = arith.constant 0 : index
    %14 = vector.load %arg6[%c0_7, %c0_8] : memref<16x512xf32, #tpu.memory_space<vmem>>, vector<16x512xf32>
    %cst_9 = arith.constant dense<0.000000e+00> : vector<16x512xf32>
    %15 = tpu.matmul %13, %14, %cst_9 {dimension_numbers = #tpu.dot_dimension_numbers<[1], [0], [0], [1], [0, 0, 1, 1], [], []>} : vector<16x16xf32>, vector<16x512xf32>, vector<16x512xf32> -> vector<16x512xf32>
    %c0_10 = arith.constant 0 : index
    %c0_11 = arith.constant 0 : index
    %16 = vector.load %arg7[%c0_10, %c0_11] : memref<24x512xf32, #tpu.memory_space<vmem>>, vector<24x512xf32>
    %cst_12 = arith.constant dense<0.000000e+00> : vector<16x512xf32>
    %17 = tpu.matmul %12, %16, %cst_12 {dimension_numbers = #tpu.dot_dimension_numbers<[1], [0], [0], [1], [0, 0, 1, 1], [], []>} : vector<16x24xf32>, vector<24x512xf32>, vector<16x512xf32> -> vector<16x512xf32>
    %18 = arith.addf %15, %17 : vector<16x512xf32>
    %c0_13 = arith.constant 0 : index
    %c0_14 = arith.constant 0 : index
    %19 = vector.load %arg8[%c0_13, %c0_14] : memref<1x512xf32, #tpu.memory_space<vmem>>, vector<1x512xf32>
    %20 = vector.broadcast %19 : vector<1x512xf32> to vector<16x512xf32>
    %21 = arith.addf %18, %20 : vector<16x512xf32>
    %c0_15 = arith.constant 0 : index
    %c0_16 = arith.constant 0 : index
    %22 = vector.load %arg20[%c0_15, %c0_16] : memref<16x512xf32, #tpu.memory_space<vmem>>, vector<16x512xf32>
    tpu.vector_store %arg20[%c0_15, %c0_16], %21 {strides = array<i32>} : memref<16x512xf32, #tpu.memory_space<vmem>>, vector<16x512xf32>,
    %c0_17 = arith.constant 0 : index
    %c0_18 = arith.constant 0 : index
    %23 = vector.load %arg9[%c0_17, %c0_18] : memref<128x512xf32, #tpu.memory_space<vmem>>, vector<128x512xf32>
    %c0_19 = arith.constant 0 : index
    %c0_20 = arith.constant 0 : index
    %24 = vector.load %arg10[%c0_19, %c0_20] : memref<1x512xf32, #tpu.memory_space<vmem>>, vector<1x512xf32>
    %cst_21 = arith.constant 0.000000e+00 : f32
    %25 = vector.broadcast %cst_21 : f32 to vector<1x512xf32>
    %26 = arith.cmpf ogt, %24, %25 : vector<1x512xf32>
    %cst_22 = arith.constant 0.000000e+00 : f32
    %27 = vector.broadcast %cst_22 : f32 to vector<2x128xf32>
    %cst_23 = arith.constant 0.000000e+00 : f32
    %28 = vector.broadcast %cst_23 : f32 to vector<2x128xf32>
    %cst_24 = arith.constant dense<0.000000e+00> : vector<2x512xf32>
    %29 = tpu.matmul %27, %23, %cst_24 {dimension_numbers = #tpu.dot_dimension_numbers<[1], [0], [0], [1], [0, 0, 1, 1], [], []>} : vector<2x128xf32>, vector<128x512xf32>, vector<2x512xf32> -> vector<2x512xf32>
    %c0_25 = arith.constant 0 : index
    %c0_26 = arith.constant 0 : index
    %30 = vector.load %arg20[%c0_25, %c0_26] : memref<16x512xf32, #tpu.memory_space<vmem>>, vector<2x512xf32>
    %c14 = arith.constant 14 : index
    %c0_27 = arith.constant 0 : index
    %31 = vector.load %arg20[%c14, %c0_27] : memref<16x512xf32, #tpu.memory_space<vmem>>, vector<2x512xf32>
    %32 = vector.shape_cast %26 : vector<1x512xi1> to vector<1x512xi1>
    %33 = vector.broadcast %32 : vector<1x512xi1> to vector<2x512xi1>
    %34 = arith.select %33, %30, %31 : vector<2x512xi1>, vector<2x512xf32>
    %35 = arith.addf %34, %29 : vector<2x512xf32>
    %36 = vector.extract_strided_slice %35 {offsets = [0, 0], sizes = [2, 128], strides = [1, 1]} : vector<2x512xf32> to vector<2x128xf32>
    %cst_28 = arith.constant 0.000000e+00 : f32
    %37 = vector.broadcast %cst_28 : f32 to vector<2x128xf32>
    %38 = arith.subf %37, %36 : vector<2x128xf32>
    %39 = math.exp %38 : vector<2x128xf32>
    %cst_29 = arith.constant 1.000000e+00 : f32
    %40 = vector.broadcast %cst_29 : f32 to vector<2x128xf32>
    %41 = arith.addf %40, %39 : vector<2x128xf32>
    %cst_30 = arith.constant 1.000000e+00 : f32
    %42 = vector.broadcast %cst_30 : f32 to vector<2x128xf32>
    %43 = arith.divf %42, %41 : vector<2x128xf32>
    %44 = vector.extract_strided_slice %35 {offsets = [0, 128], sizes = [2, 128], strides = [1, 1]} : vector<2x512xf32> to vector<2x128xf32>
    %cst_31 = arith.constant 0.000000e+00 : f32
    %45 = vector.broadcast %cst_31 : f32 to vector<2x128xf32>
    %46 = arith.subf %45, %44 : vector<2x128xf32>
    %47 = math.exp %46 : vector<2x128xf32>
    %cst_32 = arith.constant 1.000000e+00 : f32
    %48 = vector.broadcast %cst_32 : f32 to vector<2x128xf32>
    %49 = arith.addf %48, %47 : vector<2x128xf32>
    %cst_33 = arith.constant 1.000000e+00 : f32
    %50 = vector.broadcast %cst_33 : f32 to vector<2x128xf32>
    %51 = arith.divf %50, %49 : vector<2x128xf32>
    %52 = vector.extract_strided_slice %35 {offsets = [0, 256], sizes = [2, 128], strides = [1, 1]} : vector<2x512xf32> to vector<2x128xf32>
    %53 = math.tanh %52 : vector<2x128xf32>
    %54 = vector.extract_strided_slice %35 {offsets = [0, 384], sizes = [2, 128], strides = [1, 1]} : vector<2x512xf32> to vector<2x128xf32>
    %cst_34 = arith.constant 0.000000e+00 : f32
    %55 = vector.broadcast %cst_34 : f32 to vector<2x128xf32>
    %56 = arith.subf %55, %54 : vector<2x128xf32>
    %57 = math.exp %56 : vector<2x128xf32>
    %cst_35 = arith.constant 1.000000e+00 : f32
    %58 = vector.broadcast %cst_35 : f32 to vector<2x128xf32>
    %59 = arith.addf %58, %57 : vector<2x128xf32>
    %cst_36 = arith.constant 1.000000e+00 : f32
    %60 = vector.broadcast %cst_36 : f32 to vector<2x128xf32>
    %61 = arith.divf %60, %59 : vector<2x128xf32>
    %62 = arith.mulf %51, %28 : vector<2x128xf32>
    %63 = arith.mulf %43, %53 : vector<2x128xf32>
    %64 = arith.addf %62, %63 : vector<2x128xf32>
    %65 = math.tanh %64 : vector<2x128xf32>
    %66 = arith.mulf %61, %65 : vector<2x128xf32>
    %c0_37 = arith.constant 0 : index
    %c0_38 = arith.constant 0 : index
    %67 = vector.load %arg21[%c0_37, %c0_38] : memref<16x128xf32, #tpu.memory_space<vmem>>, vector<2x128xf32>
    tpu.vector_store %arg21[%c0_37, %c0_38], %66 {strides = array<i32>} : memref<16x128xf32, #tpu.memory_space<vmem>>, vector<2x128xf32>,
    %c14_39 = arith.constant 14 : index
    %c0_40 = arith.constant 0 : index
    %68 = vector.load %arg22[%c14_39, %c0_40] : memref<16x128xf32, #tpu.memory_space<vmem>>, vector<2x128xf32>
    tpu.vector_store %arg22[%c14_39, %c0_40], %66 {strides = array<i32>} : memref<16x128xf32, #tpu.memory_space<vmem>>, vector<2x128xf32>,
    %cst_41 = arith.constant dense<0.000000e+00> : vector<2x512xf32>
    %69 = tpu.matmul %66, %23, %cst_41 {dimension_numbers = #tpu.dot_dimension_numbers<[1], [0], [0], [1], [0, 0, 1, 1], [], []>} : vector<2x128xf32>, vector<128x512xf32>, vector<2x512xf32> -> vector<2x512xf32>
    %c2 = arith.constant 2 : index
    %c0_42 = arith.constant 0 : index
    %70 = vector.load %arg20[%c2, %c0_42] : memref<16x512xf32, #tpu.memory_space<vmem>>, vector<2x512xf32>
    %c12 = arith.constant 12 : index
    %c0_43 = arith.constant 0 : index
    %71 = vector.load %arg20[%c12, %c0_43] : memref<16x512xf32, #tpu.memory_space<vmem>>, vector<2x512xf32>
    %72 = vector.shape_cast %26 : vector<1x512xi1> to vector<1x512xi1>
    %73 = vector.broadcast %72 : vector<1x512xi1> to vector<2x512xi1>
    %74 = arith.select %73, %70, %71 : vector<2x512xi1>, vector<2x512xf32>
    %75 = arith.addf %74, %69 : vector<2x512xf32>
    %76 = vector.extract_strided_slice %75 {offsets = [0, 0], sizes = [2, 128], strides = [1, 1]} : vector<2x512xf32> to vector<2x128xf32>
    %cst_44 = arith.constant 0.000000e+00 : f32
    %77 = vector.broadcast %cst_44 : f32 to vector<2x128xf32>
    %78 = arith.subf %77, %76 : vector<2x128xf32>
    %79 = math.exp %78 : vector<2x128xf32>
    %cst_45 = arith.constant 1.000000e+00 : f32
    %80 = vector.broadcast %cst_45 : f32 to vector<2x128xf32>
    %81 = arith.addf %80, %79 : vector<2x128xf32>
    %cst_46 = arith.constant 1.000000e+00 : f32
    %82 = vector.broadcast %cst_46 : f32 to vector<2x128xf32>
    %83 = arith.divf %82, %81 : vector<2x128xf32>
    %84 = vector.extract_strided_slice %75 {offsets = [0, 128], sizes = [2, 128], strides = [1, 1]} : vector<2x512xf32> to vector<2x128xf32>
    %cst_47 = arith.constant 0.000000e+00 : f32
    %85 = vector.broadcast %cst_47 : f32 to vector<2x128xf32>
    %86 = arith.subf %85, %84 : vector<2x128xf32>
    %87 = math.exp %86 : vector<2x128xf32>
    %cst_48 = arith.constant 1.000000e+00 : f32
    %88 = vector.broadcast %cst_48 : f32 to vector<2x128xf32>
    %89 = arith.addf %88, %87 : vector<2x128xf32>
    %cst_49 = arith.constant 1.000000e+00 : f32
    %90 = vector.broadcast %cst_49 : f32 to vector<2x128xf32>
    %91 = arith.divf %90, %89 : vector<2x128xf32>
    %92 = vector.extract_strided_slice %75 {offsets = [0, 256], sizes = [2, 128], strides = [1, 1]} : vector<2x512xf32> to vector<2x128xf32>
    %93 = math.tanh %92 : vector<2x128xf32>
    %94 = vector.extract_strided_slice %75 {offsets = [0, 384], sizes = [2, 128], strides = [1, 1]} : vector<2x512xf32> to vector<2x128xf32>
    %cst_50 = arith.constant 0.000000e+00 : f32
    %95 = vector.broadcast %cst_50 : f32 to vector<2x128xf32>
    %96 = arith.subf %95, %94 : vector<2x128xf32>
    %97 = math.exp %96 : vector<2x128xf32>
    %cst_51 = arith.constant 1.000000e+00 : f32
    %98 = vector.broadcast %cst_51 : f32 to vector<2x128xf32>
    %99 = arith.addf %98, %97 : vector<2x128xf32>
    %cst_52 = arith.constant 1.000000e+00 : f32
    %100 = vector.broadcast %cst_52 : f32 to vector<2x128xf32>
    %101 = arith.divf %100, %99 : vector<2x128xf32>
    %102 = arith.mulf %91, %64 : vector<2x128xf32>
    %103 = arith.mulf %83, %93 : vector<2x128xf32>
    %104 = arith.addf %102, %103 : vector<2x128xf32>
    %105 = math.tanh %104 : vector<2x128xf32>
    %106 = arith.mulf %101, %105 : vector<2x128xf32>
    %c2_53 = arith.constant 2 : index
    %c0_54 = arith.constant 0 : index
    %107 = vector.load %arg21[%c2_53, %c0_54] : memref<16x128xf32, #tpu.memory_space<vmem>>, vector<2x128xf32>
    tpu.vector_store %arg21[%c2_53, %c0_54], %106 {strides = array<i32>} : memref<16x128xf32, #tpu.memory_space<vmem>>, vector<2x128xf32>,
    %c12_55 = arith.constant 12 : index
    %c0_56 = arith.constant 0 : index
    %108 = vector.load %arg22[%c12_55, %c0_56] : memref<16x128xf32, #tpu.memory_space<vmem>>, vector<2x128xf32>
    tpu.vector_store %arg22[%c12_55, %c0_56], %106 {strides = array<i32>} : memref<16x128xf32, #tpu.memory_space<vmem>>, vector<2x128xf32>,
    %cst_57 = arith.constant dense<0.000000e+00> : vector<2x512xf32>
    %109 = tpu.matmul %106, %23, %cst_57 {dimension_numbers = #tpu.dot_dimension_numbers<[1], [0], [0], [1], [0, 0, 1, 1], [], []>} : vector<2x128xf32>, vector<128x512xf32>, vector<2x512xf32> -> vector<2x512xf32>
    %c4 = arith.constant 4 : index
    %c0_58 = arith.constant 0 : index
    %110 = vector.load %arg20[%c4, %c0_58] : memref<16x512xf32, #tpu.memory_space<vmem>>, vector<2x512xf32>
    %c10 = arith.constant 10 : index
    %c0_59 = arith.constant 0 : index
    %111 = vector.load %arg20[%c10, %c0_59] : memref<16x512xf32, #tpu.memory_space<vmem>>, vector<2x512xf32>
    %112 = vector.shape_cast %26 : vector<1x512xi1> to vector<1x512xi1>
    %113 = vector.broadcast %112 : vector<1x512xi1> to vector<2x512xi1>
    %114 = arith.select %113, %110, %111 : vector<2x512xi1>, vector<2x512xf32>
    %115 = arith.addf %114, %109 : vector<2x512xf32>
    %116 = vector.extract_strided_slice %115 {offsets = [0, 0], sizes = [2, 128], strides = [1, 1]} : vector<2x512xf32> to vector<2x128xf32>
    %cst_60 = arith.constant 0.000000e+00 : f32
    %117 = vector.broadcast %cst_60 : f32 to vector<2x128xf32>
    %118 = arith.subf %117, %116 : vector<2x128xf32>
    %119 = math.exp %118 : vector<2x128xf32>
    %cst_61 = arith.constant 1.000000e+00 : f32
    %120 = vector.broadcast %cst_61 : f32 to vector<2x128xf32>
    %121 = arith.addf %120, %119 : vector<2x128xf32>
    %cst_62 = arith.constant 1.000000e+00 : f32
    %122 = vector.broadcast %cst_62 : f32 to vector<2x128xf32>
    %123 = arith.divf %122, %121 : vector<2x128xf32>
    %124 = vector.extract_strided_slice %115 {offsets = [0, 128], sizes = [2, 128], strides = [1, 1]} : vector<2x512xf32> to vector<2x128xf32>
    %cst_63 = arith.constant 0.000000e+00 : f32
    %125 = vector.broadcast %cst_63 : f32 to vector<2x128xf32>
    %126 = arith.subf %125, %124 : vector<2x128xf32>
    %127 = math.exp %126 : vector<2x128xf32>
    %cst_64 = arith.constant 1.000000e+00 : f32
    %128 = vector.broadcast %cst_64 : f32 to vector<2x128xf32>
    %129 = arith.addf %128, %127 : vector<2x128xf32>
    %cst_65 = arith.constant 1.000000e+00 : f32
    %130 = vector.broadcast %cst_65 : f32 to vector<2x128xf32>
    %131 = arith.divf %130, %129 : vector<2x128xf32>
    %132 = vector.extract_strided_slice %115 {offsets = [0, 256], sizes = [2, 128], strides = [1, 1]} : vector<2x512xf32> to vector<2x128xf32>
    %133 = math.tanh %132 : vector<2x128xf32>
    %134 = vector.extract_strided_slice %115 {offsets = [0, 384], sizes = [2, 128], strides = [1, 1]} : vector<2x512xf32> to vector<2x128xf32>
    %cst_66 = arith.constant 0.000000e+00 : f32
    %135 = vector.broadcast %cst_66 : f32 to vector<2x128xf32>
    %136 = arith.subf %135, %134 : vector<2x128xf32>
    %137 = math.exp %136 : vector<2x128xf32>
    %cst_67 = arith.constant 1.000000e+00 : f32
    %138 = vector.broadcast %cst_67 : f32 to vector<2x128xf32>
    %139 = arith.addf %138, %137 : vector<2x128xf32>
    %cst_68 = arith.constant 1.000000e+00 : f32
    %140 = vector.broadcast %cst_68 : f32 to vector<2x128xf32>
    %141 = arith.divf %140, %139 : vector<2x128xf32>
    %142 = arith.mulf %131, %104 : vector<2x128xf32>
    %143 = arith.mulf %123, %133 : vector<2x128xf32>
    %144 = arith.addf %142, %143 : vector<2x128xf32>
    %145 = math.tanh %144 : vector<2x128xf32>
    %146 = arith.mulf %141, %145 : vector<2x128xf32>
    %c4_69 = arith.constant 4 : index
    %c0_70 = arith.constant 0 : index
    %147 = vector.load %arg21[%c4_69, %c0_70] : memref<16x128xf32, #tpu.memory_space<vmem>>, vector<2x128xf32>
    tpu.vector_store %arg21[%c4_69, %c0_70], %146 {strides = array<i32>} : memref<16x128xf32, #tpu.memory_space<vmem>>, vector<2x128xf32>,
    %c10_71 = arith.constant 10 : index
    %c0_72 = arith.constant 0 : index
    %148 = vector.load %arg22[%c10_71, %c0_72] : memref<16x128xf32, #tpu.memory_space<vmem>>, vector<2x128xf32>
    tpu.vector_store %arg22[%c10_71, %c0_72], %146 {strides = array<i32>} : memref<16x128xf32, #tpu.memory_space<vmem>>, vector<2x128xf32>,
    %cst_73 = arith.constant dense<0.000000e+00> : vector<2x512xf32>
    %149 = tpu.matmul %146, %23, %cst_73 {dimension_numbers = #tpu.dot_dimension_numbers<[1], [0], [0], [1], [0, 0, 1, 1], [], []>} : vector<2x128xf32>, vector<128x512xf32>, vector<2x512xf32> -> vector<2x512xf32>
    %c6 = arith.constant 6 : index
    %c0_74 = arith.constant 0 : index
    %150 = vector.load %arg20[%c6, %c0_74] : memref<16x512xf32, #tpu.memory_space<vmem>>, vector<2x512xf32>
    %c8 = arith.constant 8 : index
    %c0_75 = arith.constant 0 : index
    %151 = vector.load %arg20[%c8, %c0_75] : memref<16x512xf32, #tpu.memory_space<vmem>>, vector<2x512xf32>
    %152 = vector.shape_cast %26 : vector<1x512xi1> to vector<1x512xi1>
    %153 = vector.broadcast %152 : vector<1x512xi1> to vector<2x512xi1>
    %154 = arith.select %153, %150, %151 : vector<2x512xi1>, vector<2x512xf32>
    %155 = arith.addf %154, %149 : vector<2x512xf32>
    %156 = vector.extract_strided_slice %155 {offsets = [0, 0], sizes = [2, 128], strides = [1, 1]} : vector<2x512xf32> to vector<2x128xf32>
    %cst_76 = arith.constant 0.000000e+00 : f32
    %157 = vector.broadcast %cst_76 : f32 to vector<2x128xf32>
    %158 = arith.subf %157, %156 : vector<2x128xf32>
    %159 = math.exp %158 : vector<2x128xf32>
    %cst_77 = arith.constant 1.000000e+00 : f32
    %160 = vector.broadcast %cst_77 : f32 to vector<2x128xf32>
    %161 = arith.addf %160, %159 : vector<2x128xf32>
    %cst_78 = arith.constant 1.000000e+00 : f32
    %162 = vector.broadcast %cst_78 : f32 to vector<2x128xf32>
    %163 = arith.divf %162, %161 : vector<2x128xf32>
    %164 = vector.extract_strided_slice %155 {offsets = [0, 128], sizes = [2, 128], strides = [1, 1]} : vector<2x512xf32> to vector<2x128xf32>
    %cst_79 = arith.constant 0.000000e+00 : f32
    %165 = vector.broadcast %cst_79 : f32 to vector<2x128xf32>
    %166 = arith.subf %165, %164 : vector<2x128xf32>
    %167 = math.exp %166 : vector<2x128xf32>
    %cst_80 = arith.constant 1.000000e+00 : f32
    %168 = vector.broadcast %cst_80 : f32 to vector<2x128xf32>
    %169 = arith.addf %168, %167 : vector<2x128xf32>
    %cst_81 = arith.constant 1.000000e+00 : f32
    %170 = vector.broadcast %cst_81 : f32 to vector<2x128xf32>
    %171 = arith.divf %170, %169 : vector<2x128xf32>
    %172 = vector.extract_strided_slice %155 {offsets = [0, 256], sizes = [2, 128], strides = [1, 1]} : vector<2x512xf32> to vector<2x128xf32>
    %173 = math.tanh %172 : vector<2x128xf32>
    %174 = vector.extract_strided_slice %155 {offsets = [0, 384], sizes = [2, 128], strides = [1, 1]} : vector<2x512xf32> to vector<2x128xf32>
    %cst_82 = arith.constant 0.000000e+00 : f32
    %175 = vector.broadcast %cst_82 : f32 to vector<2x128xf32>
    %176 = arith.subf %175, %174 : vector<2x128xf32>
    %177 = math.exp %176 : vector<2x128xf32>
    %cst_83 = arith.constant 1.000000e+00 : f32
    %178 = vector.broadcast %cst_83 : f32 to vector<2x128xf32>
    %179 = arith.addf %178, %177 : vector<2x128xf32>
    %cst_84 = arith.constant 1.000000e+00 : f32
    %180 = vector.broadcast %cst_84 : f32 to vector<2x128xf32>
    %181 = arith.divf %180, %179 : vector<2x128xf32>
    %182 = arith.mulf %171, %144 : vector<2x128xf32>
    %183 = arith.mulf %163, %173 : vector<2x128xf32>
    %184 = arith.addf %182, %183 : vector<2x128xf32>
    %185 = math.tanh %184 : vector<2x128xf32>
    %186 = arith.mulf %181, %185 : vector<2x128xf32>
    %c6_85 = arith.constant 6 : index
    %c0_86 = arith.constant 0 : index
    %187 = vector.load %arg21[%c6_85, %c0_86] : memref<16x128xf32, #tpu.memory_space<vmem>>, vector<2x128xf32>
    tpu.vector_store %arg21[%c6_85, %c0_86], %186 {strides = array<i32>} : memref<16x128xf32, #tpu.memory_space<vmem>>, vector<2x128xf32>,
    %c8_87 = arith.constant 8 : index
    %c0_88 = arith.constant 0 : index
    %188 = vector.load %arg22[%c8_87, %c0_88] : memref<16x128xf32, #tpu.memory_space<vmem>>, vector<2x128xf32>
    tpu.vector_store %arg22[%c8_87, %c0_88], %186 {strides = array<i32>} : memref<16x128xf32, #tpu.memory_space<vmem>>, vector<2x128xf32>,
    %cst_89 = arith.constant dense<0.000000e+00> : vector<2x512xf32>
    %189 = tpu.matmul %186, %23, %cst_89 {dimension_numbers = #tpu.dot_dimension_numbers<[1], [0], [0], [1], [0, 0, 1, 1], [], []>} : vector<2x128xf32>, vector<128x512xf32>, vector<2x512xf32> -> vector<2x512xf32>
    %c8_90 = arith.constant 8 : index
    %c0_91 = arith.constant 0 : index
    %190 = vector.load %arg20[%c8_90, %c0_91] : memref<16x512xf32, #tpu.memory_space<vmem>>, vector<2x512xf32>
    %c6_92 = arith.constant 6 : index
    %c0_93 = arith.constant 0 : index
    %191 = vector.load %arg20[%c6_92, %c0_93] : memref<16x512xf32, #tpu.memory_space<vmem>>, vector<2x512xf32>
    %192 = vector.shape_cast %26 : vector<1x512xi1> to vector<1x512xi1>
    %193 = vector.broadcast %192 : vector<1x512xi1> to vector<2x512xi1>
    %194 = arith.select %193, %190, %191 : vector<2x512xi1>, vector<2x512xf32>
    %195 = arith.addf %194, %189 : vector<2x512xf32>
    %196 = vector.extract_strided_slice %195 {offsets = [0, 0], sizes = [2, 128], strides = [1, 1]} : vector<2x512xf32> to vector<2x128xf32>
    %cst_94 = arith.constant 0.000000e+00 : f32
    %197 = vector.broadcast %cst_94 : f32 to vector<2x128xf32>
    %198 = arith.subf %197, %196 : vector<2x128xf32>
    %199 = math.exp %198 : vector<2x128xf32>
    %cst_95 = arith.constant 1.000000e+00 : f32
    %200 = vector.broadcast %cst_95 : f32 to vector<2x128xf32>
    %201 = arith.addf %200, %199 : vector<2x128xf32>
    %cst_96 = arith.constant 1.000000e+00 : f32
    %202 = vector.broadcast %cst_96 : f32 to vector<2x128xf32>
    %203 = arith.divf %202, %201 : vector<2x128xf32>
    %204 = vector.extract_strided_slice %195 {offsets = [0, 128], sizes = [2, 128], strides = [1, 1]} : vector<2x512xf32> to vector<2x128xf32>
    %cst_97 = arith.constant 0.000000e+00 : f32
    %205 = vector.broadcast %cst_97 : f32 to vector<2x128xf32>
    %206 = arith.subf %205, %204 : vector<2x128xf32>
    %207 = math.exp %206 : vector<2x128xf32>
    %cst_98 = arith.constant 1.000000e+00 : f32
    %208 = vector.broadcast %cst_98 : f32 to vector<2x128xf32>
    %209 = arith.addf %208, %207 : vector<2x128xf32>
    %cst_99 = arith.constant 1.000000e+00 : f32
    %210 = vector.broadcast %cst_99 : f32 to vector<2x128xf32>
    %211 = arith.divf %210, %209 : vector<2x128xf32>
    %212 = vector.extract_strided_slice %195 {offsets = [0, 256], sizes = [2, 128], strides = [1, 1]} : vector<2x512xf32> to vector<2x128xf32>
    %213 = math.tanh %212 : vector<2x128xf32>
    %214 = vector.extract_strided_slice %195 {offsets = [0, 384], sizes = [2, 128], strides = [1, 1]} : vector<2x512xf32> to vector<2x128xf32>
    %cst_100 = arith.constant 0.000000e+00 : f32
    %215 = vector.broadcast %cst_100 : f32 to vector<2x128xf32>
    %216 = arith.subf %215, %214 : vector<2x128xf32>
    %217 = math.exp %216 : vector<2x128xf32>
    %cst_101 = arith.constant 1.000000e+00 : f32
    %218 = vector.broadcast %cst_101 : f32 to vector<2x128xf32>
    %219 = arith.addf %218, %217 : vector<2x128xf32>
    %cst_102 = arith.constant 1.000000e+00 : f32
    %220 = vector.broadcast %cst_102 : f32 to vector<2x128xf32>
    %221 = arith.divf %220, %219 : vector<2x128xf32>
    %222 = arith.mulf %211, %184 : vector<2x128xf32>
    %223 = arith.mulf %203, %213 : vector<2x128xf32>
    %224 = arith.addf %222, %223 : vector<2x128xf32>
    %225 = math.tanh %224 : vector<2x128xf32>
    %226 = arith.mulf %221, %225 : vector<2x128xf32>
    %c8_103 = arith.constant 8 : index
    %c0_104 = arith.constant 0 : index
    %227 = vector.load %arg21[%c8_103, %c0_104] : memref<16x128xf32, #tpu.memory_space<vmem>>, vector<2x128xf32>
    tpu.vector_store %arg21[%c8_103, %c0_104], %226 {strides = array<i32>} : memref<16x128xf32, #tpu.memory_space<vmem>>, vector<2x128xf32>,
    %c6_105 = arith.constant 6 : index
    %c0_106 = arith.constant 0 : index
    %228 = vector.load %arg22[%c6_105, %c0_106] : memref<16x128xf32, #tpu.memory_space<vmem>>, vector<2x128xf32>
    tpu.vector_store %arg22[%c6_105, %c0_106], %226 {strides = array<i32>} : memref<16x128xf32, #tpu.memory_space<vmem>>, vector<2x128xf32>,
    %cst_107 = arith.constant dense<0.000000e+00> : vector<2x512xf32>
    %229 = tpu.matmul %226, %23, %cst_107 {dimension_numbers = #tpu.dot_dimension_numbers<[1], [0], [0], [1], [0, 0, 1, 1], [], []>} : vector<2x128xf32>, vector<128x512xf32>, vector<2x512xf32> -> vector<2x512xf32>
    %c10_108 = arith.constant 10 : index
    %c0_109 = arith.constant 0 : index
    %230 = vector.load %arg20[%c10_108, %c0_109] : memref<16x512xf32, #tpu.memory_space<vmem>>, vector<2x512xf32>
    %c4_110 = arith.constant 4 : index
    %c0_111 = arith.constant 0 : index
    %231 = vector.load %arg20[%c4_110, %c0_111] : memref<16x512xf32, #tpu.memory_space<vmem>>, vector<2x512xf32>
    %232 = vector.shape_cast %26 : vector<1x512xi1> to vector<1x512xi1>
    %233 = vector.broadcast %232 : vector<1x512xi1> to vector<2x512xi1>
    %234 = arith.select %233, %230, %231 : vector<2x512xi1>, vector<2x512xf32>
    %235 = arith.addf %234, %229 : vector<2x512xf32>
    %236 = vector.extract_strided_slice %235 {offsets = [0, 0], sizes = [2, 128], strides = [1, 1]} : vector<2x512xf32> to vector<2x128xf32>
    %cst_112 = arith.constant 0.000000e+00 : f32
    %237 = vector.broadcast %cst_112 : f32 to vector<2x128xf32>
    %238 = arith.subf %237, %236 : vector<2x128xf32>
    %239 = math.exp %238 : vector<2x128xf32>
    %cst_113 = arith.constant 1.000000e+00 : f32
    %240 = vector.broadcast %cst_113 : f32 to vector<2x128xf32>
    %241 = arith.addf %240, %239 : vector<2x128xf32>
    %cst_114 = arith.constant 1.000000e+00 : f32
    %242 = vector.broadcast %cst_114 : f32 to vector<2x128xf32>
    %243 = arith.divf %242, %241 : vector<2x128xf32>
    %244 = vector.extract_strided_slice %235 {offsets = [0, 128], sizes = [2, 128], strides = [1, 1]} : vector<2x512xf32> to vector<2x128xf32>
    %cst_115 = arith.constant 0.000000e+00 : f32
    %245 = vector.broadcast %cst_115 : f32 to vector<2x128xf32>
    %246 = arith.subf %245, %244 : vector<2x128xf32>
    %247 = math.exp %246 : vector<2x128xf32>
    %cst_116 = arith.constant 1.000000e+00 : f32
    %248 = vector.broadcast %cst_116 : f32 to vector<2x128xf32>
    %249 = arith.addf %248, %247 : vector<2x128xf32>
    %cst_117 = arith.constant 1.000000e+00 : f32
    %250 = vector.broadcast %cst_117 : f32 to vector<2x128xf32>
    %251 = arith.divf %250, %249 : vector<2x128xf32>
    %252 = vector.extract_strided_slice %235 {offsets = [0, 256], sizes = [2, 128], strides = [1, 1]} : vector<2x512xf32> to vector<2x128xf32>
    %253 = math.tanh %252 : vector<2x128xf32>
    %254 = vector.extract_strided_slice %235 {offsets = [0, 384], sizes = [2, 128], strides = [1, 1]} : vector<2x512xf32> to vector<2x128xf32>
    %cst_118 = arith.constant 0.000000e+00 : f32
    %255 = vector.broadcast %cst_118 : f32 to vector<2x128xf32>
    %256 = arith.subf %255, %254 : vector<2x128xf32>
    %257 = math.exp %256 : vector<2x128xf32>
    %cst_119 = arith.constant 1.000000e+00 : f32
    %258 = vector.broadcast %cst_119 : f32 to vector<2x128xf32>
    %259 = arith.addf %258, %257 : vector<2x128xf32>
    %cst_120 = arith.constant 1.000000e+00 : f32
    %260 = vector.broadcast %cst_120 : f32 to vector<2x128xf32>
    %261 = arith.divf %260, %259 : vector<2x128xf32>
    %262 = arith.mulf %251, %224 : vector<2x128xf32>
    %263 = arith.mulf %243, %253 : vector<2x128xf32>
    %264 = arith.addf %262, %263 : vector<2x128xf32>
    %265 = math.tanh %264 : vector<2x128xf32>
    %266 = arith.mulf %261, %265 : vector<2x128xf32>
    %c10_121 = arith.constant 10 : index
    %c0_122 = arith.constant 0 : index
    %267 = vector.load %arg21[%c10_121, %c0_122] : memref<16x128xf32, #tpu.memory_space<vmem>>, vector<2x128xf32>
    tpu.vector_store %arg21[%c10_121, %c0_122], %266 {strides = array<i32>} : memref<16x128xf32, #tpu.memory_space<vmem>>, vector<2x128xf32>,
    %c4_123 = arith.constant 4 : index
    %c0_124 = arith.constant 0 : index
    %268 = vector.load %arg22[%c4_123, %c0_124] : memref<16x128xf32, #tpu.memory_space<vmem>>, vector<2x128xf32>
    tpu.vector_store %arg22[%c4_123, %c0_124], %266 {strides = array<i32>} : memref<16x128xf32, #tpu.memory_space<vmem>>, vector<2x128xf32>,
    %cst_125 = arith.constant dense<0.000000e+00> : vector<2x512xf32>
    %269 = tpu.matmul %266, %23, %cst_125 {dimension_numbers = #tpu.dot_dimension_numbers<[1], [0], [0], [1], [0, 0, 1, 1], [], []>} : vector<2x128xf32>, vector<128x512xf32>, vector<2x512xf32> -> vector<2x512xf32>
    %c12_126 = arith.constant 12 : index
    %c0_127 = arith.constant 0 : index
    %270 = vector.load %arg20[%c12_126, %c0_127] : memref<16x512xf32, #tpu.memory_space<vmem>>, vector<2x512xf32>
    %c2_128 = arith.constant 2 : index
    %c0_129 = arith.constant 0 : index
    %271 = vector.load %arg20[%c2_128, %c0_129] : memref<16x512xf32, #tpu.memory_space<vmem>>, vector<2x512xf32>
    %272 = vector.shape_cast %26 : vector<1x512xi1> to vector<1x512xi1>
    %273 = vector.broadcast %272 : vector<1x512xi1> to vector<2x512xi1>
    %274 = arith.select %273, %270, %271 : vector<2x512xi1>, vector<2x512xf32>
    %275 = arith.addf %274, %269 : vector<2x512xf32>
    %276 = vector.extract_strided_slice %275 {offsets = [0, 0], sizes = [2, 128], strides = [1, 1]} : vector<2x512xf32> to vector<2x128xf32>
    %cst_130 = arith.constant 0.000000e+00 : f32
    %277 = vector.broadcast %cst_130 : f32 to vector<2x128xf32>
    %278 = arith.subf %277, %276 : vector<2x128xf32>
    %279 = math.exp %278 : vector<2x128xf32>
    %cst_131 = arith.constant 1.000000e+00 : f32
    %280 = vector.broadcast %cst_131 : f32 to vector<2x128xf32>
    %281 = arith.addf %280, %279 : vector<2x128xf32>
    %cst_132 = arith.constant 1.000000e+00 : f32
    %282 = vector.broadcast %cst_132 : f32 to vector<2x128xf32>
    %283 = arith.divf %282, %281 : vector<2x128xf32>
    %284 = vector.extract_strided_slice %275 {offsets = [0, 128], sizes = [2, 128], strides = [1, 1]} : vector<2x512xf32> to vector<2x128xf32>
    %cst_133 = arith.constant 0.000000e+00 : f32
    %285 = vector.broadcast %cst_133 : f32 to vector<2x128xf32>
    %286 = arith.subf %285, %284 : vector<2x128xf32>
    %287 = math.exp %286 : vector<2x128xf32>
    %cst_134 = arith.constant 1.000000e+00 : f32
    %288 = vector.broadcast %cst_134 : f32 to vector<2x128xf32>
    %289 = arith.addf %288, %287 : vector<2x128xf32>
    %cst_135 = arith.constant 1.000000e+00 : f32
    %290 = vector.broadcast %cst_135 : f32 to vector<2x128xf32>
    %291 = arith.divf %290, %289 : vector<2x128xf32>
    %292 = vector.extract_strided_slice %275 {offsets = [0, 256], sizes = [2, 128], strides = [1, 1]} : vector<2x512xf32> to vector<2x128xf32>
    %293 = math.tanh %292 : vector<2x128xf32>
    %294 = vector.extract_strided_slice %275 {offsets = [0, 384], sizes = [2, 128], strides = [1, 1]} : vector<2x512xf32> to vector<2x128xf32>
    %cst_136 = arith.constant 0.000000e+00 : f32
    %295 = vector.broadcast %cst_136 : f32 to vector<2x128xf32>
    %296 = arith.subf %295, %294 : vector<2x128xf32>
    %297 = math.exp %296 : vector<2x128xf32>
    %cst_137 = arith.constant 1.000000e+00 : f32
    %298 = vector.broadcast %cst_137 : f32 to vector<2x128xf32>
    %299 = arith.addf %298, %297 : vector<2x128xf32>
    %cst_138 = arith.constant 1.000000e+00 : f32
    %300 = vector.broadcast %cst_138 : f32 to vector<2x128xf32>
    %301 = arith.divf %300, %299 : vector<2x128xf32>
    %302 = arith.mulf %291, %264 : vector<2x128xf32>
    %303 = arith.mulf %283, %293 : vector<2x128xf32>
    %304 = arith.addf %302, %303 : vector<2x128xf32>
    %305 = math.tanh %304 : vector<2x128xf32>
    %306 = arith.mulf %301, %305 : vector<2x128xf32>
    %c12_139 = arith.constant 12 : index
    %c0_140 = arith.constant 0 : index
    %307 = vector.load %arg21[%c12_139, %c0_140] : memref<16x128xf32, #tpu.memory_space<vmem>>, vector<2x128xf32>
    tpu.vector_store %arg21[%c12_139, %c0_140], %306 {strides = array<i32>} : memref<16x128xf32, #tpu.memory_space<vmem>>, vector<2x128xf32>,
    %c2_141 = arith.constant 2 : index
    %c0_142 = arith.constant 0 : index
    %308 = vector.load %arg22[%c2_141, %c0_142] : memref<16x128xf32, #tpu.memory_space<vmem>>, vector<2x128xf32>
    tpu.vector_store %arg22[%c2_141, %c0_142], %306 {strides = array<i32>} : memref<16x128xf32, #tpu.memory_space<vmem>>, vector<2x128xf32>,
    %cst_143 = arith.constant dense<0.000000e+00> : vector<2x512xf32>
    %309 = tpu.matmul %306, %23, %cst_143 {dimension_numbers = #tpu.dot_dimension_numbers<[1], [0], [0], [1], [0, 0, 1, 1], [], []>} : vector<2x128xf32>, vector<128x512xf32>, vector<2x512xf32> -> vector<2x512xf32>
    %c14_144 = arith.constant 14 : index
    %c0_145 = arith.constant 0 : index
    %310 = vector.load %arg20[%c14_144, %c0_145] : memref<16x512xf32, #tpu.memory_space<vmem>>, vector<2x512xf32>
    %c0_146 = arith.constant 0 : index
    %c0_147 = arith.constant 0 : index
    %311 = vector.load %arg20[%c0_146, %c0_147] : memref<16x512xf32, #tpu.memory_space<vmem>>, vector<2x512xf32>
    %312 = vector.shape_cast %26 : vector<1x512xi1> to vector<1x512xi1>
    %313 = vector.broadcast %312 : vector<1x512xi1> to vector<2x512xi1>
    %314 = arith.select %313, %310, %311 : vector<2x512xi1>, vector<2x512xf32>
    %315 = arith.addf %314, %309 : vector<2x512xf32>
    %316 = vector.extract_strided_slice %315 {offsets = [0, 0], sizes = [2, 128], strides = [1, 1]} : vector<2x512xf32> to vector<2x128xf32>
    %cst_148 = arith.constant 0.000000e+00 : f32
    %317 = vector.broadcast %cst_148 : f32 to vector<2x128xf32>
    %318 = arith.subf %317, %316 : vector<2x128xf32>
    %319 = math.exp %318 : vector<2x128xf32>
    %cst_149 = arith.constant 1.000000e+00 : f32
    %320 = vector.broadcast %cst_149 : f32 to vector<2x128xf32>
    %321 = arith.addf %320, %319 : vector<2x128xf32>
    %cst_150 = arith.constant 1.000000e+00 : f32
    %322 = vector.broadcast %cst_150 : f32 to vector<2x128xf32>
    %323 = arith.divf %322, %321 : vector<2x128xf32>
    %324 = vector.extract_strided_slice %315 {offsets = [0, 128], sizes = [2, 128], strides = [1, 1]} : vector<2x512xf32> to vector<2x128xf32>
    %cst_151 = arith.constant 0.000000e+00 : f32
    %325 = vector.broadcast %cst_151 : f32 to vector<2x128xf32>
    %326 = arith.subf %325, %324 : vector<2x128xf32>
    %327 = math.exp %326 : vector<2x128xf32>
    %cst_152 = arith.constant 1.000000e+00 : f32
    %328 = vector.broadcast %cst_152 : f32 to vector<2x128xf32>
    %329 = arith.addf %328, %327 : vector<2x128xf32>
    %cst_153 = arith.constant 1.000000e+00 : f32
    %330 = vector.broadcast %cst_153 : f32 to vector<2x128xf32>
    %331 = arith.divf %330, %329 : vector<2x128xf32>
    %332 = vector.extract_strided_slice %315 {offsets = [0, 256], sizes = [2, 128], strides = [1, 1]} : vector<2x512xf32> to vector<2x128xf32>
    %333 = math.tanh %332 : vector<2x128xf32>
    %334 = vector.extract_strided_slice %315 {offsets = [0, 384], sizes = [2, 128], strides = [1, 1]} : vector<2x512xf32> to vector<2x128xf32>
    %cst_154 = arith.constant 0.000000e+00 : f32
    %335 = vector.broadcast %cst_154 : f32 to vector<2x128xf32>
    %336 = arith.subf %335, %334 : vector<2x128xf32>
    %337 = math.exp %336 : vector<2x128xf32>
    %cst_155 = arith.constant 1.000000e+00 : f32
    %338 = vector.broadcast %cst_155 : f32 to vector<2x128xf32>
    %339 = arith.addf %338, %337 : vector<2x128xf32>
    %cst_156 = arith.constant 1.000000e+00 : f32
    %340 = vector.broadcast %cst_156 : f32 to vector<2x128xf32>
    %341 = arith.divf %340, %339 : vector<2x128xf32>
    %342 = arith.mulf %331, %304 : vector<2x128xf32>
    %343 = arith.mulf %323, %333 : vector<2x128xf32>
    %344 = arith.addf %342, %343 : vector<2x128xf32>
    %345 = math.tanh %344 : vector<2x128xf32>
    %346 = arith.mulf %341, %345 : vector<2x128xf32>
    %c14_157 = arith.constant 14 : index
    %c0_158 = arith.constant 0 : index
    %347 = vector.load %arg21[%c14_157, %c0_158] : memref<16x128xf32, #tpu.memory_space<vmem>>, vector<2x128xf32>
    tpu.vector_store %arg21[%c14_157, %c0_158], %346 {strides = array<i32>} : memref<16x128xf32, #tpu.memory_space<vmem>>, vector<2x128xf32>,
    %c0_159 = arith.constant 0 : index
    %c0_160 = arith.constant 0 : index
    %348 = vector.load %arg22[%c0_159, %c0_160] : memref<16x128xf32, #tpu.memory_space<vmem>>, vector<2x128xf32>
    tpu.vector_store %arg22[%c0_159, %c0_160], %346 {strides = array<i32>} : memref<16x128xf32, #tpu.memory_space<vmem>>, vector<2x128xf32>,
    %c0_161 = arith.constant 0 : index
    %c0_162 = arith.constant 0 : index
    %349 = vector.load %arg21[%c0_161, %c0_162] : memref<16x128xf32, #tpu.memory_space<vmem>>, vector<16x128xf32>
    %c0_163 = arith.constant 0 : index
    %c0_164 = arith.constant 0 : index
    %350 = vector.load %arg11[%c0_163, %c0_164] : memref<128x8xf32, #tpu.memory_space<vmem>>, vector<128x8xf32>
    %cst_165 = arith.constant dense<0.000000e+00> : vector<16x8xf32>
    %351 = tpu.matmul %349, %350, %cst_165 {dimension_numbers = #tpu.dot_dimension_numbers<[1], [0], [0], [1], [0, 0, 1, 1], [], []>} : vector<16x128xf32>, vector<128x8xf32>, vector<16x8xf32> -> vector<16x8xf32>
    %c0_166 = arith.constant 0 : index
    %c0_167 = arith.constant 0 : index
    %352 = vector.load %arg22[%c0_166, %c0_167] : memref<16x128xf32, #tpu.memory_space<vmem>>, vector<16x128xf32>
    %c0_168 = arith.constant 0 : index
    %c0_169 = arith.constant 0 : index
    %353 = vector.load %arg12[%c0_168, %c0_169] : memref<128x8xf32, #tpu.memory_space<vmem>>, vector<128x8xf32>
    %cst_170 = arith.constant dense<0.000000e+00> : vector<16x8xf32>
    %354 = tpu.matmul %352, %353, %cst_170 {dimension_numbers = #tpu.dot_dimension_numbers<[1], [0], [0], [1], [0, 0, 1, 1], [], []>} : vector<16x128xf32>, vector<128x8xf32>, vector<16x8xf32> -> vector<16x8xf32>
    %355 = arith.addf %351, %354 : vector<16x8xf32>
    %c0_171 = arith.constant 0 : index
    %c0_172 = arith.constant 0 : index
    %356 = vector.load %arg13[%c0_171, %c0_172] : memref<1x8xf32, #tpu.memory_space<vmem>>, vector<1x8xf32>
    %357 = vector.broadcast %356 : vector<1x8xf32> to vector<16x8xf32>
    %358 = arith.addf %355, %357 : vector<16x8xf32>
    %359 = tpu.iota {dimensions = array<i32: 1>} : vector<16x8xi32>
    %c0_173 = arith.constant 0 : index
    %c0_174 = arith.constant 0 : index
    %360 = vector.load %arg2[%c0_173, %c0_174] : memref<16x1xi32, #tpu.memory_space<vmem>>, vector<16x1xi32>
    %361 = vector.broadcast %360 : vector<16x1xi32> to vector<16x8xi32>
    %362 = arith.cmpi eq, %361, %359 : vector<16x8xi32>
    %363 = arith.extui %362 : vector<16x8xi1> to vector<16x8xi32>
    %364 = arith.sitofp %363 : vector<16x8xi32> to vector<16x8xf32>
    %c0_175 = arith.constant 0 : index
    %c0_176 = arith.constant 0 : index
    %365 = vector.load %arg3[%c0_175, %c0_176] : memref<16x1xf32, #tpu.memory_space<vmem>>, vector<16x1xf32>
    %366 = arith.mulf %358, %364 : vector<16x8xf32>
    %cst_177 = arith.constant dense<0.000000e+00> : vector<16xf32>
    %367 = vector.multi_reduction <add>, %366, %cst_177 [1] : vector<16x8xf32> to vector<16xf32>
    %368 = vector.shape_cast %367 : vector<16xf32> to vector<16x1xf32>
    %369 = arith.mulf %368, %365 : vector<16x1xf32>
    %c0_178 = arith.constant 0 : index
    %c0_179 = arith.constant 0 : index
    %370 = vector.load %arg14[%c0_178, %c0_179] : memref<8x8xf32, #tpu.memory_space<vmem>>, vector<8x8xf32>
    %c0_180 = arith.constant 0 : index
    %c0_181 = arith.constant 0 : index
    %371 = vector.load %arg15[%c0_180, %c0_181] : memref<8x8xf32, #tpu.memory_space<vmem>>, vector<8x8xf32>
    %c0_182 = arith.constant 0 : index
    %c0_183 = arith.constant 0 : index
    %372 = vector.load %arg16[%c0_182, %c0_183] : memref<1x8xf32, #tpu.memory_space<vmem>>, vector<1x8xf32>
    %c0_184 = arith.constant 0 : index
    %c0_185 = arith.constant 0 : index
    %373 = vector.load %arg17[%c0_184, %c0_185] : memref<1x8xf32, #tpu.memory_space<vmem>>, vector<1x8xf32>
    %cst_186 = arith.constant dense<0.000000e+00> : vector<16x8xf32>
    %374 = tpu.matmul %364, %370, %cst_186 {dimension_numbers = #tpu.dot_dimension_numbers<[1], [0], [0], [1], [0, 0, 1, 1], [], []>} : vector<16x8xf32>, vector<8x8xf32>, vector<16x8xf32> -> vector<16x8xf32>
    %375 = math.exp %370 : vector<8x8xf32>
    %376 = tpu.iota {dimensions = array<i32: 1>} : vector<2x8xi32>
    %377 = arith.sitofp %376 : vector<2x8xi32> to vector<2x8xf32>
    %378 = tpu.iota {dimensions = array<i32: 2>} : vector<2x8x8xi32>
    %379 = arith.sitofp %378 : vector<2x8x8xi32> to vector<2x8x8xf32>
    %380 = vector.extract_strided_slice %358 {offsets = [0, 0], sizes = [2, 8], strides = [1, 1]} : vector<16x8xf32> to vector<2x8xf32>
    %381 = vector.extract_strided_slice %364 {offsets = [0, 0], sizes = [2, 8], strides = [1, 1]} : vector<16x8xf32> to vector<2x8xf32>
    %382 = vector.broadcast %372 : vector<1x8xf32> to vector<2x8xf32>
    %383 = arith.mulf %382, %381 : vector<2x8xf32>
    %cst_187 = arith.constant dense<0.000000e+00> : vector<2xf32>
    %384 = vector.multi_reduction <add>, %383, %cst_187 [1] : vector<2x8xf32> to vector<2xf32>
    %385 = vector.shape_cast %384 : vector<2xf32> to vector<2x1xf32>
    %386 = vector.extract_strided_slice %369 {offsets = [0, 0], sizes = [2, 1], strides = [1, 1]} : vector<16x1xf32> to vector<2x1xf32>
    %387 = arith.addf %385, %386 : vector<2x1xf32>
    %388 = vector.broadcast %372 : vector<1x8xf32> to vector<2x8xf32>
    %389 = arith.addf %388, %380 : vector<2x8xf32>
    %390 = vector.broadcast %372 : vector<1x8xf32> to vector<2x8xf32>
    %391 = arith.addf %390, %380 : vector<2x8xf32>
    %392 = vector.extract_strided_slice %358 {offsets = [2, 0], sizes = [2, 8], strides = [1, 1]} : vector<16x8xf32> to vector<2x8xf32>
    %393 = vector.extract_strided_slice %364 {offsets = [2, 0], sizes = [2, 8], strides = [1, 1]} : vector<16x8xf32> to vector<2x8xf32>
    %394 = vector.extract_strided_slice %365 {offsets = [2, 0], sizes = [2, 1], strides = [1, 1]} : vector<16x1xf32> to vector<2x1xf32>
    %395 = vector.extract_strided_slice %374 {offsets = [0, 0], sizes = [2, 8], strides = [1, 1]} : vector<16x8xf32> to vector<2x8xf32>
    %396 = arith.mulf %395, %393 : vector<2x8xf32>
    %cst_188 = arith.constant dense<0.000000e+00> : vector<2xf32>
    %397 = vector.multi_reduction <add>, %396, %cst_188 [1] : vector<2x8xf32> to vector<2xf32>
    %398 = vector.shape_cast %397 : vector<2xf32> to vector<2x1xf32>
    %399 = vector.extract_strided_slice %369 {offsets = [2, 0], sizes = [2, 1], strides = [1, 1]} : vector<16x1xf32> to vector<2x1xf32>
    %400 = arith.addf %387, %399 : vector<2x1xf32>
    %401 = arith.mulf %398, %394 : vector<2x1xf32>
    %402 = arith.addf %400, %401 : vector<2x1xf32>
    %cst_189 = arith.constant 0.000000e+00 : f32
    %403 = vector.broadcast %cst_189 : f32 to vector<2x1xf32>
    %404 = arith.cmpf ogt, %394, %403 : vector<2x1xf32>
    %405 = vector.shape_cast %404 : vector<2x1xi1> to vector<2x1xi1>
    %406 = vector.broadcast %405 : vector<2x1xi1> to vector<2x8xi1>
    %407 = arith.select %406, %393, %381 : vector<2x8xi1>, vector<2x8xf32>
    %cst_190 = arith.constant dense<0xFF800000> : vector<2xf32>
    %408 = vector.multi_reduction <maximumf>, %389, %cst_190 [1] : vector<2x8xf32> to vector<2xf32>
    %409 = vector.shape_cast %408 : vector<2xf32> to vector<2x1xf32>
    %410 = vector.broadcast %409 : vector<2x1xf32> to vector<2x8xf32>
    %411 = arith.subf %389, %410 : vector<2x8xf32>
    %412 = math.exp %411 : vector<2x8xf32>
    %cst_191 = arith.constant dense<0.000000e+00> : vector<2x8xf32>
    %413 = tpu.matmul %412, %375, %cst_191 {dimension_numbers = #tpu.dot_dimension_numbers<[1], [0], [0], [1], [0, 0, 1, 1], [], []>} : vector<2x8xf32>, vector<8x8xf32>, vector<2x8xf32> -> vector<2x8xf32>
    %cst_192 = arith.constant 0.000000e+00 : f32
    %414 = vector.broadcast %cst_192 : f32 to vector<2x1xf32>
    %415 = arith.cmpf ogt, %394, %414 : vector<2x1xf32>
    %416 = math.log %413 : vector<2x8xf32>
    %417 = arith.addf %392, %416 : vector<2x8xf32>
    %418 = vector.broadcast %409 : vector<2x1xf32> to vector<2x8xf32>
    %419 = arith.addf %417, %418 : vector<2x8xf32>
    %420 = vector.shape_cast %415 : vector<2x1xi1> to vector<2x1xi1>
    %421 = vector.broadcast %420 : vector<2x1xi1> to vector<2x8xi1>
    %422 = arith.select %421, %419, %389 : vector<2x8xi1>, vector<2x8xf32>
    %423 = vector.shape_cast %391 : vector<2x8xf32> to vector<2x1x8xf32>
    %424 = vector.shape_cast %371 : vector<8x8xf32> to vector<1x8x8xf32>
    %425 = vector.broadcast %423 : vector<2x1x8xf32> to vector<2x8x8xf32>
    %426 = vector.broadcast %424 : vector<1x8x8xf32> to vector<2x8x8xf32>
    %427 = arith.addf %425, %426 : vector<2x8x8xf32>
    %cst_193 = arith.constant dense<0xFF800000> : vector<2x8xf32>
    %428 = vector.multi_reduction <maximumf>, %427, %cst_193 [2] : vector<2x8x8xf32> to vector<2x8xf32>
    %cst_194 = arith.constant dense<0xFF800000> : vector<2x8xf32>
    %429 = vector.multi_reduction <maximumf>, %427, %cst_194 [2] : vector<2x8x8xf32> to vector<2x8xf32>
    %430 = vector.shape_cast %429 : vector<2x8xf32> to vector<2x8x1xf32>
    %431 = vector.broadcast %430 : vector<2x8x1xf32> to vector<2x8x8xf32>
    %432 = arith.cmpf oeq, %427, %431 : vector<2x8x8xf32>
    %cst_195 = arith.constant 8.000000e+00 : f32
    %433 = vector.broadcast %cst_195 : f32 to vector<2x8x8xf32>
    %434 = arith.select %432, %379, %433 : vector<2x8x8xi1>, vector<2x8x8xf32>
    %cst_196 = arith.constant dense<0x7F800000> : vector<2x8xf32>
    %435 = vector.multi_reduction <minimumf>, %434, %cst_196 [2] : vector<2x8x8xf32> to vector<2x8xf32>
    %cst_197 = arith.constant 0.000000e+00 : f32
    %436 = vector.broadcast %cst_197 : f32 to vector<2x1xf32>
    %437 = arith.cmpf ogt, %394, %436 : vector<2x1xf32>
    %438 = arith.addf %428, %392 : vector<2x8xf32>
    %439 = vector.shape_cast %437 : vector<2x1xi1> to vector<2x1xi1>
    %440 = vector.broadcast %439 : vector<2x1xi1> to vector<2x8xi1>
    %441 = arith.select %440, %438, %391 : vector<2x8xi1>, vector<2x8xf32>
    %442 = vector.extract_strided_slice %358 {offsets = [4, 0], sizes = [2, 8], strides = [1, 1]} : vector<16x8xf32> to vector<2x8xf32>
    %443 = vector.extract_strided_slice %364 {offsets = [4, 0], sizes = [2, 8], strides = [1, 1]} : vector<16x8xf32> to vector<2x8xf32>
    %444 = vector.extract_strided_slice %365 {offsets = [4, 0], sizes = [2, 1], strides = [1, 1]} : vector<16x1xf32> to vector<2x1xf32>
    %445 = vector.extract_strided_slice %374 {offsets = [2, 0], sizes = [2, 8], strides = [1, 1]} : vector<16x8xf32> to vector<2x8xf32>
    %446 = arith.mulf %445, %443 : vector<2x8xf32>
    %cst_198 = arith.constant dense<0.000000e+00> : vector<2xf32>
    %447 = vector.multi_reduction <add>, %446, %cst_198 [1] : vector<2x8xf32> to vector<2xf32>
    %448 = vector.shape_cast %447 : vector<2xf32> to vector<2x1xf32>
    %449 = vector.extract_strided_slice %369 {offsets = [4, 0], sizes = [2, 1], strides = [1, 1]} : vector<16x1xf32> to vector<2x1xf32>
    %450 = arith.addf %402, %449 : vector<2x1xf32>
    %451 = arith.mulf %448, %444 : vector<2x1xf32>
    %452 = arith.addf %450, %451 : vector<2x1xf32>
    %cst_199 = arith.constant 0.000000e+00 : f32
    %453 = vector.broadcast %cst_199 : f32 to vector<2x1xf32>
    %454 = arith.cmpf ogt, %444, %453 : vector<2x1xf32>
    %455 = vector.shape_cast %454 : vector<2x1xi1> to vector<2x1xi1>
    %456 = vector.broadcast %455 : vector<2x1xi1> to vector<2x8xi1>
    %457 = arith.select %456, %443, %407 : vector<2x8xi1>, vector<2x8xf32>
    %cst_200 = arith.constant dense<0xFF800000> : vector<2xf32>
    %458 = vector.multi_reduction <maximumf>, %422, %cst_200 [1] : vector<2x8xf32> to vector<2xf32>
    %459 = vector.shape_cast %458 : vector<2xf32> to vector<2x1xf32>
    %460 = vector.broadcast %459 : vector<2x1xf32> to vector<2x8xf32>
    %461 = arith.subf %422, %460 : vector<2x8xf32>
    %462 = math.exp %461 : vector<2x8xf32>
    %cst_201 = arith.constant dense<0.000000e+00> : vector<2x8xf32>
    %463 = tpu.matmul %462, %375, %cst_201 {dimension_numbers = #tpu.dot_dimension_numbers<[1], [0], [0], [1], [0, 0, 1, 1], [], []>} : vector<2x8xf32>, vector<8x8xf32>, vector<2x8xf32> -> vector<2x8xf32>
    %cst_202 = arith.constant 0.000000e+00 : f32
    %464 = vector.broadcast %cst_202 : f32 to vector<2x1xf32>
    %465 = arith.cmpf ogt, %444, %464 : vector<2x1xf32>
    %466 = math.log %463 : vector<2x8xf32>
    %467 = arith.addf %442, %466 : vector<2x8xf32>
    %468 = vector.broadcast %459 : vector<2x1xf32> to vector<2x8xf32>
    %469 = arith.addf %467, %468 : vector<2x8xf32>
    %470 = vector.shape_cast %465 : vector<2x1xi1> to vector<2x1xi1>
    %471 = vector.broadcast %470 : vector<2x1xi1> to vector<2x8xi1>
    %472 = arith.select %471, %469, %422 : vector<2x8xi1>, vector<2x8xf32>
    %473 = vector.shape_cast %441 : vector<2x8xf32> to vector<2x1x8xf32>
    %474 = vector.shape_cast %371 : vector<8x8xf32> to vector<1x8x8xf32>
    %475 = vector.broadcast %473 : vector<2x1x8xf32> to vector<2x8x8xf32>
    %476 = vector.broadcast %474 : vector<1x8x8xf32> to vector<2x8x8xf32>
    %477 = arith.addf %475, %476 : vector<2x8x8xf32>
    %cst_203 = arith.constant dense<0xFF800000> : vector<2x8xf32>
    %478 = vector.multi_reduction <maximumf>, %477, %cst_203 [2] : vector<2x8x8xf32> to vector<2x8xf32>
    %cst_204 = arith.constant dense<0xFF800000> : vector<2x8xf32>
    %479 = vector.multi_reduction <maximumf>, %477, %cst_204 [2] : vector<2x8x8xf32> to vector<2x8xf32>
    %480 = vector.shape_cast %479 : vector<2x8xf32> to vector<2x8x1xf32>
    %481 = vector.broadcast %480 : vector<2x8x1xf32> to vector<2x8x8xf32>
    %482 = arith.cmpf oeq, %477, %481 : vector<2x8x8xf32>
    %cst_205 = arith.constant 8.000000e+00 : f32
    %483 = vector.broadcast %cst_205 : f32 to vector<2x8x8xf32>
    %484 = arith.select %482, %379, %483 : vector<2x8x8xi1>, vector<2x8x8xf32>
    %cst_206 = arith.constant dense<0x7F800000> : vector<2x8xf32>
    %485 = vector.multi_reduction <minimumf>, %484, %cst_206 [2] : vector<2x8x8xf32> to vector<2x8xf32>
    %cst_207 = arith.constant 0.000000e+00 : f32
    %486 = vector.broadcast %cst_207 : f32 to vector<2x1xf32>
    %487 = arith.cmpf ogt, %444, %486 : vector<2x1xf32>
    %488 = arith.addf %478, %442 : vector<2x8xf32>
    %489 = vector.shape_cast %487 : vector<2x1xi1> to vector<2x1xi1>
    %490 = vector.broadcast %489 : vector<2x1xi1> to vector<2x8xi1>
    %491 = arith.select %490, %488, %441 : vector<2x8xi1>, vector<2x8xf32>
    %492 = vector.extract_strided_slice %358 {offsets = [6, 0], sizes = [2, 8], strides = [1, 1]} : vector<16x8xf32> to vector<2x8xf32>
    %493 = vector.extract_strided_slice %364 {offsets = [6, 0], sizes = [2, 8], strides = [1, 1]} : vector<16x8xf32> to vector<2x8xf32>
    %494 = vector.extract_strided_slice %365 {offsets = [6, 0], sizes = [2, 1], strides = [1, 1]} : vector<16x1xf32> to vector<2x1xf32>
    %495 = vector.extract_strided_slice %374 {offsets = [4, 0], sizes = [2, 8], strides = [1, 1]} : vector<16x8xf32> to vector<2x8xf32>
    %496 = arith.mulf %495, %493 : vector<2x8xf32>
    %cst_208 = arith.constant dense<0.000000e+00> : vector<2xf32>
    %497 = vector.multi_reduction <add>, %496, %cst_208 [1] : vector<2x8xf32> to vector<2xf32>
    %498 = vector.shape_cast %497 : vector<2xf32> to vector<2x1xf32>
    %499 = vector.extract_strided_slice %369 {offsets = [6, 0], sizes = [2, 1], strides = [1, 1]} : vector<16x1xf32> to vector<2x1xf32>
    %500 = arith.addf %452, %499 : vector<2x1xf32>
    %501 = arith.mulf %498, %494 : vector<2x1xf32>
    %502 = arith.addf %500, %501 : vector<2x1xf32>
    %cst_209 = arith.constant 0.000000e+00 : f32
    %503 = vector.broadcast %cst_209 : f32 to vector<2x1xf32>
    %504 = arith.cmpf ogt, %494, %503 : vector<2x1xf32>
    %505 = vector.shape_cast %504 : vector<2x1xi1> to vector<2x1xi1>
    %506 = vector.broadcast %505 : vector<2x1xi1> to vector<2x8xi1>
    %507 = arith.select %506, %493, %457 : vector<2x8xi1>, vector<2x8xf32>
    %cst_210 = arith.constant dense<0xFF800000> : vector<2xf32>
    %508 = vector.multi_reduction <maximumf>, %472, %cst_210 [1] : vector<2x8xf32> to vector<2xf32>
    %509 = vector.shape_cast %508 : vector<2xf32> to vector<2x1xf32>
    %510 = vector.broadcast %509 : vector<2x1xf32> to vector<2x8xf32>
    %511 = arith.subf %472, %510 : vector<2x8xf32>
    %512 = math.exp %511 : vector<2x8xf32>
    %cst_211 = arith.constant dense<0.000000e+00> : vector<2x8xf32>
    %513 = tpu.matmul %512, %375, %cst_211 {dimension_numbers = #tpu.dot_dimension_numbers<[1], [0], [0], [1], [0, 0, 1, 1], [], []>} : vector<2x8xf32>, vector<8x8xf32>, vector<2x8xf32> -> vector<2x8xf32>
    %cst_212 = arith.constant 0.000000e+00 : f32
    %514 = vector.broadcast %cst_212 : f32 to vector<2x1xf32>
    %515 = arith.cmpf ogt, %494, %514 : vector<2x1xf32>
    %516 = math.log %513 : vector<2x8xf32>
    %517 = arith.addf %492, %516 : vector<2x8xf32>
    %518 = vector.broadcast %509 : vector<2x1xf32> to vector<2x8xf32>
    %519 = arith.addf %517, %518 : vector<2x8xf32>
    %520 = vector.shape_cast %515 : vector<2x1xi1> to vector<2x1xi1>
    %521 = vector.broadcast %520 : vector<2x1xi1> to vector<2x8xi1>
    %522 = arith.select %521, %519, %472 : vector<2x8xi1>, vector<2x8xf32>
    %523 = vector.shape_cast %491 : vector<2x8xf32> to vector<2x1x8xf32>
    %524 = vector.shape_cast %371 : vector<8x8xf32> to vector<1x8x8xf32>
    %525 = vector.broadcast %523 : vector<2x1x8xf32> to vector<2x8x8xf32>
    %526 = vector.broadcast %524 : vector<1x8x8xf32> to vector<2x8x8xf32>
    %527 = arith.addf %525, %526 : vector<2x8x8xf32>
    %cst_213 = arith.constant dense<0xFF800000> : vector<2x8xf32>
    %528 = vector.multi_reduction <maximumf>, %527, %cst_213 [2] : vector<2x8x8xf32> to vector<2x8xf32>
    %cst_214 = arith.constant dense<0xFF800000> : vector<2x8xf32>
    %529 = vector.multi_reduction <maximumf>, %527, %cst_214 [2] : vector<2x8x8xf32> to vector<2x8xf32>
    %530 = vector.shape_cast %529 : vector<2x8xf32> to vector<2x8x1xf32>
    %531 = vector.broadcast %530 : vector<2x8x1xf32> to vector<2x8x8xf32>
    %532 = arith.cmpf oeq, %527, %531 : vector<2x8x8xf32>
    %cst_215 = arith.constant 8.000000e+00 : f32
    %533 = vector.broadcast %cst_215 : f32 to vector<2x8x8xf32>
    %534 = arith.select %532, %379, %533 : vector<2x8x8xi1>, vector<2x8x8xf32>
    %cst_216 = arith.constant dense<0x7F800000> : vector<2x8xf32>
    %535 = vector.multi_reduction <minimumf>, %534, %cst_216 [2] : vector<2x8x8xf32> to vector<2x8xf32>
    %cst_217 = arith.constant 0.000000e+00 : f32
    %536 = vector.broadcast %cst_217 : f32 to vector<2x1xf32>
    %537 = arith.cmpf ogt, %494, %536 : vector<2x1xf32>
    %538 = arith.addf %528, %492 : vector<2x8xf32>
    %539 = vector.shape_cast %537 : vector<2x1xi1> to vector<2x1xi1>
    %540 = vector.broadcast %539 : vector<2x1xi1> to vector<2x8xi1>
    %541 = arith.select %540, %538, %491 : vector<2x8xi1>, vector<2x8xf32>
    %542 = vector.extract_strided_slice %358 {offsets = [8, 0], sizes = [2, 8], strides = [1, 1]} : vector<16x8xf32> to vector<2x8xf32>
    %543 = vector.extract_strided_slice %364 {offsets = [8, 0], sizes = [2, 8], strides = [1, 1]} : vector<16x8xf32> to vector<2x8xf32>
    %544 = vector.extract_strided_slice %365 {offsets = [8, 0], sizes = [2, 1], strides = [1, 1]} : vector<16x1xf32> to vector<2x1xf32>
    %545 = vector.extract_strided_slice %374 {offsets = [6, 0], sizes = [2, 8], strides = [1, 1]} : vector<16x8xf32> to vector<2x8xf32>
    %546 = arith.mulf %545, %543 : vector<2x8xf32>
    %cst_218 = arith.constant dense<0.000000e+00> : vector<2xf32>
    %547 = vector.multi_reduction <add>, %546, %cst_218 [1] : vector<2x8xf32> to vector<2xf32>
    %548 = vector.shape_cast %547 : vector<2xf32> to vector<2x1xf32>
    %549 = vector.extract_strided_slice %369 {offsets = [8, 0], sizes = [2, 1], strides = [1, 1]} : vector<16x1xf32> to vector<2x1xf32>
    %550 = arith.addf %502, %549 : vector<2x1xf32>
    %551 = arith.mulf %548, %544 : vector<2x1xf32>
    %552 = arith.addf %550, %551 : vector<2x1xf32>
    %cst_219 = arith.constant 0.000000e+00 : f32
    %553 = vector.broadcast %cst_219 : f32 to vector<2x1xf32>
    %554 = arith.cmpf ogt, %544, %553 : vector<2x1xf32>
    %555 = vector.shape_cast %554 : vector<2x1xi1> to vector<2x1xi1>
    %556 = vector.broadcast %555 : vector<2x1xi1> to vector<2x8xi1>
    %557 = arith.select %556, %543, %507 : vector<2x8xi1>, vector<2x8xf32>
    %cst_220 = arith.constant dense<0xFF800000> : vector<2xf32>
    %558 = vector.multi_reduction <maximumf>, %522, %cst_220 [1] : vector<2x8xf32> to vector<2xf32>
    %559 = vector.shape_cast %558 : vector<2xf32> to vector<2x1xf32>
    %560 = vector.broadcast %559 : vector<2x1xf32> to vector<2x8xf32>
    %561 = arith.subf %522, %560 : vector<2x8xf32>
    %562 = math.exp %561 : vector<2x8xf32>
    %cst_221 = arith.constant dense<0.000000e+00> : vector<2x8xf32>
    %563 = tpu.matmul %562, %375, %cst_221 {dimension_numbers = #tpu.dot_dimension_numbers<[1], [0], [0], [1], [0, 0, 1, 1], [], []>} : vector<2x8xf32>, vector<8x8xf32>, vector<2x8xf32> -> vector<2x8xf32>
    %cst_222 = arith.constant 0.000000e+00 : f32
    %564 = vector.broadcast %cst_222 : f32 to vector<2x1xf32>
    %565 = arith.cmpf ogt, %544, %564 : vector<2x1xf32>
    %566 = math.log %563 : vector<2x8xf32>
    %567 = arith.addf %542, %566 : vector<2x8xf32>
    %568 = vector.broadcast %559 : vector<2x1xf32> to vector<2x8xf32>
    %569 = arith.addf %567, %568 : vector<2x8xf32>
    %570 = vector.shape_cast %565 : vector<2x1xi1> to vector<2x1xi1>
    %571 = vector.broadcast %570 : vector<2x1xi1> to vector<2x8xi1>
    %572 = arith.select %571, %569, %522 : vector<2x8xi1>, vector<2x8xf32>
    %573 = vector.shape_cast %541 : vector<2x8xf32> to vector<2x1x8xf32>
    %574 = vector.shape_cast %371 : vector<8x8xf32> to vector<1x8x8xf32>
    %575 = vector.broadcast %573 : vector<2x1x8xf32> to vector<2x8x8xf32>
    %576 = vector.broadcast %574 : vector<1x8x8xf32> to vector<2x8x8xf32>
    %577 = arith.addf %575, %576 : vector<2x8x8xf32>
    %cst_223 = arith.constant dense<0xFF800000> : vector<2x8xf32>
    %578 = vector.multi_reduction <maximumf>, %577, %cst_223 [2] : vector<2x8x8xf32> to vector<2x8xf32>
    %cst_224 = arith.constant dense<0xFF800000> : vector<2x8xf32>
    %579 = vector.multi_reduction <maximumf>, %577, %cst_224 [2] : vector<2x8x8xf32> to vector<2x8xf32>
    %580 = vector.shape_cast %579 : vector<2x8xf32> to vector<2x8x1xf32>
    %581 = vector.broadcast %580 : vector<2x8x1xf32> to vector<2x8x8xf32>
    %582 = arith.cmpf oeq, %577, %581 : vector<2x8x8xf32>
    %cst_225 = arith.constant 8.000000e+00 : f32
    %583 = vector.broadcast %cst_225 : f32 to vector<2x8x8xf32>
    %584 = arith.select %582, %379, %583 : vector<2x8x8xi1>, vector<2x8x8xf32>
    %cst_226 = arith.constant dense<0x7F800000> : vector<2x8xf32>
    %585 = vector.multi_reduction <minimumf>, %584, %cst_226 [2] : vector<2x8x8xf32> to vector<2x8xf32>
    %cst_227 = arith.constant 0.000000e+00 : f32
    %586 = vector.broadcast %cst_227 : f32 to vector<2x1xf32>
    %587 = arith.cmpf ogt, %544, %586 : vector<2x1xf32>
    %588 = arith.addf %578, %542 : vector<2x8xf32>
    %589 = vector.shape_cast %587 : vector<2x1xi1> to vector<2x1xi1>
    %590 = vector.broadcast %589 : vector<2x1xi1> to vector<2x8xi1>
    %591 = arith.select %590, %588, %541 : vector<2x8xi1>, vector<2x8xf32>
    %592 = vector.extract_strided_slice %358 {offsets = [10, 0], sizes = [2, 8], strides = [1, 1]} : vector<16x8xf32> to vector<2x8xf32>
    %593 = vector.extract_strided_slice %364 {offsets = [10, 0], sizes = [2, 8], strides = [1, 1]} : vector<16x8xf32> to vector<2x8xf32>
    %594 = vector.extract_strided_slice %365 {offsets = [10, 0], sizes = [2, 1], strides = [1, 1]} : vector<16x1xf32> to vector<2x1xf32>
    %595 = vector.extract_strided_slice %374 {offsets = [8, 0], sizes = [2, 8], strides = [1, 1]} : vector<16x8xf32> to vector<2x8xf32>
    %596 = arith.mulf %595, %593 : vector<2x8xf32>
    %cst_228 = arith.constant dense<0.000000e+00> : vector<2xf32>
    %597 = vector.multi_reduction <add>, %596, %cst_228 [1] : vector<2x8xf32> to vector<2xf32>
    %598 = vector.shape_cast %597 : vector<2xf32> to vector<2x1xf32>
    %599 = vector.extract_strided_slice %369 {offsets = [10, 0], sizes = [2, 1], strides = [1, 1]} : vector<16x1xf32> to vector<2x1xf32>
    %600 = arith.addf %552, %599 : vector<2x1xf32>
    %601 = arith.mulf %598, %594 : vector<2x1xf32>
    %602 = arith.addf %600, %601 : vector<2x1xf32>
    %cst_229 = arith.constant 0.000000e+00 : f32
    %603 = vector.broadcast %cst_229 : f32 to vector<2x1xf32>
    %604 = arith.cmpf ogt, %594, %603 : vector<2x1xf32>
    %605 = vector.shape_cast %604 : vector<2x1xi1> to vector<2x1xi1>
    %606 = vector.broadcast %605 : vector<2x1xi1> to vector<2x8xi1>
    %607 = arith.select %606, %593, %557 : vector<2x8xi1>, vector<2x8xf32>
    %cst_230 = arith.constant dense<0xFF800000> : vector<2xf32>
    %608 = vector.multi_reduction <maximumf>, %572, %cst_230 [1] : vector<2x8xf32> to vector<2xf32>
    %609 = vector.shape_cast %608 : vector<2xf32> to vector<2x1xf32>
    %610 = vector.broadcast %609 : vector<2x1xf32> to vector<2x8xf32>
    %611 = arith.subf %572, %610 : vector<2x8xf32>
    %612 = math.exp %611 : vector<2x8xf32>
    %cst_231 = arith.constant dense<0.000000e+00> : vector<2x8xf32>
    %613 = tpu.matmul %612, %375, %cst_231 {dimension_numbers = #tpu.dot_dimension_numbers<[1], [0], [0], [1], [0, 0, 1, 1], [], []>} : vector<2x8xf32>, vector<8x8xf32>, vector<2x8xf32> -> vector<2x8xf32>
    %cst_232 = arith.constant 0.000000e+00 : f32
    %614 = vector.broadcast %cst_232 : f32 to vector<2x1xf32>
    %615 = arith.cmpf ogt, %594, %614 : vector<2x1xf32>
    %616 = math.log %613 : vector<2x8xf32>
    %617 = arith.addf %592, %616 : vector<2x8xf32>
    %618 = vector.broadcast %609 : vector<2x1xf32> to vector<2x8xf32>
    %619 = arith.addf %617, %618 : vector<2x8xf32>
    %620 = vector.shape_cast %615 : vector<2x1xi1> to vector<2x1xi1>
    %621 = vector.broadcast %620 : vector<2x1xi1> to vector<2x8xi1>
    %622 = arith.select %621, %619, %572 : vector<2x8xi1>, vector<2x8xf32>
    %623 = vector.shape_cast %591 : vector<2x8xf32> to vector<2x1x8xf32>
    %624 = vector.shape_cast %371 : vector<8x8xf32> to vector<1x8x8xf32>
    %625 = vector.broadcast %623 : vector<2x1x8xf32> to vector<2x8x8xf32>
    %626 = vector.broadcast %624 : vector<1x8x8xf32> to vector<2x8x8xf32>
    %627 = arith.addf %625, %626 : vector<2x8x8xf32>
    %cst_233 = arith.constant dense<0xFF800000> : vector<2x8xf32>
    %628 = vector.multi_reduction <maximumf>, %627, %cst_233 [2] : vector<2x8x8xf32> to vector<2x8xf32>
    %cst_234 = arith.constant dense<0xFF800000> : vector<2x8xf32>
    %629 = vector.multi_reduction <maximumf>, %627, %cst_234 [2] : vector<2x8x8xf32> to vector<2x8xf32>
    %630 = vector.shape_cast %629 : vector<2x8xf32> to vector<2x8x1xf32>
    %631 = vector.broadcast %630 : vector<2x8x1xf32> to vector<2x8x8xf32>
    %632 = arith.cmpf oeq, %627, %631 : vector<2x8x8xf32>
    %cst_235 = arith.constant 8.000000e+00 : f32
    %633 = vector.broadcast %cst_235 : f32 to vector<2x8x8xf32>
    %634 = arith.select %632, %379, %633 : vector<2x8x8xi1>, vector<2x8x8xf32>
    %cst_236 = arith.constant dense<0x7F800000> : vector<2x8xf32>
    %635 = vector.multi_reduction <minimumf>, %634, %cst_236 [2] : vector<2x8x8xf32> to vector<2x8xf32>
    %cst_237 = arith.constant 0.000000e+00 : f32
    %636 = vector.broadcast %cst_237 : f32 to vector<2x1xf32>
    %637 = arith.cmpf ogt, %594, %636 : vector<2x1xf32>
    %638 = arith.addf %628, %592 : vector<2x8xf32>
    %639 = vector.shape_cast %637 : vector<2x1xi1> to vector<2x1xi1>
    %640 = vector.broadcast %639 : vector<2x1xi1> to vector<2x8xi1>
    %641 = arith.select %640, %638, %591 : vector<2x8xi1>, vector<2x8xf32>
    %642 = vector.extract_strided_slice %358 {offsets = [12, 0], sizes = [2, 8], strides = [1, 1]} : vector<16x8xf32> to vector<2x8xf32>
    %643 = vector.extract_strided_slice %364 {offsets = [12, 0], sizes = [2, 8], strides = [1, 1]} : vector<16x8xf32> to vector<2x8xf32>
    %644 = vector.extract_strided_slice %365 {offsets = [12, 0], sizes = [2, 1], strides = [1, 1]} : vector<16x1xf32> to vector<2x1xf32>
    %645 = vector.extract_strided_slice %374 {offsets = [10, 0], sizes = [2, 8], strides = [1, 1]} : vector<16x8xf32> to vector<2x8xf32>
    %646 = arith.mulf %645, %643 : vector<2x8xf32>
    %cst_238 = arith.constant dense<0.000000e+00> : vector<2xf32>
    %647 = vector.multi_reduction <add>, %646, %cst_238 [1] : vector<2x8xf32> to vector<2xf32>
    %648 = vector.shape_cast %647 : vector<2xf32> to vector<2x1xf32>
    %649 = vector.extract_strided_slice %369 {offsets = [12, 0], sizes = [2, 1], strides = [1, 1]} : vector<16x1xf32> to vector<2x1xf32>
    %650 = arith.addf %602, %649 : vector<2x1xf32>
    %651 = arith.mulf %648, %644 : vector<2x1xf32>
    %652 = arith.addf %650, %651 : vector<2x1xf32>
    %cst_239 = arith.constant 0.000000e+00 : f32
    %653 = vector.broadcast %cst_239 : f32 to vector<2x1xf32>
    %654 = arith.cmpf ogt, %644, %653 : vector<2x1xf32>
    %655 = vector.shape_cast %654 : vector<2x1xi1> to vector<2x1xi1>
    %656 = vector.broadcast %655 : vector<2x1xi1> to vector<2x8xi1>
    %657 = arith.select %656, %643, %607 : vector<2x8xi1>, vector<2x8xf32>
    %cst_240 = arith.constant dense<0xFF800000> : vector<2xf32>
    %658 = vector.multi_reduction <maximumf>, %622, %cst_240 [1] : vector<2x8xf32> to vector<2xf32>
    %659 = vector.shape_cast %658 : vector<2xf32> to vector<2x1xf32>
    %660 = vector.broadcast %659 : vector<2x1xf32> to vector<2x8xf32>
    %661 = arith.subf %622, %660 : vector<2x8xf32>
    %662 = math.exp %661 : vector<2x8xf32>
    %cst_241 = arith.constant dense<0.000000e+00> : vector<2x8xf32>
    %663 = tpu.matmul %662, %375, %cst_241 {dimension_numbers = #tpu.dot_dimension_numbers<[1], [0], [0], [1], [0, 0, 1, 1], [], []>} : vector<2x8xf32>, vector<8x8xf32>, vector<2x8xf32> -> vector<2x8xf32>
    %cst_242 = arith.constant 0.000000e+00 : f32
    %664 = vector.broadcast %cst_242 : f32 to vector<2x1xf32>
    %665 = arith.cmpf ogt, %644, %664 : vector<2x1xf32>
    %666 = math.log %663 : vector<2x8xf32>
    %667 = arith.addf %642, %666 : vector<2x8xf32>
    %668 = vector.broadcast %659 : vector<2x1xf32> to vector<2x8xf32>
    %669 = arith.addf %667, %668 : vector<2x8xf32>
    %670 = vector.shape_cast %665 : vector<2x1xi1> to vector<2x1xi1>
    %671 = vector.broadcast %670 : vector<2x1xi1> to vector<2x8xi1>
    %672 = arith.select %671, %669, %622 : vector<2x8xi1>, vector<2x8xf32>
    %673 = vector.shape_cast %641 : vector<2x8xf32> to vector<2x1x8xf32>
    %674 = vector.shape_cast %371 : vector<8x8xf32> to vector<1x8x8xf32>
    %675 = vector.broadcast %673 : vector<2x1x8xf32> to vector<2x8x8xf32>
    %676 = vector.broadcast %674 : vector<1x8x8xf32> to vector<2x8x8xf32>
    %677 = arith.addf %675, %676 : vector<2x8x8xf32>
    %cst_243 = arith.constant dense<0xFF800000> : vector<2x8xf32>
    %678 = vector.multi_reduction <maximumf>, %677, %cst_243 [2] : vector<2x8x8xf32> to vector<2x8xf32>
    %cst_244 = arith.constant dense<0xFF800000> : vector<2x8xf32>
    %679 = vector.multi_reduction <maximumf>, %677, %cst_244 [2] : vector<2x8x8xf32> to vector<2x8xf32>
    %680 = vector.shape_cast %679 : vector<2x8xf32> to vector<2x8x1xf32>
    %681 = vector.broadcast %680 : vector<2x8x1xf32> to vector<2x8x8xf32>
    %682 = arith.cmpf oeq, %677, %681 : vector<2x8x8xf32>
    %cst_245 = arith.constant 8.000000e+00 : f32
    %683 = vector.broadcast %cst_245 : f32 to vector<2x8x8xf32>
    %684 = arith.select %682, %379, %683 : vector<2x8x8xi1>, vector<2x8x8xf32>
    %cst_246 = arith.constant dense<0x7F800000> : vector<2x8xf32>
    %685 = vector.multi_reduction <minimumf>, %684, %cst_246 [2] : vector<2x8x8xf32> to vector<2x8xf32>
    %cst_247 = arith.constant 0.000000e+00 : f32
    %686 = vector.broadcast %cst_247 : f32 to vector<2x1xf32>
    %687 = arith.cmpf ogt, %644, %686 : vector<2x1xf32>
    %688 = arith.addf %678, %642 : vector<2x8xf32>
    %689 = vector.shape_cast %687 : vector<2x1xi1> to vector<2x1xi1>
    %690 = vector.broadcast %689 : vector<2x1xi1> to vector<2x8xi1>
    %691 = arith.select %690, %688, %641 : vector<2x8xi1>, vector<2x8xf32>
    %692 = vector.extract_strided_slice %358 {offsets = [14, 0], sizes = [2, 8], strides = [1, 1]} : vector<16x8xf32> to vector<2x8xf32>
    %693 = vector.extract_strided_slice %364 {offsets = [14, 0], sizes = [2, 8], strides = [1, 1]} : vector<16x8xf32> to vector<2x8xf32>
    %694 = vector.extract_strided_slice %365 {offsets = [14, 0], sizes = [2, 1], strides = [1, 1]} : vector<16x1xf32> to vector<2x1xf32>
    %695 = vector.extract_strided_slice %374 {offsets = [12, 0], sizes = [2, 8], strides = [1, 1]} : vector<16x8xf32> to vector<2x8xf32>
    %696 = arith.mulf %695, %693 : vector<2x8xf32>
    %cst_248 = arith.constant dense<0.000000e+00> : vector<2xf32>
    %697 = vector.multi_reduction <add>, %696, %cst_248 [1] : vector<2x8xf32> to vector<2xf32>
    %698 = vector.shape_cast %697 : vector<2xf32> to vector<2x1xf32>
    %699 = vector.extract_strided_slice %369 {offsets = [14, 0], sizes = [2, 1], strides = [1, 1]} : vector<16x1xf32> to vector<2x1xf32>
    %700 = arith.addf %652, %699 : vector<2x1xf32>
    %701 = arith.mulf %698, %694 : vector<2x1xf32>
    %702 = arith.addf %700, %701 : vector<2x1xf32>
    %cst_249 = arith.constant 0.000000e+00 : f32
    %703 = vector.broadcast %cst_249 : f32 to vector<2x1xf32>
    %704 = arith.cmpf ogt, %694, %703 : vector<2x1xf32>
    %705 = vector.shape_cast %704 : vector<2x1xi1> to vector<2x1xi1>
    %706 = vector.broadcast %705 : vector<2x1xi1> to vector<2x8xi1>
    %707 = arith.select %706, %693, %657 : vector<2x8xi1>, vector<2x8xf32>
    %cst_250 = arith.constant dense<0xFF800000> : vector<2xf32>
    %708 = vector.multi_reduction <maximumf>, %672, %cst_250 [1] : vector<2x8xf32> to vector<2xf32>
    %709 = vector.shape_cast %708 : vector<2xf32> to vector<2x1xf32>
    %710 = vector.broadcast %709 : vector<2x1xf32> to vector<2x8xf32>
    %711 = arith.subf %672, %710 : vector<2x8xf32>
    %712 = math.exp %711 : vector<2x8xf32>
    %cst_251 = arith.constant dense<0.000000e+00> : vector<2x8xf32>
    %713 = tpu.matmul %712, %375, %cst_251 {dimension_numbers = #tpu.dot_dimension_numbers<[1], [0], [0], [1], [0, 0, 1, 1], [], []>} : vector<2x8xf32>, vector<8x8xf32>, vector<2x8xf32> -> vector<2x8xf32>
    %cst_252 = arith.constant 0.000000e+00 : f32
    %714 = vector.broadcast %cst_252 : f32 to vector<2x1xf32>
    %715 = arith.cmpf ogt, %694, %714 : vector<2x1xf32>
    %716 = math.log %713 : vector<2x8xf32>
    %717 = arith.addf %692, %716 : vector<2x8xf32>
    %718 = vector.broadcast %709 : vector<2x1xf32> to vector<2x8xf32>
    %719 = arith.addf %717, %718 : vector<2x8xf32>
    %720 = vector.shape_cast %715 : vector<2x1xi1> to vector<2x1xi1>
    %721 = vector.broadcast %720 : vector<2x1xi1> to vector<2x8xi1>
    %722 = arith.select %721, %719, %672 : vector<2x8xi1>, vector<2x8xf32>
    %723 = vector.shape_cast %691 : vector<2x8xf32> to vector<2x1x8xf32>
    %724 = vector.shape_cast %371 : vector<8x8xf32> to vector<1x8x8xf32>
    %725 = vector.broadcast %723 : vector<2x1x8xf32> to vector<2x8x8xf32>
    %726 = vector.broadcast %724 : vector<1x8x8xf32> to vector<2x8x8xf32>
    %727 = arith.addf %725, %726 : vector<2x8x8xf32>
    %cst_253 = arith.constant dense<0xFF800000> : vector<2x8xf32>
    %728 = vector.multi_reduction <maximumf>, %727, %cst_253 [2] : vector<2x8x8xf32> to vector<2x8xf32>
    %cst_254 = arith.constant dense<0xFF800000> : vector<2x8xf32>
    %729 = vector.multi_reduction <maximumf>, %727, %cst_254 [2] : vector<2x8x8xf32> to vector<2x8xf32>
    %730 = vector.shape_cast %729 : vector<2x8xf32> to vector<2x8x1xf32>
    %731 = vector.broadcast %730 : vector<2x8x1xf32> to vector<2x8x8xf32>
    %732 = arith.cmpf oeq, %727, %731 : vector<2x8x8xf32>
    %cst_255 = arith.constant 8.000000e+00 : f32
    %733 = vector.broadcast %cst_255 : f32 to vector<2x8x8xf32>
    %734 = arith.select %732, %379, %733 : vector<2x8x8xi1>, vector<2x8x8xf32>
    %cst_256 = arith.constant dense<0x7F800000> : vector<2x8xf32>
    %735 = vector.multi_reduction <minimumf>, %734, %cst_256 [2] : vector<2x8x8xf32> to vector<2x8xf32>
    %cst_257 = arith.constant 0.000000e+00 : f32
    %736 = vector.broadcast %cst_257 : f32 to vector<2x1xf32>
    %737 = arith.cmpf ogt, %694, %736 : vector<2x1xf32>
    %738 = arith.addf %728, %692 : vector<2x8xf32>
    %739 = vector.shape_cast %737 : vector<2x1xi1> to vector<2x1xi1>
    %740 = vector.broadcast %739 : vector<2x1xi1> to vector<2x8xi1>
    %741 = arith.select %740, %738, %691 : vector<2x8xi1>, vector<2x8xf32>
    %742 = vector.broadcast %373 : vector<1x8xf32> to vector<2x8xf32>
    %743 = arith.mulf %742, %707 : vector<2x8xf32>
    %cst_258 = arith.constant dense<0.000000e+00> : vector<2xf32>
    %744 = vector.multi_reduction <add>, %743, %cst_258 [1] : vector<2x8xf32> to vector<2xf32>
    %745 = vector.shape_cast %744 : vector<2xf32> to vector<2x1xf32>
    %746 = arith.addf %702, %745 : vector<2x1xf32>
    %747 = vector.broadcast %373 : vector<1x8xf32> to vector<2x8xf32>
    %748 = arith.addf %722, %747 : vector<2x8xf32>
    %cst_259 = arith.constant dense<0xFF800000> : vector<2xf32>
    %749 = vector.multi_reduction <maximumf>, %748, %cst_259 [1] : vector<2x8xf32> to vector<2xf32>
    %750 = vector.shape_cast %749 : vector<2xf32> to vector<2x1xf32>
    %751 = vector.broadcast %750 : vector<2x1xf32> to vector<2x8xf32>
    %752 = arith.subf %748, %751 : vector<2x8xf32>
    %753 = math.exp %752 : vector<2x8xf32>
    %cst_260 = arith.constant dense<0.000000e+00> : vector<2xf32>
    %754 = vector.multi_reduction <add>, %753, %cst_260 [1] : vector<2x8xf32> to vector<2xf32>
    %755 = vector.shape_cast %754 : vector<2xf32> to vector<2x1xf32>
    %756 = math.log %755 : vector<2x1xf32>
    %757 = arith.addf %750, %756 : vector<2x1xf32>
    %758 = arith.subf %746, %757 : vector<2x1xf32>
    %c0_261 = arith.constant 0 : index
    %c0_262 = arith.constant 0 : index
    %759 = vector.load %arg18[%c0_261, %c0_262] : memref<2x1xf32, #tpu.memory_space<vmem>>, vector<2x1xf32>
    tpu.vector_store %arg18[%c0_261, %c0_262], %758 {strides = array<i32>} : memref<2x1xf32, #tpu.memory_space<vmem>>, vector<2x1xf32>,
    %760 = vector.broadcast %373 : vector<1x8xf32> to vector<2x8xf32>
    %761 = arith.addf %741, %760 : vector<2x8xf32>
    %cst_263 = arith.constant dense<0xFF800000> : vector<2xf32>
    %762 = vector.multi_reduction <maximumf>, %761, %cst_263 [1] : vector<2x8xf32> to vector<2xf32>
    %763 = vector.shape_cast %762 : vector<2xf32> to vector<2x1xf32>
    %764 = vector.broadcast %763 : vector<2x1xf32> to vector<2x8xf32>
    %765 = arith.cmpf oeq, %761, %764 : vector<2x8xf32>
    %cst_264 = arith.constant 8.000000e+00 : f32
    %766 = vector.broadcast %cst_264 : f32 to vector<2x8xf32>
    %767 = arith.select %765, %377, %766 : vector<2x8xi1>, vector<2x8xf32>
    %cst_265 = arith.constant dense<0x7F800000> : vector<2xf32>
    %768 = vector.multi_reduction <minimumf>, %767, %cst_265 [1] : vector<2x8xf32> to vector<2xf32>
    %769 = vector.shape_cast %768 : vector<2xf32> to vector<2x1xf32>
    %770 = vector.broadcast %769 : vector<2x1xf32> to vector<2x8xf32>
    %771 = arith.cmpf oeq, %377, %770 : vector<2x8xf32>
    %cst_266 = arith.constant 0.000000e+00 : f32
    %772 = vector.broadcast %cst_266 : f32 to vector<2x8xf32>
    %773 = arith.select %771, %735, %772 : vector<2x8xi1>, vector<2x8xf32>
    %cst_267 = arith.constant dense<0.000000e+00> : vector<2xf32>
    %774 = vector.multi_reduction <add>, %773, %cst_267 [1] : vector<2x8xf32> to vector<2xf32>
    %775 = vector.shape_cast %774 : vector<2xf32> to vector<2x1xf32>
    %cst_268 = arith.constant 0.000000e+00 : f32
    %776 = vector.broadcast %cst_268 : f32 to vector<2x1xf32>
    %777 = arith.cmpf ogt, %694, %776 : vector<2x1xf32>
    %778 = arith.select %777, %775, %769 : vector<2x1xi1>, vector<2x1xf32>
    %779 = vector.broadcast %778 : vector<2x1xf32> to vector<2x8xf32>
    %780 = arith.cmpf oeq, %377, %779 : vector<2x8xf32>
    %cst_269 = arith.constant 0.000000e+00 : f32
    %781 = vector.broadcast %cst_269 : f32 to vector<2x8xf32>
    %782 = arith.select %780, %685, %781 : vector<2x8xi1>, vector<2x8xf32>
    %cst_270 = arith.constant dense<0.000000e+00> : vector<2xf32>
    %783 = vector.multi_reduction <add>, %782, %cst_270 [1] : vector<2x8xf32> to vector<2xf32>
    %784 = vector.shape_cast %783 : vector<2xf32> to vector<2x1xf32>
    %cst_271 = arith.constant 0.000000e+00 : f32
    %785 = vector.broadcast %cst_271 : f32 to vector<2x1xf32>
    %786 = arith.cmpf ogt, %644, %785 : vector<2x1xf32>
    %787 = arith.select %786, %784, %778 : vector<2x1xi1>, vector<2x1xf32>
    %788 = vector.broadcast %787 : vector<2x1xf32> to vector<2x8xf32>
    %789 = arith.cmpf oeq, %377, %788 : vector<2x8xf32>
    %cst_272 = arith.constant 0.000000e+00 : f32
    %790 = vector.broadcast %cst_272 : f32 to vector<2x8xf32>
    %791 = arith.select %789, %635, %790 : vector<2x8xi1>, vector<2x8xf32>
    %cst_273 = arith.constant dense<0.000000e+00> : vector<2xf32>
    %792 = vector.multi_reduction <add>, %791, %cst_273 [1] : vector<2x8xf32> to vector<2xf32>
    %793 = vector.shape_cast %792 : vector<2xf32> to vector<2x1xf32>
    %cst_274 = arith.constant 0.000000e+00 : f32
    %794 = vector.broadcast %cst_274 : f32 to vector<2x1xf32>
    %795 = arith.cmpf ogt, %594, %794 : vector<2x1xf32>
    %796 = arith.select %795, %793, %787 : vector<2x1xi1>, vector<2x1xf32>
    %797 = vector.broadcast %796 : vector<2x1xf32> to vector<2x8xf32>
    %798 = arith.cmpf oeq, %377, %797 : vector<2x8xf32>
    %cst_275 = arith.constant 0.000000e+00 : f32
    %799 = vector.broadcast %cst_275 : f32 to vector<2x8xf32>
    %800 = arith.select %798, %585, %799 : vector<2x8xi1>, vector<2x8xf32>
    %cst_276 = arith.constant dense<0.000000e+00> : vector<2xf32>
    %801 = vector.multi_reduction <add>, %800, %cst_276 [1] : vector<2x8xf32> to vector<2xf32>
    %802 = vector.shape_cast %801 : vector<2xf32> to vector<2x1xf32>
    %cst_277 = arith.constant 0.000000e+00 : f32
    %803 = vector.broadcast %cst_277 : f32 to vector<2x1xf32>
    %804 = arith.cmpf ogt, %544, %803 : vector<2x1xf32>
    %805 = arith.select %804, %802, %796 : vector<2x1xi1>, vector<2x1xf32>
    %806 = vector.broadcast %805 : vector<2x1xf32> to vector<2x8xf32>
    %807 = arith.cmpf oeq, %377, %806 : vector<2x8xf32>
    %cst_278 = arith.constant 0.000000e+00 : f32
    %808 = vector.broadcast %cst_278 : f32 to vector<2x8xf32>
    %809 = arith.select %807, %535, %808 : vector<2x8xi1>, vector<2x8xf32>
    %cst_279 = arith.constant dense<0.000000e+00> : vector<2xf32>
    %810 = vector.multi_reduction <add>, %809, %cst_279 [1] : vector<2x8xf32> to vector<2xf32>
    %811 = vector.shape_cast %810 : vector<2xf32> to vector<2x1xf32>
    %cst_280 = arith.constant 0.000000e+00 : f32
    %812 = vector.broadcast %cst_280 : f32 to vector<2x1xf32>
    %813 = arith.cmpf ogt, %494, %812 : vector<2x1xf32>
    %814 = arith.select %813, %811, %805 : vector<2x1xi1>, vector<2x1xf32>
    %815 = vector.broadcast %814 : vector<2x1xf32> to vector<2x8xf32>
    %816 = arith.cmpf oeq, %377, %815 : vector<2x8xf32>
    %cst_281 = arith.constant 0.000000e+00 : f32
    %817 = vector.broadcast %cst_281 : f32 to vector<2x8xf32>
    %818 = arith.select %816, %485, %817 : vector<2x8xi1>, vector<2x8xf32>
    %cst_282 = arith.constant dense<0.000000e+00> : vector<2xf32>
    %819 = vector.multi_reduction <add>, %818, %cst_282 [1] : vector<2x8xf32> to vector<2xf32>
    %820 = vector.shape_cast %819 : vector<2xf32> to vector<2x1xf32>
    %cst_283 = arith.constant 0.000000e+00 : f32
    %821 = vector.broadcast %cst_283 : f32 to vector<2x1xf32>
    %822 = arith.cmpf ogt, %444, %821 : vector<2x1xf32>
    %823 = arith.select %822, %820, %814 : vector<2x1xi1>, vector<2x1xf32>
    %824 = vector.broadcast %823 : vector<2x1xf32> to vector<2x8xf32>
    %825 = arith.cmpf oeq, %377, %824 : vector<2x8xf32>
    %cst_284 = arith.constant 0.000000e+00 : f32
    %826 = vector.broadcast %cst_284 : f32 to vector<2x8xf32>
    %827 = arith.select %825, %435, %826 : vector<2x8xi1>, vector<2x8xf32>
    %cst_285 = arith.constant dense<0.000000e+00> : vector<2xf32>
    %828 = vector.multi_reduction <add>, %827, %cst_285 [1] : vector<2x8xf32> to vector<2xf32>
    %829 = vector.shape_cast %828 : vector<2xf32> to vector<2x1xf32>
    %cst_286 = arith.constant 0.000000e+00 : f32
    %830 = vector.broadcast %cst_286 : f32 to vector<2x1xf32>
    %831 = arith.cmpf ogt, %394, %830 : vector<2x1xf32>
    %832 = arith.select %831, %829, %823 : vector<2x1xi1>, vector<2x1xf32>
    %833 = tpu.concatenate %832, %823, %814, %805, %796, %787, %778, %769 in 1 : vector<2x1xf32>, vector<2x1xf32>, vector<2x1xf32>, vector<2x1xf32>, vector<2x1xf32>, vector<2x1xf32>, vector<2x1xf32>, vector<2x1xf32> -> vector<2x8xf32>
    %834 = arith.fptosi %833 : vector<2x8xf32> to vector<2x8xi32>
    %c0_287 = arith.constant 0 : index
    %c0_288 = arith.constant 0 : index
    %835 = vector.load %arg19[%c0_287, %c0_288] : memref<2x8xi32, #tpu.memory_space<vmem>>, vector<2x8xi32>
    tpu.vector_store %arg19[%c0_287, %c0_288], %834 {strides = array<i32>} : memref<2x8xi32, #tpu.memory_space<vmem>>, vector<2x8xi32>,
    return
  }
}

</mosaic_0001>

<bundles_post_ra>
// kernel: forward.1
= control target key start
LH: loop header
LB: loop body
LE: loop exit
PB: predicated region body
PF: predicated region fallthrough
CT: control target
= control target key end

     0   :  { %s7044_s0 = inlined_call_operand.vmem [shape: f32[16,16], index: 0, kind: input, shape index: {}]   ;;  %s7045_s1 = inlined_call_operand.vmem [shape: f32[16,48], index: 1, kind: input, shape index: {}]   ;;  %s7046_s2 = inlined_call_operand.vmem [shape: s32[16,1], index: 2, kind: input, shape index: {}]   ;;  %s7047_s3 = inlined_call_operand.vmem [shape: f32[16,1], index: 3, kind: input, shape index: {}]   ;;  %s7048_s4 = inlined_call_operand.vmem [shape: f32[48,96], index: 4, kind: input, shape index: {}]   ;;  %s7049_s5 = inlined_call_operand.vmem [shape: f32[1,24], index: 5, kind: input, shape index: {}]   ;;  %s7050_s6 = inlined_call_operand.vmem [shape: f32[16,512], index: 6, kind: input, shape index: {}]   ;;  %s7051_s7 = inlined_call_operand.vmem [shape: f32[24,512], index: 7, kind: input, shape index: {}]   ;;  %s7052_s8 = inlined_call_operand.vmem [shape: f32[1,512], index: 8, kind: input, shape index: {}]   ;;  %s7053_s9 = inlined_call_operand.vmem [shape: f32[128,512], index: 9, kind: input, shape index: {}]   ;;  %s7054_s10 = inlined_call_operand.vmem [shape: f32[1,512], index: 10, kind: input, shape index: {}]   ;;  %s7055_s11 = inlined_call_operand.vmem [shape: f32[128,8], index: 11, kind: input, shape index: {}]   ;;  %s7056_s12 = inlined_call_operand.vmem [shape: f32[128,8], index: 12, kind: input, shape index: {}]   ;;  %s7057_s13 = inlined_call_operand.vmem [shape: f32[1,8], index: 13, kind: input, shape index: {}]   ;;  %s7058_s14 = inlined_call_operand.vmem [shape: f32[8,8], index: 14, kind: input, shape index: {}]   ;;  %s7059_s15 = inlined_call_operand.vmem [shape: f32[8,8], index: 15, kind: input, shape index: {}]   ;;  %s7060_s16 = inlined_call_operand.vmem [shape: f32[1,8], index: 16, kind: input, shape index: {}]   ;;  %s7061_s17 = inlined_call_operand.vmem [shape: f32[1,8], index: 17, kind: input, shape index: {}]   ;;  %s7062_s18 = inlined_call_operand.vmem [shape: f32[2,1], index: 18, kind: output, shape index: {0}]   ;;  %s7063_s19 = inlined_call_operand.hbm [shape: s32[2,8], index: 19, kind: output, shape index: {1}]  }
   0x1   :  { %7078 = sst [smem:[#allocation11_spill]] %s7044_s0 }
   0x2   :  { %7079 = sst [smem:[#allocation12_spill]] %s7045_s1 }
   0x3   :  { %7080 = sst [smem:[#allocation13_spill]] %s7046_s2 }
   0x4   :  { %7081 = sst [smem:[#allocation14_spill]] %s7047_s3 }
   0x5   :  { %v64_v0 = vld [vmem:[%s7048_s4] sm:$0xff]  ;;  %v65_v1 = vld [vmem:[%s7048_s4 + $0x8] sm:$0xff]  ;;  %v66_v2 = vld [vmem:[%s7048_s4 + $0x10] sm:$0xff]  ;;  %vm70_vm0 = vcmask 392192   ;;  %s7082_s29 = sld [smem:[#allocation12_spill]] }
   0x6   :  { %v4575_v3 = vpack.c.bf16 %v65_v1, %v64_v0  ;;  %v67_v4 = vld [vmem:[%s7048_s4 + $0x18] sm:$0xff]  ;;  %v68_v5 = vld [vmem:[%s7048_s4 + $0x20] sm:$0xff]  ;;  %v69_v7 = vld [vmem:[%s7048_s4 + $0x28] sm:$0xff] }
   0x7   :  { %v4579_v6 = vpack.c.bf16 %v67_v4, %v66_v2 }
   0xb   :  { %v62_v8 = vld [vmem:[%s7082_s29] sm:$0xff] }
   0xc   :  { %25 = vsyncpa [#allocation6], 0  ;;  %4576 = vmatprep.subr.bf16.mxu1 %v4575_v3  ;;  %4462 = vmatprep.mubr.msk.f32.mxu1 %vm70_vm0, %v62_v8  ;;  %v4583_v9 = vpack.c.bf16 %v69_v7, %v68_v5  ;;  %v63_v10 = vld [vmem:[%s7082_s29 + $0x8] sm:$0xff]  ;;  %v189_v13 = vld [vmem:[%s7050_s6] sm:$0xff]  ;;  %v7071_v16 = vmov 0.0   ;;  %s7083_s21 = sld [smem:[#allocation11_spill]] }
   0xd   :  { %4578 = vmatpush3.bf16.msra.mxu1 %v4575_v3  ;;  %v190_v11 = vld [vmem:[%s7050_s6 + $0x8] sm:$0xff]  ;;  %v193_v15 = vld [vmem:[%s7050_s6 + $0x20] sm:$0xff]  ;;  %441 = vmatprep.mubr.f32.mxu0 %v7071_v16  ;;  %vm370_vm1 = vcmask 130048   ;;  %v200_v51 = vld [vmem:[%s7051_s7 + $0x18] sm:$0xff]  ;;  %s5396_s23 = smov 104   ;;  %s5397_s0 = smov 56  }
   0xe   :  { %4580 = vmatprep.subr.bf16.mxu1 %v4579_v6  ;;  %v194_v12 = vld [vmem:[%s7050_s6 + $0x28] sm:$0xff]  ;;  %v4597_v19 = vpack.c.bf16 %v193_v15, %v189_v13  ;;  %v569_v21 = vld [vmem:[%s7053_s9] sm:$0xff]  ;;  %v204_v52 = vld [vmem:[%s7051_s7 + $0x38] sm:$0xff]  ;;  %s5398_s20 = smov 80   ;;  %vm209_vm2 = vcmask 195584   ;;  %vm2547_vm9 = vcmask 64512  }
   0xf   :  { %v4595_v14 = vpack.c.bf16 %v194_v12, %v190_v11  ;;  %v570_v17 = vld [vmem:[%s7053_s9 + $0x8] sm:$0xff]  ;;  %v573_v22 = vld [vmem:[%s7053_s9 + $0x20] sm:$0xff]  ;;  %v4591_v53 = vpack.c.bf16 %v204_v52, %v200_v51  ;;  %v195_v51 = vld [vmem:[%s7050_s6 + $0x30] sm:$0xff]  ;;  %vm2651_vm12 = vcmask 58368   ;;  %vm5401_vm13 = vmmov 0   ;;  %s5404_s24 = smov 5  }
  0x10   :  { %v574_v18 = vld [vmem:[%s7053_s9 + $0x28] sm:$0xff]  ;;  %v5568_v24 = vpack.c.bf16 %v573_v22, %v569_v21  ;;  %v577_v28 = vld [vmem:[%s7053_s9 + $0x40] sm:$0xff]  ;;  %v572_v52 = vld [vmem:[%s7053_s9 + $0x18] sm:$0xff]  ;;  %vm2859_vm14 = vcmask 1043459  }
  0x11   :  { %4582 = vmatpush3.bf16.msra.mxu1 %v4579_v6  ;;  %v5555_v20 = vpack.c.bf16 %v574_v18, %v570_v17  ;;  %4596 = vmatprep.subr.bf16.mxu0 %v4595_v14  ;;  %v578_v25 = vld [vmem:[%s7053_s9 + $0x48] sm:$0xff]  ;;  %v581_v29 = vld [vmem:[%s7053_s9 + $0x60] sm:$0xff] }
  0x12   :  { %4584 = vmatprep.subr.bf16.mxu1 %v4583_v9  ;;  %4598 = vmatpush1.bf16.msra.mxu0 %v4597_v19  ;;  %v5566_v23 = vld [vmem:[%s7083_s21] sm:$0xff]  ;;  %v582_v26 = vld [vmem:[%s7053_s9 + $0x68] sm:$0xff]  ;;  %v5589_v30 = vpack.c.bf16 %v581_v29, %v577_v28  ;;  %v199_v28 = vld [vmem:[%s7051_s7 + $0x10] sm:$0xff] }
  0x13   :  { %4604 = vmatprep.subr.bf16.mxu0 %v5555_v20  ;;  %v5581_v27 = vpack.c.bf16 %v582_v26, %v578_v25  ;;  %v198_v31 = vld [vmem:[%s7051_s7 + $0x8] sm:$0xff]  ;;  %v197_v34 = vld [vmem:[%s7051_s7] sm:$0xff]  ;;  %v203_v29 = vld [vmem:[%s7051_s7 + $0x30] sm:$0xff] }
  0x14   :  { %v202_v32 = vld [vmem:[%s7051_s7 + $0x28] sm:$0xff]  ;;  %v201_v35 = vld [vmem:[%s7051_s7 + $0x20] sm:$0xff] }
  0x15   :  { %4586 = vmatpush3.bf16.msra.mxu1 %v4583_v9  ;;  %4371 = vmatmul.mubr.msk.f32.vlgmr.msra.gmra.mrb[0].mxu0 %vm370_vm1, %v5566_v23  ;;  %v4587_v33 = vpack.c.bf16 %v202_v32, %v198_v31  ;;  %v4589_v36 = vpack.c.bf16 %v201_v35, %v197_v34  ;;  %v586_v37 = vld [vmem:[%s7053_s9 + $0x88] sm:$0xff]  ;;  %v585_v39 = vld [vmem:[%s7053_s9 + $0x80] sm:$0xff]  ;;  %v4593_v35 = vpack.c.bf16 %v203_v29, %v199_v28  ;;  %v603_v28 = vld [vmem:[%s7053_s9 + $0x110] sm:$0xff] }
  0x16   :  { %4606 = vmatpush1.bf16.msra.mxu0 %v5568_v24  ;;  %447 = vmatprep.mubr.f32.mxu0 %v7071_v16  ;;  %v590_v38 = vld [vmem:[%s7053_s9 + $0xa8] sm:$0xff]  ;;  %v589_v41 = vld [vmem:[%s7053_s9 + $0xa0] sm:$0xff]  ;;  %v607_v29 = vld [vmem:[%s7053_s9 + $0x130] sm:$0xff] }
  0x17   :  { %4608 = vmatprep.subr.bf16.mxu0 %v5581_v27  ;;  %4588 = vmatprep.subr.bf16.mxu1 %v4587_v33  ;;  %v5614_v40 = vpack.c.bf16 %v590_v38, %v586_v37  ;;  %v5619_v42 = vpack.c.bf16 %v589_v41, %v585_v39  ;;  %v594_v43 = vld [vmem:[%s7053_s9 + $0xc8] sm:$0xff]  ;;  %v593_v47 = vld [vmem:[%s7053_s9 + $0xc0] sm:$0xff]  ;;  %v208_v39 = vld [vmem:[%s7051_s7 + $0x58] sm:$0xff] }
  0x18   :  { %4463 = vmatmul.mubr.msk.f32.vlgmr.msra.gmra.mrb[0].mxu1 %vm70_vm0, %v63_v10  ;;  %v598_v44 = vld [vmem:[%s7053_s9 + $0xe8] sm:$0xff]  ;;  %v597_v48 = vld [vmem:[%s7053_s9 + $0xe0] sm:$0xff]  ;;  %v192_v41 = vld [vmem:[%s7050_s6 + $0x18] sm:$0xff]  ;;  %vm2863_vm0 = vcmask 60418  }
  0x19   :  { %280 = vmatprep.mubr.f32.mxu1 %v7071_v16  ;;  %4590 = vmatpush1.bf16.msra.mxu1 %v4589_v36  ;;  %v206_v45 = vld [vmem:[%s7051_s7 + $0x48] sm:$0xff]  ;;  %v5632_v46 = vpack.c.bf16 %v598_v44, %v594_v43  ;;  %v205_v49 = vld [vmem:[%s7051_s7 + $0x40] sm:$0xff]  ;;  %v5643_v50 = vpack.c.bf16 %v597_v48, %v593_v47  ;;  %v196_v43 = vld [vmem:[%s7050_s6 + $0x38] sm:$0xff] }
  0x1a   :  { %4610 = vmatpush1.bf16.msra.mxu0 %v5589_v30  ;;  %220 = vmatprep.subr.mxu1 %v206_v45  ;;  %v602_v54 = vld [vmem:[%s7053_s9 + $0x108] sm:$0xff]  ;;  %v601_v57 = vld [vmem:[%s7053_s9 + $0x100] sm:$0xff]  ;;  %v207_v47 = vld [vmem:[%s7051_s7 + $0x50] sm:$0xff]  ;;  %v4599_v48 = vpack.c.bf16 %v196_v43, %v192_v41 }
  0x1b   :  { %4612 = vmatprep.subr.bf16.mxu0 %v5614_v40  ;;  %v606_v56 = vld [vmem:[%s7053_s9 + $0x128] sm:$0xff]  ;;  %v605_v58 = vld [vmem:[%s7053_s9 + $0x120] sm:$0xff]  ;;  %v619_v43 = vld [vmem:[%s7053_s9 + $0x190] sm:$0xff] }
  0x1c   :  { %v5670_v60 = vpack.c.bf16 %v606_v56, %v602_v54  ;;  %v5672_v61 = vpack.c.bf16 %v605_v58, %v601_v57  ;;  %v5678_v62 = vld [vmem:[%s7083_s21 + $0x8] sm:$0xff]  ;;  %v609_v2 = vld [vmem:[%s7053_s9 + $0x140] sm:$0xff]  ;;  %v571_v56 = vld [vmem:[%s7053_s9 + $0x10] sm:$0xff] }
  0x1d   :  { %221 = vmatpush1.msra.mxu1 %v205_v49  ;;  %4372 = vmatmul.mubr.msk.f32.gmra.mrb[2].mxu0 %vm370_vm1, %v5678_v62  ;;  %v610_v63 = vld [vmem:[%s7053_s9 + $0x148] sm:$0xff]  ;;  %v613_v3 = vld [vmem:[%s7053_s9 + $0x160] sm:$0xff]  ;;  %v191_v49 = vld [vmem:[%s7050_s6 + $0x10] sm:$0xff]  ;;  %s7096_s6 = sld [smem:[#allocation13_spill]] }
  0x1e   :  { %4614 = vmatpush1.bf16.msra.mxu0 %v5619_v42  ;;  %4592 = vmatprep.subr.bf16.mxu1 %v4591_v53  ;;  %v614_v0 = vld [vmem:[%s7053_s9 + $0x168] sm:$0xff]  ;;  %v5702_v4 = vpack.c.bf16 %v613_v3, %v609_v2  ;;  %v617_v7 = vld [vmem:[%s7053_s9 + $0x180] sm:$0xff]  ;;  %v576_v53 = vld [vmem:[%s7053_s9 + $0x38] sm:$0xff]  ;;  %v4601_v54 = vpack.c.bf16 %v195_v51, %v191_v49 }
  0x1f   :  { %4616 = vmatprep.subr.bf16.mxu0 %v5632_v46  ;;  %v5690_v1 = vpack.c.bf16 %v614_v0, %v610_v63  ;;  %699 = vmatprep.mubr.f32.mxu0 %v7071_v16  ;;  %v618_v5 = vld [vmem:[%s7053_s9 + $0x188] sm:$0xff]  ;;  %v621_v8 = vld [vmem:[%s7053_s9 + $0x1a0] sm:$0xff]  ;;  %v575_v57 = vld [vmem:[%s7053_s9 + $0x30] sm:$0xff] }
  0x20   :  { %v622_v6 = vld [vmem:[%s7053_s9 + $0x1a8] sm:$0xff]  ;;  %v5720_v10 = vpack.c.bf16 %v621_v8, %v617_v7  ;;  %v625_v14 = vld [vmem:[%s7053_s9 + $0x1c0] sm:$0xff]  ;;  %v580_v58 = vld [vmem:[%s7053_s9 + $0x58] sm:$0xff]  ;;  %v5820_v63 = vpack.c.bf16 %v575_v57, %v571_v56 }
  0x21   :  { %v5718_v9 = vpack.c.bf16 %v622_v6, %v618_v5  ;;  %v626_v11 = vld [vmem:[%s7053_s9 + $0x1c8] sm:$0xff]  ;;  %v629_v15 = vld [vmem:[%s7053_s9 + $0x1e0] sm:$0xff]  ;;  %v579_v2 = vld [vmem:[%s7053_s9 + $0x50] sm:$0xff] }
  0x22   :  { %4618 = vmatpush1.bf16.msra.mxu0 %v5643_v50  ;;  %v630_v12 = vld [vmem:[%s7053_s9 + $0x1e8] sm:$0xff]  ;;  %v5739_v17 = vpack.c.bf16 %v629_v15, %v625_v14  ;;  %v4366_v31 = vld [vmem:[%s7049_s5] ss:$0 sm:$0xff]  ;;  %v583_v3 = vld [vmem:[%s7053_s9 + $0x70] sm:$0xff] }
  0x23   :  { %4620 = vmatprep.subr.bf16.mxu0 %v5670_v60  ;;  %v5731_v13 = vpack.c.bf16 %v630_v12, %v626_v11  ;;  %v588_v5 = vld [vmem:[%s7053_s9 + $0x98] sm:$0xff]  ;;  %v5840_v7 = vpack.c.bf16 %v583_v3, %v579_v2  ;;  %v587_v11 = vld [vmem:[%s7053_s9 + $0x90] sm:$0xff] }
  0x24   :  { %v592_v6 = vld [vmem:[%s7053_s9 + $0xb8] sm:$0xff]  ;;  %v591_v12 = vld [vmem:[%s7053_s9 + $0xb0] sm:$0xff] }
  0x25   :  { %v5843_v8 = vpack.c.bf16 %v592_v6, %v588_v5  ;;  %v600_v14 = vld [vmem:[%s7053_s9 + $0xf8] sm:$0xff]  ;;  %v5860_v15 = vpack.c.bf16 %v591_v12, %v587_v11  ;;  %v627_v51 = vld [vmem:[%s7053_s9 + $0x1d0] sm:$0xff]  ;;  %v7068_v5 = vlaneseq  ;;  %v531_v12 = vld [vmem:[%s7052_s8] sm:$0xf]  ;;  %s7097_s8 = sld [smem:[#allocation14_spill]] }
  0x26   :  { %4622 = vmatpush1.bf16.msra.mxu0 %v5672_v61 }
  0x27   :  { %4624 = vmatprep.subr.bf16.mxu0 %v5690_v1  ;;  %v5971_v6 = vshrl.u32 %v7068_v5, 7 }
  0x29   :  { %v5974_v11 = vsub.s32 0, %v5971_v6 }
  0x2a   :  { %4626 = vmatpush1.bf16.msra.mxu0 %v5702_v4 }
  0x2b   :  { %4628 = vmatprep.subr.bf16.mxu0 %v5718_v9 }
  0x2e   :  { %4630 = vmatpush1.bf16.msra.mxu0 %v5720_v10 }
  0x2f   :  { %4632 = vmatprep.subr.bf16.mxu0 %v5731_v13 }
  0x32   :  { %4634 = vmatpush1.bf16.msra.mxu0 %v5739_v17 }
  0x33   :  { %4668 = vmatprep.subr.bf16.mxu0 %v5555_v20 }
  0x35   :  { %700 = vmatmul.mubr.f32.vlgmr.msra.gmra.mrb[4].mxu0 %v7071_v16 }
  0x36   :  { %4670 = vmatpush1.bf16.msra.mxu0 %v5568_v24  ;;  %916 = vmatprep.mubr.f32.mxu0 %v7071_v16 }
  0x37   :  { %4672 = vmatprep.subr.bf16.mxu0 %v5581_v27 }
  0x3a   :  { %4674 = vmatpush1.bf16.msra.mxu0 %v5589_v30 }
  0x3b   :  { %4676 = vmatprep.subr.bf16.mxu0 %v5614_v40 }
  0x3e   :  { %4678 = vmatpush1.bf16.msra.mxu0 %v5619_v42 }
  0x3f   :  { %4680 = vmatprep.subr.bf16.mxu0 %v5632_v46 }
  0x42   :  { %4682 = vmatpush1.bf16.msra.mxu0 %v5643_v50 }
  0x43   :  { %4684 = vmatprep.subr.bf16.mxu0 %v5670_v60 }
  0x46   :  { %4686 = vmatpush1.bf16.msra.mxu0 %v5672_v61 }
  0x47   :  { %4688 = vmatprep.subr.bf16.mxu0 %v5690_v1 }
  0x4a   :  { %4690 = vmatpush1.bf16.msra.mxu0 %v5702_v4 }
  0x4b   :  { %4692 = vmatprep.subr.bf16.mxu0 %v5718_v9 }
  0x4e   :  { %4694 = vmatpush1.bf16.msra.mxu0 %v5720_v10 }
  0x4f   :  { %4696 = vmatprep.subr.bf16.mxu0 %v5731_v13 }
  0x52   :  { %4698 = vmatpush1.bf16.msra.mxu0 %v5739_v17 }
  0x53   :  { %4732 = vmatprep.subr.bf16.mxu0 %v5555_v20 }
  0xeb   :  { %v5655_v55 = vpop.f32.mrb[0].mxu1 }
  0xec   :  { %156 = vrot.lane.b32.xlu1 %v5655_v55, %s5396_s23  ;;  %v5668_v59 = vpop.f32.mrb[1].mxu1 }
  0xed   :  { %154 = vrot.lane.b32.xlu0 %v5668_v59, %s5396_s23  ;;  %s5403_s23 = smov 3  }
  0xf0   :  { %170 = vrot.lane.b32.xlu1 %v5668_v59, %s5397_s0 }
  0xf1   :  { %162 = vrot.lane.b32.xlu0 %v5668_v59, %s5398_s20 }
  0xf4   :  { %172 = vrot.lane.b32.xlu1 %v5655_v55, %s5397_s0 }
  0xf5   :  { %164 = vrot.lane.b32.xlu0 %v5655_v55, %s5398_s20 }
 0x15e   :  { %v157_v18 = vpop.permute.xlu1 %156 }
 0x15f   :  { %v155_v19 = vpop.permute.xlu0 %154  ;;  %v161_v32 = vmax.f32 %v5655_v55, %v157_v18  ;;  %v5801_v55 = vpack.c.bf16 %v576_v53, %v572_v52  ;;  %v631_v52 = vld [vmem:[%s7053_s9 + $0x1f0] sm:$0xff] }
 0x160   :  { %v160_v21 = vmax.f32 %v5668_v59, %v155_v19  ;;  %v584_v59 = vld [vmem:[%s7053_s9 + $0x78] sm:$0xff]  ;;  %v595_v19 = vld [vmem:[%s7053_s9 + $0xd0] sm:$0xff]  ;;  %v5945_v53 = vpack.c.bf16 %v631_v52, %v627_v51 }
 0x161   :  { %v5822_v0 = vpack.c.bf16 %v584_v59, %v580_v58  ;;  %v7069_v59 = vmov 0  }
 0x162   :  { %v171_v22 = vpop.permute.xlu1 %170  ;;  %5205 = vset.pattern.permute.xlu1 %v7069_v59  ;;  %5206 = vset.pattern.permute.xlu0 %v7069_v59 }
 0x163   :  { %v163_v25 = vpop.permute.xlu0 %162 }
 0x164   :  { %v168_v26 = vmax.f32 %v160_v21, %v163_v25  ;;  %v599_v21 = vld [vmem:[%s7053_s9 + $0xf0] sm:$0xff] }
 0x165   :  { %v5879_v25 = vpack.c.bf16 %v599_v21, %v595_v19 }
 0x166   :  { %v176_v33 = vmax.f32 %v168_v26, %v171_v22  ;;  %v173_v38 = vpop.permute.xlu1 %172  ;;  %v608_v22 = vld [vmem:[%s7053_s9 + $0x138] sm:$0xff] }
 0x167   :  { %v165_v34 = vpop.permute.xlu0 %164 }
 0x168   :  { %v185_v36 = vadd.f32 %v4366_v31, %v176_v33  ;;  %v169_v37 = vmax.f32 %v161_v32, %v165_v34  ;;  %v616_v32 = vld [vmem:[%s7053_s9 + $0x178] sm:$0xff]  ;;  %v5897_v33 = vpack.c.bf16 %v607_v29, %v603_v28 }
 0x16a   :  { %v177_v44 = vmax.f32 %v169_v37, %v173_v38  ;;  %4367 = vmatmul.mubr.msk.f32.vlgmr.msra.gmra.mrb[2].mxu1 %vm209_vm2, %v185_v36  ;;  %v620_v37 = vld [vmem:[%s7053_s9 + $0x198] sm:$0xff] }
 0x16b   :  { %4594 = vmatpush1.bf16.msra.mxu1 %v4593_v35  ;;  %286 = vmatprep.mubr.f32.mxu1 %v7071_v16  ;;  %v611_v35 = vld [vmem:[%s7053_s9 + $0x150] sm:$0xff]  ;;  %v624_v38 = vld [vmem:[%s7053_s9 + $0x1b8] sm:$0xff] }
 0x16c   :  { %v186_v45 = vadd.f32 %v4366_v31, %v177_v44  ;;  %297 = vmatprep.subr.mxu1 %v208_v39  ;;  %v612_v31 = vld [vmem:[%s7053_s9 + $0x158] sm:$0xff]  ;;  %v5918_v41 = vpack.c.bf16 %v624_v38, %v620_v37  ;;  %v623_v44 = vld [vmem:[%s7053_s9 + $0x1b0] sm:$0xff] }
 0x16d   :  { %v5900_v34 = vpack.c.bf16 %v616_v32, %v612_v31 }
 0x16e   :  { %4368 = vmatmul.mubr.msk.f32.gmra.mrb[4].mxu1 %vm209_vm2, %v186_v45 }
 0x16f   :  { %298 = vmatpush1.msra.mxu1 %v207_v47  ;;  %357 = vmatprep.mubr.f32.mxu1 %v7071_v16  ;;  %v632_v47 = vld [vmem:[%s7053_s9 + $0x1f8] sm:$0xff] }
 0x170   :  { %4600 = vmatprep.subr.bf16.mxu1 %v4599_v48  ;;  %v5933_v48 = vpack.c.bf16 %v623_v44, %v619_v43 }
 0x172   :  { %4369 = vmatmul.mubr.msk.f32.vlgmr.msra.gmra.mrb[6].mxu1 %vm209_vm2, %v185_v36  ;;  %v615_v36 = vld [vmem:[%s7053_s9 + $0x170] sm:$0xff] }
 0x173   :  { %4602 = vmatpush1.bf16.msra.mxu1 %v4601_v54  ;;  %363 = vmatprep.mubr.f32.mxu1 %v7071_v16  ;;  %v5915_v39 = vpack.c.bf16 %v615_v36, %v611_v35  ;;  %v443_v54 = vpop.f32.mrb[0].mxu0  ;;  %v633_v35 = vld [vmem:[%s7054_s10] sm:$0xf] }
 0x174   :  { %4636 = vmatprep.subr.bf16.mxu1 %v5801_v55  ;;  %v445_v56 = vpop.f32.mrb[1].mxu0  ;;  %vm634_vm3 = vcmp.gt.f32.partialorder %v633_v35, 0.0 }
 0x175   :  { %v449_v57 = vpop.f32.mrb[2].mxu0  ;;  %v785_v51 = vsel %vm634_vm3, 1, %v7069_v59  ;;  %vm3262_vm3 = vcmask 1047559  }
 0x176   :  { %4370 = vmatmul.mubr.msk.f32.gmra.mrb[8].mxu1 %vm209_vm2, %v186_v45  ;;  %v628_v45 = vld [vmem:[%s7053_s9 + $0x1d8] sm:$0xff]  ;;  %v451_v58 = vpop.f32.mrb[3].mxu0  ;;  %vm3066_vm2 = vcmask 62468  }
 0x177   :  { %518 = vmatprep.mubr.f32.mxu1 %v7071_v16  ;;  %v5936_v49 = vpack.c.bf16 %v632_v47, %v628_v45  ;;  %v701_v2 = vpop.f32.mrb[4].mxu0  ;;  %v5988_v45 = vsub.s32 2, %v5971_v6  ;;  %v5991_v47 = vsub.s32 3, %v5971_v6 }
 0x178   :  { %v703_v3 = vpop.f32.mrb[5].mxu0 }
 0x179   :  { %7085 = vst [vmem:[#allocation9_spill] sm:$0xff] %v5988_v45  ;;  %7086 = vst [vmem:[#allocation10_spill] sm:$0xff] %v5991_v47  ;;  %v544_v52 = vrot.slane %v531_v12, %v5988_v45  ;;  %v797_v59 = vrot.slane %v785_v51, %v5988_v45 }
 0x17a   :  { %4373 = vmatmul.mubr.msk.f32.vlgmr.msra.gmra.mrb[6].mxu1 %vm370_vm1, %v5566_v23  ;;  %v596_v23 = vld [vmem:[%s7053_s9 + $0xd8] sm:$0xff] }
 0x17b   :  { %4638 = vmatpush1.bf16.msra.mxu1 %v5820_v63  ;;  %524 = vmatprep.mubr.f32.mxu1 %v7071_v16  ;;  %v5864_v18 = vpack.c.bf16 %v600_v14, %v596_v23  ;;  %v5980_v23 = vsub.s32 1, %v5971_v6  ;;  %v536_v14 = vrot.slane %v531_v12, %v5974_v11  ;;  %vm6012_vm6 = vcmp.eq.s32.totalorder %v797_v59, 1 }
 0x17c   :  { %4640 = vmatprep.subr.bf16.mxu1 %v5822_v0 }
 0x17d   :  { %7084 = vst [vmem:[#allocation8_spill] sm:$0xff] %v5980_v23  ;;  %v540_v21 = vrot.slane %v531_v12, %v5980_v23 }
 0x17e   :  { %4374 = vmatmul.mubr.msk.f32.gmra.mrb[8].mxu1 %vm370_vm1, %v5678_v62  ;;  %v604_v62 = vld [vmem:[%s7053_s9 + $0x118] sm:$0xff]  ;;  %vm3060_vm1 = vcmask 1045509  }
 0x17f   :  { %4642 = vmatpush1.bf16.msra.mxu1 %v5840_v7  ;;  %770 = vmatprep.mubr.f32.mxu1 %v7071_v16  ;;  %v5882_v26 = vpack.c.bf16 %v608_v22, %v604_v62 }
 0x180   :  { %4644 = vmatprep.subr.bf16.mxu1 %v5843_v8 }
 0x183   :  { %4646 = vmatpush1.bf16.msra.mxu1 %v5860_v15 }
 0x184   :  { %4648 = vmatprep.subr.bf16.mxu1 %v5864_v18 }
 0x187   :  { %4650 = vmatpush1.bf16.msra.mxu1 %v5879_v25 }
 0x188   :  { %4652 = vmatprep.subr.bf16.mxu1 %v5882_v26 }
 0x18b   :  { %4654 = vmatpush1.bf16.msra.mxu1 %v5897_v33 }
 0x18c   :  { %4656 = vmatprep.subr.bf16.mxu1 %v5900_v34 }
 0x18f   :  { %4658 = vmatpush1.bf16.msra.mxu1 %v5915_v39 }
 0x190   :  { %4660 = vmatprep.subr.bf16.mxu1 %v5918_v41 }
 0x193   :  { %4662 = vmatpush1.bf16.msra.mxu1 %v5933_v48 }
 0x194   :  { %4664 = vmatprep.subr.bf16.mxu1 %v5936_v49 }
 0x197   :  { %4666 = vmatpush1.bf16.msra.mxu1 %v5945_v53 }
 0x198   :  { %4700 = vmatprep.subr.bf16.mxu1 %v5801_v55 }
 0x19a   :  { %771 = vmatmul.mubr.f32.vlgmr.msra.gmra.mrb[10].mxu1 %v7071_v16 }
 0x19b   :  { %4702 = vmatpush1.bf16.msra.mxu1 %v5820_v63  ;;  %987 = vmatprep.mubr.f32.mxu1 %v7071_v16 }
 0x19c   :  { %4704 = vmatprep.subr.bf16.mxu1 %v5822_v0 }
 0x19f   :  { %4706 = vmatpush1.bf16.msra.mxu1 %v5840_v7 }
 0x1a0   :  { %4708 = vmatprep.subr.bf16.mxu1 %v5843_v8 }
 0x1a3   :  { %4710 = vmatpush1.bf16.msra.mxu1 %v5860_v15 }
 0x1a4   :  { %4712 = vmatprep.subr.bf16.mxu1 %v5864_v18 }
 0x1a7   :  { %4714 = vmatpush1.bf16.msra.mxu1 %v5879_v25 }
 0x1a8   :  { %4716 = vmatprep.subr.bf16.mxu1 %v5882_v26 }
 0x1ab   :  { %4718 = vmatpush1.bf16.msra.mxu1 %v5897_v33 }
 0x1ac   :  { %4720 = vmatprep.subr.bf16.mxu1 %v5900_v34 }
 0x1af   :  { %4722 = vmatpush1.bf16.msra.mxu1 %v5915_v39 }
 0x1b0   :  { %4724 = vmatprep.subr.bf16.mxu1 %v5918_v41 }
 0x1b3   :  { %4726 = vmatpush1.bf16.msra.mxu1 %v5933_v48 }
 0x1b4   :  { %4728 = vmatprep.subr.bf16.mxu1 %v5936_v49 }
 0x1b7   :  { %4730 = vmatpush1.bf16.msra.mxu1 %v5945_v53 }
 0x1b8   :  { %4764 = vmatprep.subr.bf16.mxu1 %v5801_v55 }
 0x23d   :  { %v282_v19 = vpop.f32.mrb[2].mxu1 }
 0x23e   :  { %v444_v62 = vadd.f32 %v443_v54, %v282_v19  ;;  %v284_v22 = vpop.f32.mrb[3].mxu1  ;;  %v548_v54 = vrot.slane %v531_v12, %v5991_v47 }
 0x23f   :  { %v446_v28 = vadd.f32 %v445_v56, %v284_v22  ;;  %v789_v56 = vrot.slane %v785_v51, %v5974_v11 }
 0x240   :  { %v553_v29 = vadd.f32 %v536_v14, %v444_v62 }
 0x241   :  { %v554_v31 = vadd.f32 %v540_v21, %v446_v28  ;;  %v288_v32 = vpop.f32.mrb[4].mxu1  ;;  %vm5998_vm4 = vcmp.eq.s32.totalorder %v789_v56, 1 }
 0x242   :  { %561 = vst [vmem:[#allocation2] sm:$0xff] %v553_v29  ;;  %v450_v36 = vadd.f32 %v449_v57, %v288_v32  ;;  %v290_v37 = vpop.f32.mrb[5].mxu1  ;;  %v793_v57 = vrot.slane %v785_v51, %v5980_v23 }
 0x243   :  { %562 = vst [vmem:[#allocation2 + $0x8] sm:$0xff] %v554_v31  ;;  %v452_v38 = vadd.f32 %v451_v58, %v290_v37 }
 0x244   :  { %v557_v43 = vadd.f32 %v536_v14, %v450_v36  ;;  %vm6002_vm5 = vcmp.eq.s32.totalorder %v793_v57, 1 }
 0x245   :  { %v558_v44 = vadd.f32 %v540_v21, %v452_v38 }
 0x246   :  { %565 = vst [vmem:[#allocation2 + $0x20] sm:$0xff] %v557_v43 }
 0x247   :  { %566 = vst [vmem:[#allocation2 + $0x28] sm:$0xff] %v558_v44 }
 0x249   :  { %v777_v29 = vld [vmem:[#allocation2] sm:$0x3] }
 0x24a   :  { %v778_v36 = vld [vmem:[#allocation2 + $0x8] sm:$0x3] }
 0x24d   :  { %v520_v58 = vpop.f32.mrb[6].mxu1  ;;  %v781_v14 = vld [vmem:[#allocation2 + $0x20] sm:$0xc0] }
 0x24e   :  { %v555_v19 = vadd.f32 %v544_v52, %v520_v58  ;;  %v522_v21 = vpop.f32.mrb[7].mxu1  ;;  %v810_v62 = vrot.slane %v781_v14, 6  ;;  %v782_v22 = vld [vmem:[#allocation2 + $0x28] sm:$0xc0] }
 0x24f   :  { %v556_v28 = vadd.f32 %v548_v54, %v522_v21  ;;  %v811_v32 = vrot.slane %v782_v22, 6 }
 0x250   :  { %563 = vst [vmem:[#allocation2 + $0x10] sm:$0xff] %v555_v19  ;;  %v818_v12 = vsel %vm5998_vm4, %v777_v29, %v810_v62 }
 0x251   :  { %564 = vst [vmem:[#allocation2 + $0x18] sm:$0xff] %v556_v28  ;;  %v526_v37 = vpop.f32.mrb[8].mxu1  ;;  %v819_v38 = vsel %vm6002_vm5, %v778_v36, %v811_v32  ;;  %v822_v43 = vadd.f32 %v818_v12, %v701_v2  ;;  %v801_v2 = vrot.slane %v785_v51, %v5991_v47 }
 0x252   :  { %v559_v44 = vadd.f32 %v544_v52, %v526_v37  ;;  %v823_v56 = vadd.f32 %v819_v38, %v703_v3  ;;  %v528_v58 = vpop.f32.mrb[9].mxu1 }
 0x253   :  { %v560_v14 = vadd.f32 %v548_v54, %v528_v58  ;;  %v826_v21 = vsub.f32 0.0, %v822_v43  ;;  %vm6018_vm7 = vcmp.eq.s32.totalorder %v801_v2, 1 }
 0x254   :  { %567 = vst [vmem:[#allocation2 + $0x30] sm:$0xff] %v559_v44  ;;  %v832_v57 = vsub.f32 0.0, %v823_v56 }
 0x255   :  { %568 = vst [vmem:[#allocation2 + $0x38] sm:$0xff] %v560_v14  ;;  %v827_v19 = vmul.f32 1.442695, %v826_v21 }
 0x256   :  { %v833_v22 = vmul.f32 1.442695, %v832_v57 }
 0x257   :  { %v779_v12 = vld [vmem:[#allocation2 + $0x10] sm:$0x3] }
 0x258   :  { %5207 = vpow2.f32 %v833_v22  ;;  %v780_v43 = vld [vmem:[#allocation2 + $0x18] sm:$0x3] }
 0x259   :  { %5209 = vpow2.f32 %v827_v19 }
 0x25b   :  { %v783_v62 = vld [vmem:[#allocation2 + $0x30] sm:$0xc0] }
 0x25c   :  { %v784_v28 = vld [vmem:[#allocation2 + $0x38] sm:$0xc0]  ;;  %v812_v32 = vrot.slane %v783_v62, 6 }
 0x25d   :  { %v813_v52 = vrot.slane %v784_v28, 6 }
 0x25e   :  { %v820_v38 = vsel %vm6012_vm6, %v779_v12, %v812_v32  ;;  %v1000_v12 = vld [vmem:[#allocation2 + $0x30] sm:$0x30] }
 0x262   :  { %v5208_v29 = vpop.eup %5207 }
 0x263   :  { %v5210_v5 = vpop.eup %5209  ;;  %v835_v3 = vadd.f32 1.0, %v5208_v29 }
 0x264   :  { %v829_v54 = vadd.f32 1.0, %v5210_v5  ;;  %v821_v5 = vsel %vm6018_vm7, %v780_v43, %v813_v52 }
 0x265   :  { %5211 = vrcp.f32 %v835_v3 }
 0x266   :  { %5213 = vrcp.f32 %v829_v54  ;;  %v998_v54 = vld [vmem:[#allocation2 + $0x20] sm:$0x30] }
 0x267   :  { %v1006_v43 = vrot.slane %v998_v54, 2 }
 0x26d   :  { %v772_v37 = vpop.f32.mrb[10].mxu1 }
 0x26e   :  { %v824_v56 = vadd.f32 %v820_v38, %v772_v37  ;;  %v774_v51 = vpop.f32.mrb[11].mxu1  ;;  %v999_v37 = vld [vmem:[#allocation2 + $0x28] sm:$0x30]  ;;  %v1001_v38 = vld [vmem:[#allocation2 + $0x38] sm:$0x30] }
 0x26f   :  { %v825_v59 = vadd.f32 %v821_v5, %v774_v51  ;;  %v5212_v57 = vpop.eup %5211  ;;  %v1007_v51 = vrot.slane %v999_v37, 2  ;;  %v1009_v5 = vrot.slane %v1001_v38, 2 }
 0x270   :  { %5215 = vtanh.f32 %v824_v56  ;;  %v5214_v21 = vpop.eup %5213  ;;  %v845_v19 = vmul.f32 0.0, %v5212_v57  ;;  %v1008_v56 = vrot.slane %v1000_v12, 2 }
 0x271   :  { %v839_v58 = vsub.f32 0.0, %v825_v59 }
 0x273   :  { %v840_v14 = vmul.f32 1.442695, %v839_v58  ;;  %v994_v58 = vld [vmem:[#allocation2] sm:$0xc] }
 0x275   :  { %5217 = vpow2.f32 %v840_v14 }
 0x27a   :  { %v5216_v22 = vpop.eup %5215 }
 0x27b   :  { %v846_v62 = vmul.f32 %v5216_v22, %v5214_v21  ;;  %v996_v21 = vld [vmem:[#allocation2 + $0x10] sm:$0xc] }
 0x27d   :  { %v6024_v29 = vadd.f32 %v846_v62, %v845_v19 }
 0x27f   :  { %v5218_v28 = vpop.eup %5217  ;;  %5219 = vtanh.f32 %v6024_v29 }
 0x280   :  { %v842_v32 = vadd.f32 1.0, %v5218_v28  ;;  %v1014_v28 = vsel %vm5998_vm4, %v994_v58, %v1006_v43 }
 0x282   :  { %5221 = vrcp.f32 %v842_v32  ;;  %v1016_v32 = vsel %vm6012_vm6, %v996_v21, %v1008_v56 }
 0x289   :  { %v5220_v2 = vpop.eup %5219 }
 0x28c   :  { %v5222_v3 = vpop.eup %5221 }
 0x28d   :  { %v849_v52 = vmul.f32 %v5222_v3, %v5220_v2  ;;  %v995_v2 = vld [vmem:[#allocation2 + $0x8] sm:$0xc] }
 0x28e   :  { %v1015_v38 = vsel %vm6002_vm5, %v995_v2, %v1007_v51 }
 0x28f   :  { %850 = vst [vmem:[#allocation3] sm:$0x3] %v849_v52  ;;  %851 = vst [vmem:[#allocation4 + $0xe] sm:$0x3] %v849_v52  ;;  %917 = vmatmul.mubr.f32.vlgmr.msra.gmra.mrb[6].mxu0 %v849_v52  ;;  %988 = vmatmul.mubr.f32.vlgmr.msra.gmra.mrb[12].mxu1 %v849_v52  ;;  %v997_v52 = vld [vmem:[#allocation2 + $0x18] sm:$0xc] }
 0x290   :  { %4734 = vmatpush1.bf16.msra.mxu0 %v5568_v24  ;;  %4766 = vmatpush1.bf16.msra.mxu1 %v5820_v63 }
 0x291   :  { %4736 = vmatprep.subr.bf16.mxu0 %v5581_v27  ;;  %4768 = vmatprep.subr.bf16.mxu1 %v5822_v0 }
 0x292   :  { %1130 = vmatprep.mubr.f32.mxu0 %v7071_v16  ;;  %1201 = vmatprep.mubr.f32.mxu1 %v7071_v16 }
 0x294   :  { %4738 = vmatpush1.bf16.msra.mxu0 %v5589_v30  ;;  %4770 = vmatpush1.bf16.msra.mxu1 %v5840_v7 }
 0x295   :  { %4740 = vmatprep.subr.bf16.mxu0 %v5614_v40  ;;  %4772 = vmatprep.subr.bf16.mxu1 %v5843_v8 }
 0x298   :  { %4742 = vmatpush1.bf16.msra.mxu0 %v5619_v42  ;;  %4774 = vmatpush1.bf16.msra.mxu1 %v5860_v15 }
 0x299   :  { %4744 = vmatprep.subr.bf16.mxu0 %v5632_v46  ;;  %4776 = vmatprep.subr.bf16.mxu1 %v5864_v18 }
 0x29c   :  { %4746 = vmatpush1.bf16.msra.mxu0 %v5643_v50  ;;  %4778 = vmatpush1.bf16.msra.mxu1 %v5879_v25 }
 0x29d   :  { %4748 = vmatprep.subr.bf16.mxu0 %v5670_v60  ;;  %4780 = vmatprep.subr.bf16.mxu1 %v5882_v26 }
 0x2a0   :  { %4750 = vmatpush1.bf16.msra.mxu0 %v5672_v61  ;;  %4782 = vmatpush1.bf16.msra.mxu1 %v5897_v33 }
 0x2a1   :  { %4752 = vmatprep.subr.bf16.mxu0 %v5690_v1  ;;  %4784 = vmatprep.subr.bf16.mxu1 %v5900_v34 }
 0x2a4   :  { %4754 = vmatpush1.bf16.msra.mxu0 %v5702_v4  ;;  %4786 = vmatpush1.bf16.msra.mxu1 %v5915_v39 }
 0x2a5   :  { %4756 = vmatprep.subr.bf16.mxu0 %v5718_v9  ;;  %4788 = vmatprep.subr.bf16.mxu1 %v5918_v41 }
 0x2a8   :  { %4758 = vmatpush1.bf16.msra.mxu0 %v5720_v10  ;;  %4790 = vmatpush1.bf16.msra.mxu1 %v5933_v48 }
 0x2a9   :  { %4760 = vmatprep.subr.bf16.mxu0 %v5731_v13  ;;  %4792 = vmatprep.subr.bf16.mxu1 %v5936_v49 }
 0x2ac   :  { %4762 = vmatpush1.bf16.msra.mxu0 %v5739_v17  ;;  %4794 = vmatpush1.bf16.msra.mxu1 %v5945_v53 }
 0x2ad   :  { %4796 = vmatprep.subr.bf16.mxu0 %v5555_v20  ;;  %4828 = vmatprep.subr.bf16.mxu1 %v5801_v55 }
 0x362   :  { %v918_v59 = vpop.f32.mrb[6].mxu0  ;;  %v989_v14 = vpop.f32.mrb[12].mxu1 }
 0x363   :  { %v1022_v57 = vrot.slane %v918_v59, 6  ;;  %v1024_v22 = vrot.slane %v989_v14, 6  ;;  %v920_v19 = vpop.f32.mrb[7].mxu0  ;;  %v991_v62 = vpop.f32.mrb[13].mxu1  ;;  %v1017_v59 = vsel %vm6018_vm7, %v997_v52, %v1009_v5 }
 0x364   :  { %v1023_v3 = vrot.slane %v920_v19, 6  ;;  %v1025_v54 = vrot.slane %v991_v62, 6 }
 0x365   :  { %v1030_v12 = vadd.f32 %v1022_v57, %v1014_v28  ;;  %v1032_v37 = vadd.f32 %v1024_v22, %v1016_v32  ;;  %v1054_v32 = vrot.slane %v6024_v29, 6  ;;  %v7095_v29 = vmov 0.0  }
 0x366   :  { %v1031_v14 = vadd.f32 %v1023_v3, %v1015_v38  ;;  %v1033_v16 = vadd.f32 %v1025_v54, %v1017_v59  ;;  %v1212_v38 = vld [vmem:[#allocation2 + $0x20] sm:$0xc]  ;;  %v1214_v59 = vld [vmem:[#allocation2 + $0x30] sm:$0xc] }
 0x367   :  { %v1034_v23 = vsub.f32 0.0, %v1030_v12 }
 0x368   :  { %v1040_v45 = vsub.f32 0.0, %v1031_v14  ;;  %v1047_v56 = vsub.f32 0.0, %v1033_v16  ;;  %v1213_v14 = vld [vmem:[#allocation2 + $0x28] sm:$0xc] }
 0x369   :  { %v1035_v43 = vmul.f32 1.442695, %v1034_v23 }
 0x36a   :  { %v1041_v58 = vmul.f32 1.442695, %v1040_v45  ;;  %v1048_v21 = vmul.f32 1.442695, %v1047_v56  ;;  %v1222_v56 = vrot.slane %v1214_v59, 6 }
 0x36b   :  { %5223 = vpow2.f32 %v1035_v43  ;;  %v1215_v43 = vld [vmem:[#allocation2 + $0x38] sm:$0xc] }
 0x36c   :  { %5225 = vpow2.f32 %v1041_v58  ;;  %v1220_v58 = vrot.slane %v1212_v38, 6 }
 0x36d   :  { %5227 = vpow2.f32 %v1048_v21  ;;  %v1221_v21 = vrot.slane %v1213_v14, 6 }
 0x36e   :  { %5229 = vtanh.f32 %v1032_v37 }
 0x375   :  { %v5224_v19 = vpop.eup %5223 }
 0x376   :  { %v5226_v62 = vpop.eup %5225  ;;  %v1037_v57 = vadd.f32 1.0, %v5224_v19  ;;  %v1223_v19 = vrot.slane %v1215_v43, 6 }
 0x377   :  { %v1043_v22 = vadd.f32 1.0, %v5226_v62  ;;  %v5228_v51 = vpop.eup %5227 }
 0x378   :  { %5231 = vrcp.f32 %v1037_v57  ;;  %v5230_v5 = vpop.eup %5229  ;;  %v1050_v45 = vadd.f32 1.0, %v5228_v51  ;;  %v1208_v57 = vld [vmem:[#allocation2] sm:$0x30] }
 0x379   :  { %5233 = vrcp.f32 %v1043_v22 }
 0x37a   :  { %5235 = vrcp.f32 %v1050_v45 }
 0x382   :  { %v5232_v28 = vpop.eup %5231 }
 0x383   :  { %v5234_v2 = vpop.eup %5233  ;;  %v1057_v23 = vmul.f32 %v5232_v28, %v5230_v5  ;;  %v1210_v5 = vld [vmem:[#allocation2 + $0x10] sm:$0x30] }
 0x384   :  { %v1056_v3 = vmul.f32 %v5234_v2, %v1054_v32  ;;  %v5236_v16 = vpop.eup %5235  ;;  %v1230_v45 = vsel %vm6012_vm6, %v1210_v5, %v1222_v56 }
 0x386   :  { %v6070_v52 = vadd.f32 %v1057_v23, %v1056_v3  ;;  %v1228_v23 = vsel %vm5998_vm4, %v1208_v57, %v1220_v58  ;;  %v1209_v3 = vld [vmem:[#allocation2 + $0x8] sm:$0x30] }
 0x387   :  { %v1229_v59 = vsel %vm6002_vm5, %v1209_v3, %v1221_v21 }
 0x388   :  { %5237 = vtanh.f32 %v6070_v52 }
 0x392   :  { %v5238_v54 = vpop.eup %5237 }
 0x393   :  { %v1060_v12 = vmul.f32 %v5238_v54, %v5236_v16  ;;  %v1211_v54 = vld [vmem:[#allocation2 + $0x18] sm:$0x30] }
 0x394   :  { %v1231_v14 = vsel %vm6018_vm7, %v1211_v54, %v1223_v19 }
 0x395   :  { %1061 = vst [vmem:[#allocation3] sm:$0xc] %v1060_v12  ;;  %1062 = vst [vmem:[#allocation4 + $0xa] sm:$0xc] %v1060_v12  ;;  %v1064_v37 = vrot.slane %v1060_v12, 2 }
 0x397   :  { %1131 = vmatmul.mubr.f32.vlgmr.msra.gmra.mrb[8].mxu0 %v1064_v37  ;;  %1202 = vmatmul.mubr.f32.vlgmr.msra.gmra.mrb[14].mxu1 %v1064_v37 }
 0x398   :  { %4798 = vmatpush1.bf16.msra.mxu0 %v5568_v24  ;;  %4830 = vmatpush1.bf16.msra.mxu1 %v5820_v63 }
 0x399   :  { %4800 = vmatprep.subr.bf16.mxu0 %v5581_v27  ;;  %4832 = vmatprep.subr.bf16.mxu1 %v5822_v0 }
 0x39a   :  { %1344 = vmatprep.mubr.f32.mxu0 %v7095_v29  ;;  %1415 = vmatprep.mubr.f32.mxu1 %v7095_v29 }
 0x39c   :  { %4802 = vmatpush1.bf16.msra.mxu0 %v5589_v30  ;;  %4834 = vmatpush1.bf16.msra.mxu1 %v5840_v7 }
 0x39d   :  { %4804 = vmatprep.subr.bf16.mxu0 %v5614_v40  ;;  %4836 = vmatprep.subr.bf16.mxu1 %v5843_v8 }
 0x3a0   :  { %4806 = vmatpush1.bf16.msra.mxu0 %v5619_v42  ;;  %4838 = vmatpush1.bf16.msra.mxu1 %v5860_v15 }
 0x3a1   :  { %4808 = vmatprep.subr.bf16.mxu0 %v5632_v46  ;;  %4840 = vmatprep.subr.bf16.mxu1 %v5864_v18 }
 0x3a4   :  { %4810 = vmatpush1.bf16.msra.mxu0 %v5643_v50  ;;  %4842 = vmatpush1.bf16.msra.mxu1 %v5879_v25 }
 0x3a5   :  { %4812 = vmatprep.subr.bf16.mxu0 %v5670_v60  ;;  %4844 = vmatprep.subr.bf16.mxu1 %v5882_v26 }
 0x3a8   :  { %4814 = vmatpush1.bf16.msra.mxu0 %v5672_v61  ;;  %4846 = vmatpush1.bf16.msra.mxu1 %v5897_v33 }
 0x3a9   :  { %4816 = vmatprep.subr.bf16.mxu0 %v5690_v1  ;;  %4848 = vmatprep.subr.bf16.mxu1 %v5900_v34 }
 0x3ac   :  { %4818 = vmatpush1.bf16.msra.mxu0 %v5702_v4  ;;  %4850 = vmatpush1.bf16.msra.mxu1 %v5915_v39 }
 0x3ad   :  { %4820 = vmatprep.subr.bf16.mxu0 %v5718_v9  ;;  %4852 = vmatprep.subr.bf16.mxu1 %v5918_v41 }
 0x3b0   :  { %4822 = vmatpush1.bf16.msra.mxu0 %v5720_v10  ;;  %4854 = vmatpush1.bf16.msra.mxu1 %v5933_v48 }
 0x3b1   :  { %4824 = vmatprep.subr.bf16.mxu0 %v5731_v13  ;;  %4856 = vmatprep.subr.bf16.mxu1 %v5936_v49 }
 0x3b4   :  { %4826 = vmatpush1.bf16.msra.mxu0 %v5739_v17  ;;  %4858 = vmatpush1.bf16.msra.mxu1 %v5945_v53 }
 0x3b5   :  { %4860 = vmatprep.subr.bf16.mxu0 %v5555_v20  ;;  %4892 = vmatprep.subr.bf16.mxu1 %v5801_v55 }
 0x46a   :  { %v1132_v62 = vpop.f32.mrb[8].mxu0  ;;  %v1203_v22 = vpop.f32.mrb[14].mxu1 }
 0x46b   :  { %v1236_v51 = vrot.slane %v1132_v62, 4  ;;  %v1238_v28 = vrot.slane %v1203_v22, 4  ;;  %v1134_v32 = vpop.f32.mrb[9].mxu0  ;;  %v1205_v2 = vpop.f32.mrb[15].mxu1 }
 0x46c   :  { %v1237_v16 = vrot.slane %v1134_v32, 4  ;;  %v1239_v12 = vrot.slane %v1205_v2, 4 }
 0x46d   :  { %v1244_v37 = vadd.f32 %v1236_v51, %v1228_v23  ;;  %v1246_v38 = vadd.f32 %v1238_v28, %v1230_v45  ;;  %v1268_v45 = vrot.slane %v6070_v52, 6  ;;  %v1426_v52 = vld [vmem:[#allocation2 + $0x20] sm:$0x3] }
 0x46e   :  { %v1245_v43 = vadd.f32 %v1237_v16, %v1229_v59  ;;  %v1247_v62 = vadd.f32 %v1239_v12, %v1231_v14 }
 0x46f   :  { %v1248_v22 = vsub.f32 0.0, %v1244_v37 }
 0x470   :  { %v1254_v47 = vsub.f32 0.0, %v1245_v43  ;;  %v1261_v56 = vsub.f32 0.0, %v1247_v62  ;;  %v1428_v43 = vld [vmem:[#allocation2 + $0x30] sm:$0x3]  ;;  %v1427_v62 = vld [vmem:[#allocation2 + $0x28] sm:$0x3] }
 0x471   :  { %v1249_v58 = vmul.f32 1.442695, %v1248_v22  ;;  %v1429_v22 = vld [vmem:[#allocation2 + $0x38] sm:$0x3] }
 0x472   :  { %v1255_v57 = vmul.f32 1.442695, %v1254_v47  ;;  %v1262_v5 = vmul.f32 1.442695, %v1261_v56  ;;  %v1435_v56 = vrot.slane %v1427_v62, 2 }
 0x473   :  { %5239 = vpow2.f32 %v1249_v58  ;;  %v1434_v58 = vrot.slane %v1426_v52, 2 }
 0x474   :  { %5241 = vpow2.f32 %v1255_v57  ;;  %v1436_v57 = vrot.slane %v1428_v43, 2 }
 0x475   :  { %5243 = vpow2.f32 %v1262_v5  ;;  %v1437_v5 = vrot.slane %v1429_v22, 2 }
 0x476   :  { %5245 = vtanh.f32 %v1246_v38 }
 0x47d   :  { %v5240_v32 = vpop.eup %5239 }
 0x47e   :  { %v5242_v2 = vpop.eup %5241  ;;  %v1251_v51 = vadd.f32 1.0, %v5240_v32 }
 0x47f   :  { %v1257_v28 = vadd.f32 1.0, %v5242_v2  ;;  %v5244_v21 = vpop.eup %5243  ;;  %v1422_v2 = vld [vmem:[#allocation2] sm:$0xc0] }
 0x480   :  { %5247 = vrcp.f32 %v1251_v51  ;;  %v5246_v19 = vpop.eup %5245  ;;  %v1264_v47 = vadd.f32 1.0, %v5244_v21  ;;  %v1424_v21 = vld [vmem:[#allocation2 + $0x10] sm:$0xc0] }
 0x481   :  { %5249 = vrcp.f32 %v1257_v28 }
 0x482   :  { %5251 = vrcp.f32 %v1264_v47  ;;  %v1423_v47 = vld [vmem:[#allocation2 + $0x8] sm:$0xc0] }
 0x483   :  { %v1443_v52 = vsel %vm6002_vm5, %v1423_v47, %v1435_v56 }
 0x48a   :  { %v5248_v23 = vpop.eup %5247 }
 0x48b   :  { %v5250_v3 = vpop.eup %5249  ;;  %v1271_v16 = vmul.f32 %v5248_v23, %v5246_v19 }
 0x48c   :  { %v1270_v54 = vmul.f32 %v5250_v3, %v1268_v45  ;;  %v5252_v37 = vpop.eup %5251  ;;  %v1442_v3 = vsel %vm5998_vm4, %v1422_v2, %v1434_v58 }
 0x48e   :  { %v6116_v12 = vadd.f32 %v1271_v16, %v1270_v54  ;;  %v1444_v16 = vsel %vm6012_vm6, %v1424_v21, %v1436_v57 }
 0x490   :  { %5253 = vtanh.f32 %v6116_v12 }
 0x49a   :  { %v5254_v59 = vpop.eup %5253 }
 0x49b   :  { %v1274_v38 = vmul.f32 %v5254_v59, %v5252_v37  ;;  %v1425_v37 = vld [vmem:[#allocation2 + $0x18] sm:$0xc0] }
 0x49c   :  { %v1445_v43 = vsel %vm6018_vm7, %v1425_v37, %v1437_v5 }
 0x49d   :  { %1275 = vst [vmem:[#allocation3] sm:$0x30] %v1274_v38  ;;  %1276 = vst [vmem:[#allocation4 + $0x6] sm:$0x30] %v1274_v38  ;;  %v1278_v14 = vrot.slane %v1274_v38, 4 }
 0x49f   :  { %1345 = vmatmul.mubr.f32.vlgmr.msra.gmra.mrb[10].mxu0 %v1278_v14  ;;  %1416 = vmatmul.mubr.f32.vlgmr.msra.gmra.mrb[16].mxu1 %v1278_v14 }
 0x4a0   :  { %4862 = vmatpush1.bf16.msra.mxu0 %v5568_v24  ;;  %4894 = vmatpush1.bf16.msra.mxu1 %v5820_v63 }
 0x4a1   :  { %4864 = vmatprep.subr.bf16.mxu0 %v5581_v27  ;;  %4896 = vmatprep.subr.bf16.mxu1 %v5822_v0 }
 0x4a2   :  { %1558 = vmatprep.mubr.f32.mxu0 %v7095_v29  ;;  %1629 = vmatprep.mubr.f32.mxu1 %v7095_v29 }
 0x4a4   :  { %4866 = vmatpush1.bf16.msra.mxu0 %v5589_v30  ;;  %4898 = vmatpush1.bf16.msra.mxu1 %v5840_v7 }
 0x4a5   :  { %4868 = vmatprep.subr.bf16.mxu0 %v5614_v40  ;;  %4900 = vmatprep.subr.bf16.mxu1 %v5843_v8 }
 0x4a8   :  { %4870 = vmatpush1.bf16.msra.mxu0 %v5619_v42  ;;  %4902 = vmatpush1.bf16.msra.mxu1 %v5860_v15 }
 0x4a9   :  { %4872 = vmatprep.subr.bf16.mxu0 %v5632_v46  ;;  %4904 = vmatprep.subr.bf16.mxu1 %v5864_v18 }
 0x4ac   :  { %4874 = vmatpush1.bf16.msra.mxu0 %v5643_v50  ;;  %4906 = vmatpush1.bf16.msra.mxu1 %v5879_v25 }
 0x4ad   :  { %4876 = vmatprep.subr.bf16.mxu0 %v5670_v60  ;;  %4908 = vmatprep.subr.bf16.mxu1 %v5882_v26 }
 0x4b0   :  { %4878 = vmatpush1.bf16.msra.mxu0 %v5672_v61  ;;  %4910 = vmatpush1.bf16.msra.mxu1 %v5897_v33 }
 0x4b1   :  { %4880 = vmatprep.subr.bf16.mxu0 %v5690_v1  ;;  %4912 = vmatprep.subr.bf16.mxu1 %v5900_v34 }
 0x4b4   :  { %4882 = vmatpush1.bf16.msra.mxu0 %v5702_v4  ;;  %4914 = vmatpush1.bf16.msra.mxu1 %v5915_v39 }
 0x4b5   :  { %4884 = vmatprep.subr.bf16.mxu0 %v5718_v9  ;;  %4916 = vmatprep.subr.bf16.mxu1 %v5918_v41 }
 0x4b8   :  { %4886 = vmatpush1.bf16.msra.mxu0 %v5720_v10  ;;  %4918 = vmatpush1.bf16.msra.mxu1 %v5933_v48 }
 0x4b9   :  { %4888 = vmatprep.subr.bf16.mxu0 %v5731_v13  ;;  %4920 = vmatprep.subr.bf16.mxu1 %v5936_v49 }
 0x4bc   :  { %4890 = vmatpush1.bf16.msra.mxu0 %v5739_v17  ;;  %4922 = vmatpush1.bf16.msra.mxu1 %v5945_v53 }
 0x4bd   :  { %4924 = vmatprep.subr.bf16.mxu0 %v5555_v20  ;;  %4956 = vmatprep.subr.bf16.mxu1 %v5801_v55 }
 0x572   :  { %v1346_v32 = vpop.f32.mrb[10].mxu0  ;;  %v1417_v51 = vpop.f32.mrb[16].mxu1 }
 0x573   :  { %v1450_v28 = vrot.slane %v1346_v32, 2  ;;  %v1452_v19 = vrot.slane %v1417_v51, 2  ;;  %v1348_v23 = vpop.f32.mrb[11].mxu0  ;;  %v1419_v45 = vpop.f32.mrb[17].mxu1 }
 0x574   :  { %v1451_v54 = vrot.slane %v1348_v23, 2  ;;  %v1453_v59 = vrot.slane %v1419_v45, 2 }
 0x575   :  { %v1458_v38 = vadd.f32 %v1450_v28, %v1442_v3  ;;  %v1460_v14 = vadd.f32 %v1452_v19, %v1444_v16  ;;  %v1482_v16 = vrot.slane %v6116_v12, 6  ;;  %v1640_v12 = vld [vmem:[#allocation2] sm:$0xc0] }
 0x576   :  { %v1459_v62 = vadd.f32 %v1451_v54, %v1443_v52  ;;  %v1461_v22 = vadd.f32 %v1453_v59, %v1445_v43 }
 0x577   :  { %v1462_v32 = vsub.f32 0.0, %v1458_v38 }
 0x578   :  { %v1468_v51 = vsub.f32 0.0, %v1459_v62  ;;  %v1475_v57 = vsub.f32 0.0, %v1461_v22  ;;  %v1642_v22 = vld [vmem:[#allocation2 + $0x10] sm:$0xc0] }
 0x579   :  { %v1463_v58 = vmul.f32 1.442695, %v1462_v32  ;;  %v1641_v32 = vld [vmem:[#allocation2 + $0x8] sm:$0xc0] }
 0x57a   :  { %v1469_v2 = vmul.f32 1.442695, %v1468_v51  ;;  %v1476_v21 = vmul.f32 1.442695, %v1475_v57  ;;  %v1643_v51 = vld [vmem:[#allocation2 + $0x18] sm:$0xc0] }
 0x57b   :  { %5255 = vpow2.f32 %v1463_v58  ;;  %v1636_v58 = vld [vmem:[#allocation2 + $0x20] sm:$0x3]  ;;  %v1648_v57 = vrot.slane %v1640_v12, 6 }
 0x57c   :  { %5257 = vpow2.f32 %v1469_v2  ;;  %v1638_v2 = vld [vmem:[#allocation2 + $0x30] sm:$0x3] }
 0x57d   :  { %5259 = vpow2.f32 %v1476_v21  ;;  %v1650_v21 = vrot.slane %v1642_v22, 6 }
 0x57e   :  { %5261 = vtanh.f32 %v1460_v14 }
 0x585   :  { %v5256_v23 = vpop.eup %5255 }
 0x586   :  { %v5258_v45 = vpop.eup %5257  ;;  %v1465_v28 = vadd.f32 1.0, %v5256_v23  ;;  %v1637_v23 = vld [vmem:[#allocation2 + $0x28] sm:$0x3] }
 0x587   :  { %v1471_v19 = vadd.f32 1.0, %v5258_v45  ;;  %v5260_v56 = vpop.eup %5259  ;;  %v1639_v45 = vld [vmem:[#allocation2 + $0x38] sm:$0x3] }
 0x588   :  { %5263 = vrcp.f32 %v1465_v28  ;;  %v5262_v5 = vpop.eup %5261  ;;  %v1478_v37 = vadd.f32 1.0, %v5260_v56  ;;  %v1649_v28 = vrot.slane %v1641_v32, 6 }
 0x589   :  { %5265 = vrcp.f32 %v1471_v19  ;;  %v1651_v19 = vrot.slane %v1643_v51, 6 }
 0x58a   :  { %5267 = vrcp.f32 %v1478_v37 }
 0x592   :  { %v5264_v3 = vpop.eup %5263 }
 0x593   :  { %v5266_v47 = vpop.eup %5265  ;;  %v1485_v54 = vmul.f32 %v5264_v3, %v5262_v5  ;;  %v1656_v5 = vsel %vm5998_vm4, %v1636_v58, %v1648_v57 }
 0x594   :  { %v1484_v59 = vmul.f32 %v5266_v47, %v1482_v16  ;;  %v5268_v52 = vpop.eup %5267  ;;  %v1658_v16 = vsel %vm6012_vm6, %v1638_v2, %v1650_v21 }
 0x596   :  { %v6162_v38 = vadd.f32 %v1485_v54, %v1484_v59  ;;  %v1657_v59 = vsel %vm6002_vm5, %v1637_v23, %v1649_v28 }
 0x598   :  { %5269 = vtanh.f32 %v6162_v38 }
 0x5a2   :  { %v5270_v43 = vpop.eup %5269 }
 0x5a3   :  { %v1488_v14 = vmul.f32 %v5270_v43, %v5268_v52  ;;  %v1659_v43 = vsel %vm6018_vm7, %v1639_v45, %v1651_v19 }
 0x5a5   :  { %1489 = vst [vmem:[#allocation3] sm:$0xc0] %v1488_v14  ;;  %1490 = vst [vmem:[#allocation4 + $0x2] sm:$0xc0] %v1488_v14  ;;  %v1492_v62 = vrot.slane %v1488_v14, 6 }
 0x5a7   :  { %1559 = vmatmul.mubr.f32.vlgmr.msra.gmra.mrb[12].mxu0 %v1492_v62  ;;  %1630 = vmatmul.mubr.f32.vlgmr.msra.gmra.mrb[18].mxu1 %v1492_v62 }
 0x5a8   :  { %4926 = vmatpush1.bf16.msra.mxu0 %v5568_v24  ;;  %4958 = vmatpush1.bf16.msra.mxu1 %v5820_v63 }
 0x5a9   :  { %4928 = vmatprep.subr.bf16.mxu0 %v5581_v27  ;;  %4960 = vmatprep.subr.bf16.mxu1 %v5822_v0 }
 0x5aa   :  { %1757 = vmatprep.mubr.f32.mxu0 %v7095_v29  ;;  %1828 = vmatprep.mubr.f32.mxu1 %v7095_v29 }
 0x5ac   :  { %4930 = vmatpush1.bf16.msra.mxu0 %v5589_v30  ;;  %4962 = vmatpush1.bf16.msra.mxu1 %v5840_v7 }
 0x5ad   :  { %4932 = vmatprep.subr.bf16.mxu0 %v5614_v40  ;;  %4964 = vmatprep.subr.bf16.mxu1 %v5843_v8 }
 0x5b0   :  { %4934 = vmatpush1.bf16.msra.mxu0 %v5619_v42  ;;  %4966 = vmatpush1.bf16.msra.mxu1 %v5860_v15 }
 0x5b1   :  { %4936 = vmatprep.subr.bf16.mxu0 %v5632_v46  ;;  %4968 = vmatprep.subr.bf16.mxu1 %v5864_v18 }
 0x5b4   :  { %4938 = vmatpush1.bf16.msra.mxu0 %v5643_v50  ;;  %4970 = vmatpush1.bf16.msra.mxu1 %v5879_v25 }
 0x5b5   :  { %4940 = vmatprep.subr.bf16.mxu0 %v5670_v60  ;;  %4972 = vmatprep.subr.bf16.mxu1 %v5882_v26 }
 0x5b8   :  { %4942 = vmatpush1.bf16.msra.mxu0 %v5672_v61  ;;  %4974 = vmatpush1.bf16.msra.mxu1 %v5897_v33 }
 0x5b9   :  { %4944 = vmatprep.subr.bf16.mxu0 %v5690_v1  ;;  %4976 = vmatprep.subr.bf16.mxu1 %v5900_v34 }
 0x5bc   :  { %4946 = vmatpush1.bf16.msra.mxu0 %v5702_v4  ;;  %4978 = vmatpush1.bf16.msra.mxu1 %v5915_v39 }
 0x5bd   :  { %4948 = vmatprep.subr.bf16.mxu0 %v5718_v9  ;;  %4980 = vmatprep.subr.bf16.mxu1 %v5918_v41 }
 0x5c0   :  { %4950 = vmatpush1.bf16.msra.mxu0 %v5720_v10  ;;  %4982 = vmatpush1.bf16.msra.mxu1 %v5933_v48 }
 0x5c1   :  { %4952 = vmatprep.subr.bf16.mxu0 %v5731_v13  ;;  %4984 = vmatprep.subr.bf16.mxu1 %v5936_v49 }
 0x5c4   :  { %4954 = vmatpush1.bf16.msra.mxu0 %v5739_v17  ;;  %4986 = vmatpush1.bf16.msra.mxu1 %v5945_v53 }
 0x5c5   :  { %4988 = vmatprep.subr.bf16.mxu0 %v5555_v20  ;;  %5020 = vmatprep.subr.bf16.mxu1 %v5801_v55 }
 0x67a   :  { %v1560_v56 = vpop.f32.mrb[12].mxu0  ;;  %v1631_v3 = vpop.f32.mrb[18].mxu1 }
 0x67b   :  { %v1660_v47 = vadd.f32 %v1656_v5, %v1560_v56  ;;  %v1662_v54 = vadd.f32 %v1658_v16, %v1631_v3  ;;  %v1562_v37 = vpop.f32.mrb[13].mxu0  ;;  %v1633_v52 = vpop.f32.mrb[19].mxu1  ;;  %v1684_v5 = vrot.slane %v6162_v38, 6  ;;  %v1839_v38 = vld [vmem:[#allocation2] sm:$0x30] }
 0x67c   :  { %v1661_v14 = vadd.f32 %v1657_v59, %v1562_v37  ;;  %v1663_v62 = vadd.f32 %v1659_v43, %v1633_v52 }
 0x67d   :  { %v1664_v12 = vsub.f32 0.0, %v1660_v47 }
 0x67e   :  { %v1670_v22 = vsub.f32 0.0, %v1661_v14  ;;  %v1677_v58 = vsub.f32 0.0, %v1663_v62  ;;  %v1841_v14 = vld [vmem:[#allocation2 + $0x10] sm:$0x30]  ;;  %v1840_v62 = vld [vmem:[#allocation2 + $0x8] sm:$0x30] }
 0x67f   :  { %v1665_v32 = vmul.f32 1.442695, %v1664_v12  ;;  %v1842_v12 = vld [vmem:[#allocation2 + $0x18] sm:$0x30] }
 0x680   :  { %v1671_v51 = vmul.f32 1.442695, %v1670_v22  ;;  %v1678_v2 = vmul.f32 1.442695, %v1677_v58  ;;  %v1835_v22 = vld [vmem:[#allocation2 + $0x20] sm:$0xc] }
 0x681   :  { %5271 = vpow2.f32 %v1665_v32  ;;  %v1837_v32 = vld [vmem:[#allocation2 + $0x30] sm:$0xc] }
 0x682   :  { %5273 = vpow2.f32 %v1671_v51  ;;  %v1836_v51 = vld [vmem:[#allocation2 + $0x28] sm:$0xc] }
 0x683   :  { %5275 = vpow2.f32 %v1678_v2  ;;  %v1847_v2 = vrot.slane %v1839_v38, 2 }
 0x684   :  { %5277 = vtanh.f32 %v1662_v54 }
 0x68b   :  { %v5272_v57 = vpop.eup %5271 }
 0x68c   :  { %v5274_v21 = vpop.eup %5273  ;;  %v1667_v56 = vadd.f32 1.0, %v5272_v57 }
 0x68d   :  { %v1673_v23 = vadd.f32 1.0, %v5274_v21  ;;  %v5276_v28 = vpop.eup %5275  ;;  %v1849_v21 = vrot.slane %v1841_v14, 2 }
 0x68e   :  { %5279 = vrcp.f32 %v1667_v56  ;;  %v5278_v45 = vpop.eup %5277  ;;  %v1680_v47 = vadd.f32 1.0, %v5276_v28  ;;  %v1838_v56 = vld [vmem:[#allocation2 + $0x38] sm:$0xc] }
 0x68f   :  { %5281 = vrcp.f32 %v1673_v23 }
 0x690   :  { %5283 = vrcp.f32 %v1680_v47 }
 0x698   :  { %v5280_v19 = vpop.eup %5279 }
 0x699   :  { %v5282_v3 = vpop.eup %5281  ;;  %v1687_v16 = vmul.f32 %v5280_v19, %v5278_v45  ;;  %v1848_v19 = vrot.slane %v1840_v62, 2 }
 0x69a   :  { %v1686_v37 = vmul.f32 %v5282_v3, %v1684_v5  ;;  %v5284_v52 = vpop.eup %5283  ;;  %v1857_v3 = vsel %vm6012_vm6, %v1837_v32, %v1849_v21 }
 0x69c   :  { %v6208_v59 = vadd.f32 %v1687_v16, %v1686_v37 }
 0x69e   :  { %5285 = vtanh.f32 %v6208_v59 }
 0x6a8   :  { %v5286_v43 = vpop.eup %5285 }
 0x6a9   :  { %v1690_v54 = vmul.f32 %v5286_v43, %v5284_v52  ;;  %v1856_v43 = vsel %vm6002_vm5, %v1836_v51, %v1848_v19  ;;  %v1895_v19 = vrot.slane %v6208_v59, 6 }
 0x6ab   :  { %1691 = vst [vmem:[#allocation3 + $0x8] sm:$0x3] %v1690_v54  ;;  %1692 = vst [vmem:[#allocation4 + $0x6] sm:$0x3] %v1690_v54  ;;  %1758 = vmatmul.mubr.f32.vlgmr.msra.gmra.mrb[14].mxu0 %v1690_v54  ;;  %1829 = vmatmul.mubr.f32.vlgmr.msra.gmra.mrb[20].mxu1 %v1690_v54 }
 0x6ac   :  { %4990 = vmatpush1.bf16.msra.mxu0 %v5568_v24  ;;  %5022 = vmatpush1.bf16.msra.mxu1 %v5820_v63 }
 0x6ad   :  { %4992 = vmatprep.subr.bf16.mxu0 %v5581_v27  ;;  %5024 = vmatprep.subr.bf16.mxu1 %v5822_v0 }
 0x6ae   :  { %1971 = vmatprep.mubr.f32.mxu0 %v7095_v29  ;;  %2042 = vmatprep.mubr.f32.mxu1 %v7095_v29 }
 0x6b0   :  { %4994 = vmatpush1.bf16.msra.mxu0 %v5589_v30  ;;  %5026 = vmatpush1.bf16.msra.mxu1 %v5840_v7 }
 0x6b1   :  { %4996 = vmatprep.subr.bf16.mxu0 %v5614_v40  ;;  %5028 = vmatprep.subr.bf16.mxu1 %v5843_v8 }
 0x6b4   :  { %4998 = vmatpush1.bf16.msra.mxu0 %v5619_v42  ;;  %5030 = vmatpush1.bf16.msra.mxu1 %v5860_v15 }
 0x6b5   :  { %5000 = vmatprep.subr.bf16.mxu0 %v5632_v46  ;;  %5032 = vmatprep.subr.bf16.mxu1 %v5864_v18 }
 0x6b8   :  { %5002 = vmatpush1.bf16.msra.mxu0 %v5643_v50  ;;  %5034 = vmatpush1.bf16.msra.mxu1 %v5879_v25 }
 0x6b9   :  { %5004 = vmatprep.subr.bf16.mxu0 %v5670_v60  ;;  %5036 = vmatprep.subr.bf16.mxu1 %v5882_v26 }
 0x6bc   :  { %5006 = vmatpush1.bf16.msra.mxu0 %v5672_v61  ;;  %5038 = vmatpush1.bf16.msra.mxu1 %v5897_v33 }
 0x6bd   :  { %5008 = vmatprep.subr.bf16.mxu0 %v5690_v1  ;;  %5040 = vmatprep.subr.bf16.mxu1 %v5900_v34 }
 0x6c0   :  { %5010 = vmatpush1.bf16.msra.mxu0 %v5702_v4  ;;  %5042 = vmatpush1.bf16.msra.mxu1 %v5915_v39 }
 0x6c1   :  { %5012 = vmatprep.subr.bf16.mxu0 %v5718_v9  ;;  %5044 = vmatprep.subr.bf16.mxu1 %v5918_v41 }
 0x6c4   :  { %5014 = vmatpush1.bf16.msra.mxu0 %v5720_v10  ;;  %5046 = vmatpush1.bf16.msra.mxu1 %v5933_v48 }
 0x6c5   :  { %5016 = vmatprep.subr.bf16.mxu0 %v5731_v13  ;;  %5048 = vmatprep.subr.bf16.mxu1 %v5936_v49 }
 0x6c8   :  { %5018 = vmatpush1.bf16.msra.mxu0 %v5739_v17  ;;  %5050 = vmatpush1.bf16.msra.mxu1 %v5945_v53 }
 0x6c9   :  { %5052 = vmatprep.subr.bf16.mxu0 %v5555_v20  ;;  %5084 = vmatprep.subr.bf16.mxu1 %v5801_v55  ;;  %v1850_v20 = vrot.slane %v1842_v12, 2  ;;  %v1855_v55 = vsel %vm5998_vm4, %v1835_v22, %v1847_v2 }
 0x6cb   :  { %v1858_v54 = vsel %vm6018_vm7, %v1838_v56, %v1850_v20 }
 0x77e   :  { %v1759_v58 = vpop.f32.mrb[14].mxu0  ;;  %v1830_v57 = vpop.f32.mrb[20].mxu1 }
 0x77f   :  { %v1863_v23 = vrot.slane %v1759_v58, 6  ;;  %v1865_v28 = vrot.slane %v1830_v57, 6  ;;  %v1761_v45 = vpop.f32.mrb[15].mxu0  ;;  %v1832_v5 = vpop.f32.mrb[21].mxu1 }
 0x780   :  { %v1864_v16 = vrot.slane %v1761_v45, 6  ;;  %v1866_v47 = vrot.slane %v1832_v5, 6 }
 0x781   :  { %v1871_v37 = vadd.f32 %v1863_v23, %v1855_v55  ;;  %v1873_v52 = vadd.f32 %v1865_v28, %v1857_v3 }
 0x782   :  { %v1872_v38 = vadd.f32 %v1864_v16, %v1856_v43  ;;  %v1874_v14 = vadd.f32 %v1866_v47, %v1858_v54 }
 0x783   :  { %v1875_v62 = vsub.f32 0.0, %v1871_v37 }
 0x784   :  { %v1881_v12 = vsub.f32 0.0, %v1872_v38  ;;  %v1888_v22 = vsub.f32 0.0, %v1874_v14 }
 0x785   :  { %v1876_v58 = vmul.f32 1.442695, %v1875_v62 }
 0x786   :  { %v1882_v57 = vmul.f32 1.442695, %v1881_v12  ;;  %v1889_v32 = vmul.f32 1.442695, %v1888_v22 }
 0x787   :  { %5287 = vpow2.f32 %v1876_v58 }
 0x788   :  { %5289 = vpow2.f32 %v1882_v57 }
 0x789   :  { %5291 = vpow2.f32 %v1889_v32 }
 0x78a   :  { %5293 = vtanh.f32 %v1873_v52 }
 0x791   :  { %v5288_v2 = vpop.eup %5287 }
 0x792   :  { %v5290_v21 = vpop.eup %5289  ;;  %v1878_v23 = vadd.f32 1.0, %v5288_v2 }
 0x793   :  { %v1884_v28 = vadd.f32 1.0, %v5290_v21  ;;  %v5292_v51 = vpop.eup %5291 }
 0x794   :  { %5295 = vrcp.f32 %v1878_v23  ;;  %v5294_v56 = vpop.eup %5293  ;;  %v1891_v55 = vadd.f32 1.0, %v5292_v51 }
 0x795   :  { %5297 = vrcp.f32 %v1884_v28 }
 0x796   :  { %5299 = vrcp.f32 %v1891_v55 }
 0x79e   :  { %v5296_v45 = vpop.eup %5295 }
 0x79f   :  { %v5298_v5 = vpop.eup %5297  ;;  %v1898_v20 = vmul.f32 %v5296_v45, %v5294_v56 }
 0x7a0   :  { %v1897_v3 = vmul.f32 %v5298_v5, %v1895_v19  ;;  %v5300_v47 = vpop.eup %5299 }
 0x7a2   :  { %v6254_v16 = vadd.f32 %v1898_v20, %v1897_v3  ;;  %v2352_v3 = vld [vmem:[%s7056_s12] sm:$0xff] }
 0x7a4   :  { %5301 = vtanh.f32 %v6254_v16  ;;  %v2109_v21 = vrot.slane %v6254_v16, 6  ;;  %v2353_v16 = vld [vmem:[%s7056_s12 + $0x8] sm:$0xff] }
 0x7ae   :  { %v5302_v37 = vpop.eup %5301 }
 0x7af   :  { %v1901_v52 = vmul.f32 %v5302_v37, %v5300_v47  ;;  %v2354_v47 = vld [vmem:[%s7056_s12 + $0x10] sm:$0xff]  ;;  %v5115_v37 = vpack.c.bf16 %v2353_v16, %v2352_v3 }
 0x7b1   :  { %1902 = vst [vmem:[#allocation3 + $0x8] sm:$0xc] %v1901_v52  ;;  %1903 = vst [vmem:[#allocation4 + $0x2] sm:$0xc] %v1901_v52  ;;  %v1905_v43 = vrot.slane %v1901_v52, 2  ;;  %v2355_v52 = vld [vmem:[%s7056_s12 + $0x18] sm:$0xff] }
 0x7b3   :  { %1972 = vmatmul.mubr.f32.vlgmr.msra.gmra.mrb[16].mxu0 %v1905_v43  ;;  %2043 = vmatmul.mubr.f32.vlgmr.msra.gmra.mrb[22].mxu1 %v1905_v43  ;;  %v5119_v43 = vpack.c.bf16 %v2355_v52, %v2354_v47 }
 0x7b4   :  { %5054 = vmatpush1.bf16.msra.mxu0 %v5568_v24  ;;  %5086 = vmatpush1.bf16.msra.mxu1 %v5820_v63  ;;  %v2053_v24 = vld [vmem:[#allocation2] sm:$0xc] }
 0x7b5   :  { %5056 = vmatprep.subr.bf16.mxu0 %v5581_v27  ;;  %5088 = vmatprep.subr.bf16.mxu1 %v5822_v0  ;;  %v2055_v27 = vld [vmem:[#allocation2 + $0x10] sm:$0xc] }
 0x7b6   :  { %2185 = vmatprep.mubr.f32.mxu0 %v7095_v29  ;;  %2256 = vmatprep.mubr.f32.mxu1 %v7095_v29 }
 0x7b8   :  { %5058 = vmatpush1.bf16.msra.mxu0 %v5589_v30  ;;  %5090 = vmatpush1.bf16.msra.mxu1 %v5840_v7  ;;  %v2054_v30 = vld [vmem:[#allocation2 + $0x8] sm:$0xc] }
 0x7b9   :  { %5060 = vmatprep.subr.bf16.mxu0 %v5614_v40  ;;  %5092 = vmatprep.subr.bf16.mxu1 %v5843_v8  ;;  %v2056_v40 = vld [vmem:[#allocation2 + $0x18] sm:$0xc]  ;;  %v2062_v0 = vrot.slane %v2054_v30, 6 }
 0x7bc   :  { %5062 = vmatpush1.bf16.msra.mxu0 %v5619_v42  ;;  %5094 = vmatpush1.bf16.msra.mxu1 %v5860_v15  ;;  %v2049_v42 = vld [vmem:[#allocation2 + $0x20] sm:$0x30] }
 0x7bd   :  { %5064 = vmatprep.subr.bf16.mxu0 %v5632_v46  ;;  %5096 = vmatprep.subr.bf16.mxu1 %v5864_v18  ;;  %v2051_v46 = vld [vmem:[#allocation2 + $0x30] sm:$0x30] }
 0x7c0   :  { %5066 = vmatpush1.bf16.msra.mxu0 %v5643_v50  ;;  %5098 = vmatpush1.bf16.msra.mxu1 %v5879_v25  ;;  %v2050_v50 = vld [vmem:[#allocation2 + $0x28] sm:$0x30] }
 0x7c1   :  { %5068 = vmatprep.subr.bf16.mxu0 %v5670_v60  ;;  %5100 = vmatprep.subr.bf16.mxu1 %v5882_v26 }
 0x7c4   :  { %5070 = vmatpush1.bf16.msra.mxu0 %v5672_v61  ;;  %5102 = vmatpush1.bf16.msra.mxu1 %v5897_v33  ;;  %v2061_v61 = vrot.slane %v2053_v24, 6  ;;  %v2356_v24 = vld [vmem:[%s7056_s12 + $0x20] sm:$0xff] }
 0x7c5   :  { %5072 = vmatprep.subr.bf16.mxu0 %v5690_v1  ;;  %5104 = vmatprep.subr.bf16.mxu1 %v5900_v34  ;;  %v2070_v34 = vsel %vm6002_vm5, %v2050_v50, %v2062_v0  ;;  %v2360_v50 = vld [vmem:[%s7056_s12 + $0x40] sm:$0xff]  ;;  %v2366_v0 = vld [vmem:[%s7056_s12 + $0x70] sm:$0xff] }
 0x7c6   :  { %v2069_v8 = vsel %vm5998_vm4, %v2049_v42, %v2061_v61  ;;  %v2359_v42 = vld [vmem:[%s7056_s12 + $0x38] sm:$0xff] }
 0x7c8   :  { %5074 = vmatpush1.bf16.msra.mxu0 %v5702_v4  ;;  %5106 = vmatpush1.bf16.msra.mxu1 %v5915_v39  ;;  %v2063_v4 = vrot.slane %v2055_v27, 6  ;;  %v2357_v27 = vld [vmem:[%s7056_s12 + $0x28] sm:$0xff] }
 0x7c9   :  { %5076 = vmatprep.subr.bf16.mxu0 %v5718_v9  ;;  %5108 = vmatprep.subr.bf16.mxu1 %v5918_v41  ;;  %v2052_v9 = vld [vmem:[#allocation2 + $0x38] sm:$0x30]  ;;  %v5123_v30 = vpack.c.bf16 %v2357_v27, %v2356_v24 }
 0x7ca   :  { %v2071_v15 = vsel %vm6012_vm6, %v2051_v46, %v2063_v4  ;;  %v2363_v4 = vld [vmem:[%s7056_s12 + $0x58] sm:$0xff] }
 0x7cc   :  { %5078 = vmatpush1.bf16.msra.mxu0 %v5720_v10  ;;  %5110 = vmatpush1.bf16.msra.mxu1 %v5933_v48 }
 0x7cd   :  { %5080 = vmatprep.subr.bf16.mxu0 %v5731_v13  ;;  %5112 = vmatprep.subr.bf16.mxu1 %v5936_v49 }
 0x7d0   :  { %5082 = vmatpush1.bf16.msra.mxu0 %v5739_v17  ;;  %5114 = vmatpush1.bf16.msra.mxu1 %v5945_v53  ;;  %v2064_v17 = vrot.slane %v2056_v40, 6  ;;  %v2358_v40 = vld [vmem:[%s7056_s12 + $0x30] sm:$0xff] }
 0x7d1   :  { %5116 = vmatprep.subr.bf16.mxu0 %v5115_v37  ;;  %v5127_v46 = vpack.c.bf16 %v2359_v42, %v2358_v40 }
 0x7d2   :  { %v2072_v39 = vsel %vm6018_vm7, %v2052_v9, %v2064_v17 }
 0x886   :  { %v1973_v60 = vpop.f32.mrb[16].mxu0  ;;  %v2044_v1 = vpop.f32.mrb[22].mxu1 }
 0x887   :  { %v2077_v10 = vrot.slane %v1973_v60, 4  ;;  %v2079_v13 = vrot.slane %v2044_v1, 4  ;;  %v1975_v63 = vpop.f32.mrb[17].mxu0  ;;  %v2046_v7 = vpop.f32.mrb[23].mxu1  ;;  %v2361_v60 = vld [vmem:[%s7056_s12 + $0x48] sm:$0xff]  ;;  %v2362_v1 = vld [vmem:[%s7056_s12 + $0x50] sm:$0xff] }
 0x888   :  { %v2078_v18 = vrot.slane %v1975_v63, 4  ;;  %v2080_v25 = vrot.slane %v2046_v7, 4  ;;  %v5131_v61 = vpack.c.bf16 %v2361_v60, %v2360_v50  ;;  %v5135_v9 = vpack.c.bf16 %v2363_v4, %v2362_v1  ;;  %v2367_v7 = vld [vmem:[%s7056_s12 + $0x78] sm:$0xff] }
 0x889   :  { %v2085_v26 = vadd.f32 %v2077_v10, %v2069_v8  ;;  %v2087_v33 = vadd.f32 %v2079_v13, %v2071_v15  ;;  %v2364_v10 = vld [vmem:[%s7056_s12 + $0x60] sm:$0xff]  ;;  %v2365_v13 = vld [vmem:[%s7056_s12 + $0x68] sm:$0xff]  ;;  %v5143_v17 = vpack.c.bf16 %v2367_v7, %v2366_v0  ;;  %s5405_s12 = smov 4  }
 0x88a   :  { %v2086_v41 = vadd.f32 %v2078_v18, %v2070_v34  ;;  %v2088_v48 = vadd.f32 %v2080_v25, %v2072_v39  ;;  %v5139_v63 = vpack.c.bf16 %v2365_v13, %v2364_v10  ;;  %v2334_v8 = vld [vmem:[%s7055_s11] sm:$0xff]  ;;  %v2335_v15 = vld [vmem:[%s7055_s11 + $0x8] sm:$0xff]  ;;  %v7098_v39 = vmov 0  }
 0x88b   :  { %v2089_v49 = vsub.f32 0.0, %v2085_v26  ;;  %v6355_v18 = vpack.c.bf16 %v2335_v15, %v2334_v8  ;;  %v2529_v25 = vld [vmem:[%s7096_s6] sm:$0xff]  ;;  %v2530_v26 = vld [vmem:[%s7096_s6 + $0x8] sm:$0xff]  ;;  %s5406_s6 = smov 1  }
 0x88c   :  { %v2095_v53 = vsub.f32 0.0, %v2086_v41  ;;  %v2102_v38 = vsub.f32 0.0, %v2088_v48  ;;  %2532 = vperm.xlu1 %5205, %v2529_v25   ;;  %v6373_v34 = vld [vmem:[%s7097_s8] sm:$0xff]  ;;  %v2351_v25 = vld [vmem:[#allocation4 + $0x8] sm:$0xff] }
 0x88d   :  { %v2090_v59 = vmul.f32 1.442695, %v2089_v49  ;;  %vm2672_vm8 = vcmp.gt.f32.partialorder %v6373_v34, 0.0  ;;  %v2267_v48 = vld [vmem:[#allocation2] sm:$0x3] }
 0x88e   :  { %v2096_v54 = vmul.f32 1.442695, %v2095_v53  ;;  %v2103_v14 = vmul.f32 1.442695, %v2102_v38  ;;  %v2673_v41 = vsel %vm2672_vm8, 1, %v7098_v39  ;;  %v2275_v38 = vrot.slane %v2267_v48, 2 }
 0x88f   :  { %5303 = vpow2.f32 %v2090_v59  ;;  %v2269_v49 = vld [vmem:[#allocation2 + $0x10] sm:$0x3]  ;;  %v2268_v53 = vld [vmem:[#allocation2 + $0x8] sm:$0x3]  ;;  %v2270_v59 = vld [vmem:[#allocation2 + $0x18] sm:$0x3] }
 0x890   :  { %5305 = vpow2.f32 %v2096_v54  ;;  %2535 = vperm.xlu1 %5205, %v2530_v26   ;;  %v2263_v54 = vld [vmem:[#allocation2 + $0x20] sm:$0xc0] }
 0x891   :  { %5307 = vpow2.f32 %v2103_v14  ;;  %v2265_v14 = vld [vmem:[#allocation2 + $0x30] sm:$0xc0]  ;;  %v2338_v26 = vld [vmem:[%s7055_s11 + $0x20] sm:$0xff] }
 0x892   :  { %5309 = vtanh.f32 %v2087_v33  ;;  %v6367_v33 = vld [vmem:[%s7058_s14] sm:$0xff] }
 0x893   :  { %4535 = vmatprep.subr.mxu1 %v6367_v33  ;;  %v2332_v48 = vld [vmem:[#allocation3] sm:$0xff] }
 0x894   :  { %2675 = vperm.xlu1 %5205, %v2673_v41   ;;  %v2339_v41 = vld [vmem:[%s7055_s11 + $0x28] sm:$0xff] }
 0x899   :  { %v5304_v62 = vpop.eup %5303 }
 0x89a   :  { %v5306_v12 = vpop.eup %5305  ;;  %v2092_v58 = vadd.f32 1.0, %v5304_v62  ;;  %v2277_v62 = vrot.slane %v2269_v49, 2  ;;  %v5155_v49 = vpack.c.bf16 %v2339_v41, %v2338_v26 }
 0x89b   :  { %v2098_v57 = vadd.f32 1.0, %v5306_v12  ;;  %v5308_v22 = vpop.eup %5307 }
 0x89c   :  { %5311 = vrcp.f32 %v2092_v58  ;;  %v5310_v32 = vpop.eup %5309  ;;  %v2105_v51 = vadd.f32 1.0, %v5308_v22  ;;  %v2266_v22 = vld [vmem:[#allocation2 + $0x38] sm:$0xc0] }
 0x89d   :  { %5313 = vrcp.f32 %v2098_v57  ;;  %v2264_v57 = vld [vmem:[#allocation2 + $0x28] sm:$0xc0] }
 0x89e   :  { %5315 = vrcp.f32 %v2105_v51  ;;  %v2278_v51 = vrot.slane %v2270_v59, 2  ;;  %v2341_v59 = vld [vmem:[%s7055_s11 + $0x38] sm:$0xff] }
 0x8a0   :  { %v2286_v47 = vsel %vm6018_vm7, %v2266_v22, %v2278_v51  ;;  %v2347_v22 = vld [vmem:[%s7055_s11 + $0x68] sm:$0xff]  ;;  %v7099_v51 = vlaneseq  ;;  %vm3271_vm7 = vcmask 64518  }
 0x8a6   :  { %v5312_v2 = vpop.eup %5311 }
 0x8a7   :  { %v5314_v23 = vpop.eup %5313  ;;  %v2112_v28 = vmul.f32 %v5312_v2, %v5310_v32 }
 0x8a8   :  { %v2111_v56 = vmul.f32 %v5314_v23, %v2109_v21  ;;  %v5316_v19 = vpop.eup %5315  ;;  %v2276_v23 = vrot.slane %v2268_v53, 2  ;;  %v2340_v53 = vld [vmem:[%s7055_s11 + $0x30] sm:$0xff] }
 0x8aa   :  { %v6298_v45 = vadd.f32 %v2112_v28, %v2111_v56  ;;  %v2283_v56 = vsel %vm5998_vm4, %v2263_v54, %v2275_v38  ;;  %v2284_v16 = vsel %vm6002_vm5, %v2264_v57, %v2276_v23  ;;  %v5159_v54 = vpack.c.bf16 %v2341_v59, %v2340_v53  ;;  %v2342_v38 = vld [vmem:[%s7055_s11 + $0x40] sm:$0xff] }
 0x8ab   :  { %v2346_v57 = vld [vmem:[%s7055_s11 + $0x60] sm:$0xff]  ;;  %vm3474_vm5 = vcmask 1041409  }
 0x8ac   :  { %5317 = vtanh.f32 %v6298_v45 }
 0x8b6   :  { %v5318_v5 = vpop.eup %5317 }
 0x8b7   :  { %v2115_v20 = vmul.f32 %v5318_v5, %v5316_v19  ;;  %v2285_v19 = vsel %vm6012_vm6, %v2265_v14, %v2277_v62  ;;  %v2344_v62 = vld [vmem:[%s7055_s11 + $0x50] sm:$0xff] }
 0x8b9   :  { %2116 = vst [vmem:[#allocation3 + $0x8] sm:$0x30] %v2115_v20  ;;  %2117 = vst [vmem:[#allocation4 - $0x2] sm:$0x30] %v2115_v20  ;;  %v2119_v55 = vrot.slane %v2115_v20, 4 }
 0x8bb   :  { %2186 = vmatmul.mubr.f32.vlgmr.msra.gmra.mrb[18].mxu0 %v2119_v55  ;;  %2257 = vmatmul.mubr.f32.vlgmr.msra.gmra.mrb[24].mxu1 %v2119_v55 }
 0x8bc   :  { %5118 = vmatpush3.bf16.msra.mxu0 %v5115_v37  ;;  %4536 = vmatpush3.msra.mxu1 %v6367_v33 }
 0x8bd   :  { %5120 = vmatprep.subr.bf16.mxu0 %v5119_v43  ;;  %4540 = vmatprep.subr.mxu1 %v7095_v29 }
 0x8c0   :  { %5122 = vmatpush3.bf16.msra.mxu0 %v5119_v43 }
 0x8c1   :  { %5124 = vmatprep.subr.bf16.mxu0 %v5123_v30 }
 0x8c4   :  { %5126 = vmatpush3.bf16.msra.mxu0 %v5123_v30 }
 0x8c5   :  { %5128 = vmatprep.subr.bf16.mxu0 %v5127_v46 }
 0x8c8   :  { %5130 = vmatpush3.bf16.msra.mxu0 %v5127_v46 }
 0x8c9   :  { %5132 = vmatprep.subr.bf16.mxu0 %v5131_v61 }
 0x8cc   :  { %5134 = vmatpush3.bf16.msra.mxu0 %v5131_v61  ;;  %v2323_v61 = vrot.slane %v6298_v45, 6  ;;  %v2337_v45 = vld [vmem:[%s7055_s11 + $0x18] sm:$0xff] }
 0x8cd   :  { %5136 = vmatprep.subr.bf16.mxu0 %v5135_v9 }
 0x8d0   :  { %5138 = vmatpush3.bf16.msra.mxu0 %v5135_v9 }
 0x8d1   :  { %5140 = vmatprep.subr.bf16.mxu0 %v5139_v63 }
 0x8d4   :  { %5142 = vmatpush3.bf16.msra.mxu0 %v5139_v63 }
 0x8d5   :  { %5144 = vmatprep.subr.bf16.mxu0 %v5143_v17 }
 0x8d8   :  { %5146 = vmatpush3.bf16.msra.mxu0 %v5143_v17  ;;  %v2336_v17 = vld [vmem:[%s7055_s11 + $0x10] sm:$0xff] }
 0x8d9   :  { %5148 = vmatprep.subr.bf16.mxu0 %v6355_v18  ;;  %v5151_v15 = vpack.c.bf16 %v2337_v45, %v2336_v17  ;;  %v7100_v45 = vld [vmem:[#allocation10_spill] sm:$0xff] }
 0x98e   :  { %v2187_v12 = vpop.f32.mrb[18].mxu0  ;;  %v2258_v58 = vpop.f32.mrb[24].mxu1 }
 0x98f   :  { %v2291_v32 = vrot.slane %v2187_v12, 2  ;;  %v2293_v2 = vrot.slane %v2258_v58, 2  ;;  %v2189_v21 = vpop.f32.mrb[19].mxu0  ;;  %v2260_v28 = vpop.f32.mrb[25].mxu1  ;;  %v2345_v12 = vld [vmem:[%s7055_s11 + $0x58] sm:$0xff] }
 0x990   :  { %v2292_v5 = vrot.slane %v2189_v21, 2  ;;  %v2294_v20 = vrot.slane %v2260_v28, 2  ;;  %v5167_v58 = vpack.c.bf16 %v2345_v12, %v2344_v62  ;;  %v2349_v21 = vld [vmem:[%s7055_s11 + $0x78] sm:$0xff]  ;;  %v2641_v28 = vmul.f32 1.442695, %v6367_v33 }
 0x991   :  { %v2299_v55 = vadd.f32 %v2291_v32, %v2283_v56  ;;  %v2301_v3 = vadd.f32 %v2293_v2, %v2285_v19  ;;  %v5171_v32 = vpack.c.bf16 %v2347_v22, %v2346_v57  ;;  %v2348_v2 = vld [vmem:[%s7055_s11 + $0x70] sm:$0xff]  ;;  %v6435_v56 = vand.u32 127, %v7099_v51 }
 0x992   :  { %v2300_v37 = vadd.f32 %v2292_v5, %v2284_v16  ;;  %v2302_v52 = vadd.f32 %v2294_v20, %v2286_v47  ;;  %v5175_v23 = vpack.c.bf16 %v2349_v21, %v2348_v2  ;;  %v2533_v5 = vpop.permute.xlu1 %2532  ;;  %v5400_v16 = vmov 1966171168  }
 0x993   :  { %v2303_v43 = vsub.f32 0.0, %v2299_v55  ;;  %vm2537_vm10 = vcmp.eq.s32.totalorder %v2533_v5, %v6435_v56  ;;  %v2775_v47 = vunpack.c.l.s4 %v5400_v16 }
 0x994   :  { %v2309_v24 = vsub.f32 0.0, %v2300_v37  ;;  %v2316_v36 = vsub.f32 0.0, %v2302_v52  ;;  %v6439_v20 = vsel %vm2537_vm10, 1.0, %v7095_v29  ;;  %v4375_v37 = vld [vmem:[%s7057_s13] ss:$0 sm:$0xff] }
 0x995   :  { %v2304_v27 = vmul.f32 1.442695, %v2303_v43  ;;  %4537 = vmatprep.mubr.msk.f32.mxu1 %vm2547_vm9, %v6439_v20  ;;  %v2776_v52 = vunpack.c.0.s8 %v2775_v47  ;;  %v3035_v47 = vsub.s32 5, %v5971_v6 }
 0x996   :  { %v2310_v31 = vmul.f32 1.442695, %v2309_v24  ;;  %v2317_v30 = vmul.f32 1.442695, %v2316_v36  ;;  %v2536_v33 = vpop.permute.xlu1 %2535 }
 0x997   :  { %5319 = vpow2.f32 %v2304_v27  ;;  %vm2538_vm11 = vcmp.eq.s32.totalorder %v2536_v33, %v6435_v56 }
 0x998   :  { %5321 = vpow2.f32 %v2310_v31  ;;  %v4380_v31 = vld [vmem:[%s7060_s16] ss:$0 sm:$0xff] }
 0x999   :  { %5323 = vpow2.f32 %v2317_v30  ;;  %v6464_v30 = vsub.s32 %v2776_v52, %v5971_v6 }
 0x99a   :  { %5325 = vtanh.f32 %v2301_v3  ;;  %v6447_v3 = vsel %vm2538_vm11, 1.0, %v7095_v29 }
 0x99b   :  { %4538 = vmatmul.mubr.msk.f32.vlgmr.msra.gmra.mrb[26].mxu1 %vm2547_vm9, %v6447_v3 }
 0x99c   :  { %4542 = vmatprep.mubr.msk.f32.mxu1 %vm5401_vm13, %v7095_v29 }
 0x9a1   :  { %v5320_v40 = vpop.eup %5319 }
 0x9a2   :  { %v5322_v42 = vpop.eup %5321  ;;  %v2306_v46 = vadd.f32 1.0, %v5320_v40 }
 0x9a3   :  { %v2312_v35 = vadd.f32 1.0, %v5322_v42  ;;  %v5324_v44 = vpop.eup %5323 }
 0x9a4   :  { %5327 = vrcp.f32 %v2306_v46  ;;  %v5326_v50 = vpop.eup %5325  ;;  %v2319_v9 = vadd.f32 1.0, %v5324_v44 }
 0x9a5   :  { %5329 = vrcp.f32 %v2312_v35 }
 0x9a6   :  { %5331 = vrcp.f32 %v2319_v9 }
 0x9ae   :  { %v5328_v60 = vpop.eup %5327 }
 0x9af   :  { %v5330_v1 = vpop.eup %5329  ;;  %v2326_v4 = vmul.f32 %v5328_v60, %v5326_v50  ;;  %v6477_v50 = vld [vmem:[%s7059_s15] sm:$0xff] }
 0x9b0   :  { %v2325_v10 = vmul.f32 %v5330_v1, %v2323_v61  ;;  %v5332_v63 = vpop.eup %5331 }
 0x9b2   :  { %v2327_v13 = vadd.f32 %v2326_v4, %v2325_v10 }
 0x9b4   :  { %5333 = vtanh.f32 %v2327_v13 }
 0x9b5   :  { %5335 = vpow2.f32 %v2641_v28 }
 0x9be   :  { %v5334_v0 = vpop.eup %5333 }
 0x9bf   :  { %v2329_v7 = vmul.f32 %v5334_v0, %v5332_v63  ;;  %v6443_v55 = vpop.eup %5335  ;;  %v3268_v0 = vrot.slane %v6447_v3, 2 }
 0x9c0   :  { %4541 = vmatpush3.msra.mxu1 %v6443_v55 }
 0x9c1   :  { %2330 = vst [vmem:[#allocation3 + $0x8] sm:$0xc0] %v2329_v7  ;;  %2331 = vst [vmem:[#allocation4 - $0x6] sm:$0xc0] %v2329_v7  ;;  %4545 = vmatprep.subr.mxu1 %v7095_v29 }
 0x9c8   :  { %v2350_v8 = vld [vmem:[#allocation4] sm:$0xff]  ;;  %v2333_v19 = vld [vmem:[#allocation3 + $0x8] sm:$0xff] }
 0x9c9   :  { %4497 = vmatprep.mubr.f32.mxu0 %v2350_v8 }
 0x9ca   :  { %4498 = vmatmul.mubr.f32.vlgmr.msra.gmra.mrb[20].mxu0 %v2351_v25 }
 0x9cb   :  { %5150 = vmatpush3.bf16.msra.mxu0 %v6355_v18  ;;  %4532 = vmatprep.mubr.f32.mxu0 %v2332_v48  ;;  %v2343_v18 = vld [vmem:[%s7055_s11 + $0x48] sm:$0xff] }
 0x9cc   :  { %5152 = vmatprep.subr.bf16.mxu0 %v5151_v15  ;;  %v5163_v14 = vpack.c.bf16 %v2343_v18, %v2342_v38 }
 0x9cf   :  { %5154 = vmatpush3.bf16.msra.mxu0 %v5151_v15  ;;  %v7101_v15 = vld [vmem:[#allocation9_spill] sm:$0xff] }
 0x9d0   :  { %5156 = vmatprep.subr.bf16.mxu0 %v5155_v49 }
 0x9d3   :  { %5158 = vmatpush3.bf16.msra.mxu0 %v5155_v49  ;;  %v6506_v49 = vpop.permute.xlu1 %2675 }
 0x9d4   :  { %5160 = vmatprep.subr.bf16.mxu0 %v5159_v54  ;;  %vm2677_vm15 = vcmp.eq.s32.totalorder %v6506_v49, 1 }
 0x9d7   :  { %5162 = vmatpush3.bf16.msra.mxu0 %v5159_v54 }
 0x9d8   :  { %5164 = vmatprep.subr.bf16.mxu0 %v5163_v14 }
 0x9db   :  { %5166 = vmatpush3.bf16.msra.mxu0 %v5163_v14 }
 0x9dc   :  { %5168 = vmatprep.subr.bf16.mxu0 %v5167_v58 }
 0x9df   :  { %5170 = vmatpush3.bf16.msra.mxu0 %v5167_v58  ;;  %v6521_v58 = vsub.s32 %v6435_v56, %v5971_v6 }
 0x9e0   :  { %5172 = vmatprep.subr.bf16.mxu0 %v5171_v32 }
 0x9e3   :  { %5174 = vmatpush3.bf16.msra.mxu0 %v5171_v32 }
 0x9e4   :  { %5176 = vmatprep.subr.bf16.mxu0 %v5175_v23 }
 0x9e7   :  { %5178 = vmatpush3.bf16.msra.mxu0 %v5175_v23 }
 0x9ea   :  { %4533 = vmatmul.mubr.f32.vlgmr.msra.gmra.mrb[20].mxu0 %v2333_v19 }
 0xa6e   :  { %v4539_v63 = vpop.f32.mrb[26].mxu1 }
 0xa6f   :  { %v6495_v7 = vmul.f32 %v4539_v63, %v3268_v0  ;;  %v6497_v17 = vpop.f32.mrb[27].mxu1 }
 0xabd   :  { %v4534_v43 = vpop.f32.mrb[20].mxu0 }
 0xabe   :  { %v6456_v24 = vadd.f32 %v4534_v43, %v4375_v37  ;;  %v2509_v27 = vpop.f32.mrb[21].mxu0 }
 0xabf   :  { %v6461_v36 = vadd.f32 %v4375_v37, %v2509_v27 }
 0xac1   :  { %v6467_v40 = vadd.f32 %v4380_v31, %v6461_v36  ;;  %v2835_v8 = vrot.slane %v6461_v36, %v7100_v45  ;;  %v2828_v25 = vrot.slane %v6461_v36, %v7101_v15  ;;  %v3036_v37 = vrot.slane %v6461_v36, %v3035_v47 }
 0xac3   :  { %v2681_v42 = vsel %vm2651_vm12, %v6467_v40, -inf  ;;  %v2780_v46 = vrot.slane %v6467_v40, %v6464_v30  ;;  %v2771_v2 = vrot.slane %v6467_v40, 6 }
 0xac4   :  { %2682 = vmax.xlane.f32.xlu0 %v2681_v42 }
 0xac5   :  { %v2788_v35 = vrot.slane %v2780_v46, %v6464_v30  ;;  %v2781_v44 = vcombine.high %v2780_v46, %v2780_v46 }
 0xac7   :  { %v2799_v60 = vrot.slane %v2788_v35, %v5974_v11  ;;  %v2795_v61 = vrot.slane %v2781_v44, %v6464_v30 }
 0xac9   :  { %v6482_v1 = vadd.f32 %v2799_v60, %v6477_v50  ;;  %v2803_v4 = vrot.slane %v2795_v61, %v5974_v11 }
 0xacb   :  { %v2808_v9 = vsel %vm2547_vm9, %v6482_v1, -inf  ;;  %v6488_v10 = vadd.f32 %v2803_v4, %v6477_v50 }
 0xacc   :  { %2809 = vmax.xlane.f32.xlu1 %v2808_v9 }
 0xacd   :  { %v2811_v13 = vsel %vm2547_vm9, %v6488_v10, -inf }
 0xace   :  { %2812 = vmax.xlane.f32.xlu0 %v2811_v13 }
 0xadd   :  { %2837 = vbcast.lane.b32.xlu1 %v2835_v8, 256 }
 0xae4   :  { %2830 = vbcast.lane.b32.xlu0 %v2828_v25, 256  ;;  %v3028_v25 = vsub.s32 4, %v5971_v6 }
 0xb51   :  { %v2683_v26 = vpop.xlane.xlu0 %2682 }
 0xb52   :  { %v2684_v41 = vsub.f32 %v6467_v40, %v2683_v26  ;;  %v2767_v44 = vrot.slane %v2683_v26, 6  ;;  %v3029_v26 = vrot.slane %v6461_v36, %v3028_v25 }
 0xb54   :  { %v2685_v48 = vmul.f32 1.442695, %v2684_v41 }
 0xb56   :  { %5337 = vpow2.f32 %v2685_v48 }
 0xb59   :  { %v6508_v53 = vpop.xlane.xlu1 %2809 }
 0xb5b   :  { %v6510_v59 = vpop.xlane.xlu0 %2812 }
 0xb5d   :  { %v2838_v14 = vpop.permute.xlu1 %2837 }
 0xb5e   :  { %v2842_v62 = vadd.f32 %v2838_v14, %v6510_v59 }
 0xb5f   :  { %v2831_v54 = vpop.permute.xlu0 %2830 }
 0xb60   :  { %v5338_v38 = vpop.eup %5337  ;;  %v2841_v18 = vadd.f32 %v2831_v54, %v6508_v53 }
 0xb61   :  { %4543 = vmatmul.mubr.msk.f32.vlgmr.msra.gmra.mrb[28].mxu1 %vm2547_vm9, %v5338_v38 }
 0xb62   :  { %2846 = vperm.xlu1 %5205, %v2841_v18   ;;  %4546 = vmatpush3.msra.mxu1 %v6443_v55 }
 0xb63   :  { %4547 = vmatprep.mubr.msk.f32.mxu1 %vm5401_vm13, %v7095_v29  ;;  %4550 = vmatprep.subr.mxu1 %v7095_v29 }
 0xb66   :  { %2849 = vperm.xlu1 %5205, %v2842_v62  }
 0xbe1   :  { %v2847_v12 = vpop.permute.xlu1 %2846 }
 0xbe2   :  { %v2854_v22 = vrot.slane %v2847_v12, %v6521_v58 }
 0xbe5   :  { %v2850_v57 = vpop.permute.xlu1 %2849 }
 0xbe6   :  { %v2858_v32 = vrot.slane %v2850_v57, %v6521_v58 }
 0xbe8   :  { %v2860_v21 = vsel %vm2859_vm14, %v2858_v32, %v2854_v22 }
 0xbe9   :  { %v2862_v23 = vsel %vm2677_vm15, %v2860_v21, %v2771_v2 }
 0xbea   :  { %v2980_v28 = vrot.slane %v2862_v23, %v6464_v30 }
 0xbec   :  { %v2988_v51 = vrot.slane %v2980_v28, %v6464_v30  ;;  %v2981_v27 = vcombine.high %v2980_v28, %v2980_v28 }
 0xbee   :  { %v2996_v19 = vcombine.high %v2988_v51, %v2988_v51  ;;  %v2995_v31 = vrot.slane %v2981_v27, %v6464_v30 }
 0xbf0   :  { %v3001_v5 = vrot.slane %v2996_v19, %v5974_v11  ;;  %v2997_v46 = vcombine.high %v2995_v31, %v2995_v31  ;;  %v3063_v19 = vrot.slane %v2862_v23, 6 }
 0xbf2   :  { %v6534_v33 = vadd.f32 %v3001_v5, %v6477_v50  ;;  %v3005_v61 = vrot.slane %v2997_v46, %v5974_v11 }
 0xbf4   :  { %v3010_v16 = vsel %vm2547_vm9, %v6534_v33, -inf  ;;  %v6552_v63 = vadd.f32 %v3005_v61, %v6477_v50  ;;  %v3230_v61 = vsub.s32 6, %v5971_v6 }
 0xbf5   :  { %3011 = vmax.xlane.f32.xlu1 %v3010_v16 }
 0xbf6   :  { %v3013_v8 = vsel %vm2547_vm9, %v6552_v63, -inf }
 0xc06   :  { %3038 = vbcast.lane.b32.xlu1 %v3036_v37, 256 }
 0xc34   :  { %v2756_v52 = vpop.f32.mrb[28].mxu1 }
 0xc35   :  { %5339 = vlog2.f32 %v2756_v52  ;;  %v4544_v43 = vpop.f32.mrb[29].mxu1 }
 0xc3f   :  { %v5340_v40 = vpop.eup %5339 }
 0xc40   :  { %v2761_v42 = vmul.f32 0.6931472, %v5340_v40 }
 0xc42   :  { %v2763_v35 = vrot.slane %v2761_v42, 6 }
 0xc44   :  { %v2765_v60 = vadd.f32 %v2763_v35, %v6461_v36 }
 0xc46   :  { %v2769_v4 = vadd.f32 %v2767_v44, %v2765_v60  ;;  %v3237_v60 = vsub.s32 7, %v5971_v6 }
 0xc48   :  { %v6547_v9 = vsel %vm2677_vm15, %v2769_v4, %v2771_v2  ;;  %v3238_v4 = vrot.slane %v6461_v36, %v3237_v60 }
 0xc49   :  { %v2879_v13 = vsel %vm2863_vm0, %v6547_v9, -inf }
 0xc4a   :  { %2880 = vmax.xlane.f32.xlu0 %v2879_v13  ;;  %v3231_v13 = vrot.slane %v6461_v36, %v3230_v61 }
 0xc4e   :  { %3014 = vmax.xlane.f32.xlu0 %v3013_v8 }
 0xc64   :  { %3031 = vbcast.lane.b32.xlu0 %v3029_v26, 256 }
 0xc82   :  { %v6563_v18 = vpop.xlane.xlu1 %3011 }
 0xc86   :  { %v3039_v12 = vpop.permute.xlu1 %3038 }
 0xcd7   :  { %v2881_v41 = vpop.xlane.xlu0 %2880 }
 0xcd8   :  { %v2882_v48 = vsub.f32 %v6547_v9, %v2881_v41 }
 0xcda   :  { %v2883_v54 = vmul.f32 1.442695, %v2882_v48 }
 0xcdb   :  { %v6561_v38 = vpop.xlane.xlu0 %3014 }
 0xcdc   :  { %5341 = vpow2.f32 %v2883_v54  ;;  %v3043_v57 = vadd.f32 %v3039_v12, %v6561_v38 }
 0xcdf   :  { %v3032_v14 = vpop.permute.xlu0 %3031 }
 0xce0   :  { %v3042_v62 = vadd.f32 %v3032_v14, %v6563_v18 }
 0xce2   :  { %3047 = vperm.xlu0 %5206, %v3042_v62   ;;  %v2966_v62 = vrot.slane %v2881_v41, 6 }
 0xce6   :  { %v5342_v22 = vpop.eup %5341  ;;  %3050 = vperm.xlu0 %5206, %v3043_v57  }
 0xce7   :  { %v2886_v32 = vrot.slane %v5342_v22, 2 }
 0xce9   :  { %4548 = vmatmul.mubr.msk.f32.vlgmr.msra.gmra.mrb[30].mxu1 %vm2547_vm9, %v2886_v32 }
 0xcea   :  { %4551 = vmatpush3.msra.mxu1 %v6443_v55  ;;  %4552 = vmatprep.mubr.msk.f32.mxu1 %vm5401_vm13, %v7095_v29 }
 0xceb   :  { %4555 = vmatprep.subr.mxu1 %v7095_v29 }
 0xd61   :  { %v3048_v2 = vpop.permute.xlu0 %3047 }
 0xd62   :  { %v3055_v28 = vrot.slane %v3048_v2, %v6521_v58 }
 0xd65   :  { %v3051_v21 = vpop.permute.xlu0 %3050 }
 0xd66   :  { %v3059_v51 = vrot.slane %v3051_v21, %v6521_v58 }
 0xd68   :  { %v3061_v5 = vsel %vm3060_vm1, %v3059_v51, %v3055_v28 }
 0xd69   :  { %v3065_v16 = vsel %vm2677_vm15, %v3061_v5, %v3063_v19  ;;  %v2970_v19 = vrot.slane %v6547_v9, 6 }
 0xd6a   :  { %v3177_v37 = vcombine.high %v3065_v16, %v3065_v16 }
 0xd6c   :  { %v3184_v52 = vrot.slane %v3177_v37, %v6464_v30 }
 0xd6e   :  { %v3192_v43 = vrot.slane %v3184_v52, %v6464_v30  ;;  %v3185_v27 = vcombine.high %v3184_v52, %v3184_v52 }
 0xd70   :  { %v3203_v31 = vrot.slane %v3192_v43, %v5974_v11  ;;  %v3199_v40 = vrot.slane %v3185_v27, %v6464_v30 }
 0xd72   :  { %v6582_v42 = vadd.f32 %v3203_v31, %v6477_v50  ;;  %v3207_v23 = vrot.slane %v3199_v40, %v5974_v11  ;;  %v3265_v31 = vrot.slane %v3065_v16, 6 }
 0xd74   :  { %v3212_v46 = vsel %vm2547_vm9, %v6582_v42, -inf  ;;  %v6588_v35 = vadd.f32 %v3207_v23, %v6477_v50 }
 0xd75   :  { %3213 = vmax.xlane.f32.xlu0 %v3212_v46 }
 0xd76   :  { %v3215_v44 = vsel %vm2547_vm9, %v6588_v35, -inf }
 0xd77   :  { %3216 = vmax.xlane.f32.xlu1 %v3215_v44 }
 0xd88   :  { %3240 = vbcast.lane.b32.xlu1 %v3238_v4, 256 }
 0xd8b   :  { %3233 = vbcast.lane.b32.xlu0 %v3231_v13, 256 }
 0xdbc   :  { %v2955_v8 = vpop.f32.mrb[30].mxu1 }
 0xdbd   :  { %5343 = vlog2.f32 %v2955_v8  ;;  %v4549_v26 = vpop.f32.mrb[31].mxu1 }
 0xdc7   :  { %v5344_v48 = vpop.eup %5343 }
 0xdc8   :  { %v2960_v54 = vmul.f32 0.6931472, %v5344_v48 }
 0xdca   :  { %v2962_v14 = vrot.slane %v2960_v54, 4 }
 0xdcc   :  { %v2964_v12 = vadd.f32 %v2962_v14, %v6461_v36 }
 0xdce   :  { %v2968_v57 = vadd.f32 %v2966_v62, %v2964_v12 }
 0xdd0   :  { %v6610_v41 = vsel %vm2677_vm15, %v2968_v57, %v2970_v19  ;;  %v7102_v57 = vld [vmem:[#allocation8_spill] sm:$0xff] }
 0xdd1   :  { %v3082_v5 = vsel %vm3066_vm2, %v6610_v41, -inf }
 0xe02   :  { %v6601_v22 = vpop.xlane.xlu0 %3213 }
 0xe04   :  { %v6603_v32 = vpop.xlane.xlu1 %3216 }
 0xe06   :  { %v3234_v2 = vpop.permute.xlu0 %3233 }
 0xe07   :  { %v3244_v21 = vadd.f32 %v3234_v2, %v6601_v22  ;;  %v3450_v2 = vrot.slane %v6456_v24, %v7102_v57 }
 0xe08   :  { %v3241_v28 = vpop.permute.xlu1 %3240 }
 0xe09   :  { %v3245_v51 = vadd.f32 %v3241_v28, %v6603_v32  ;;  %3249 = vperm.xlu0 %5206, %v3244_v21   ;;  %v3443_v21 = vrot.slane %v6456_v24, %v5974_v11 }
 0xe0b   :  { %3252 = vperm.xlu1 %5205, %v3245_v51  }
 0xe28   :  { %3083 = vmax.xlane.f32.xlu0 %v3082_v5 }
 0xe88   :  { %v3250_v37 = vpop.permute.xlu0 %3249 }
 0xe89   :  { %v3257_v43 = vrot.slane %v3250_v37, %v6521_v58 }
 0xe8a   :  { %v3253_v52 = vpop.permute.xlu1 %3252 }
 0xe8b   :  { %v3261_v27 = vrot.slane %v3253_v52, %v6521_v58 }
 0xe8d   :  { %v3263_v40 = vsel %vm3262_vm3, %v3261_v27, %v3257_v43 }
 0xe8e   :  { %v3267_v9 = vsel %vm2677_vm15, %v3263_v40, %v3265_v31  ;;  %v6654_v31 = vld [vmem:[%s7097_s8 + $0x8] sm:$0xff] }
 0xe8f   :  { %v3386_v23 = vcombine.high %v3267_v9, %v3267_v9  ;;  %vm3284_vm4 = vcmp.gt.f32.partialorder %v6654_v31, 0.0 }
 0xe91   :  { %v3393_v46 = vrot.slane %v3386_v23, %v6464_v30 }
 0xe93   :  { %v3401_v44 = vrot.slane %v3393_v46, %v6464_v30  ;;  %v3394_v4 = vcombine.high %v3393_v46, %v3393_v46 }
 0xe95   :  { %v3409_v13 = vcombine.high %v3401_v44, %v3401_v44  ;;  %v3408_v8 = vrot.slane %v3394_v4, %v6464_v30  ;;  %v3285_v44 = vsel %vm3284_vm4, 1, %v7098_v39 }
 0xe97   :  { %v3414_v26 = vrot.slane %v3409_v13, %v5974_v11  ;;  %v3410_v48 = vcombine.high %v3408_v8, %v3408_v8 }
 0xe99   :  { %v6624_v54 = vadd.f32 %v3414_v26, %v6477_v50  ;;  %v3418_v16 = vrot.slane %v3410_v48, %v5974_v11 }
 0xe9b   :  { %v3423_v14 = vsel %vm2547_vm9, %v6624_v54, -inf  ;;  %v6630_v62 = vadd.f32 %v3418_v16, %v6477_v50 }
 0xe9c   :  { %3424 = vmax.xlane.f32.xlu1 %v3423_v14  ;;  %v3477_v14 = vrot.slane %v3267_v9, 6 }
 0xe9d   :  { %v3426_v12 = vsel %vm2547_vm9, %v6630_v62, -inf }
 0xe9e   :  { %3427 = vmax.xlane.f32.xlu0 %v3426_v12 }
 0xead   :  { %3452 = vbcast.lane.b32.xlu1 %v3450_v2, 256 }
 0xeb4   :  { %3445 = vbcast.lane.b32.xlu0 %v3443_v21, 256 }
 0xeb5   :  { %v6638_v28 = vpop.xlane.xlu0 %3083 }
 0xeb6   :  { %v3085_v51 = vsub.f32 %v6610_v41, %v6638_v28 }
 0xeb8   :  { %v3086_v19 = vmul.f32 1.442695, %v3085_v51 }
 0xeba   :  { %5345 = vpow2.f32 %v3086_v19 }
 0xec4   :  { %v5346_v5 = vpop.eup %5345 }
 0xec5   :  { %v3089_v37 = vrot.slane %v5346_v5, 4 }
 0xec7   :  { %4553 = vmatmul.mubr.msk.f32.vlgmr.msra.gmra.mrb[32].mxu1 %vm2547_vm9, %v3089_v37 }
 0xec8   :  { %4556 = vmatpush3.msra.mxu1 %v6443_v55  ;;  %4557 = vmatprep.mubr.msk.f32.mxu1 %vm5401_vm13, %v7095_v29 }
 0xec9   :  { %4560 = vmatprep.subr.mxu1 %v7095_v29 }
 0xf29   :  { %v6647_v52 = vpop.xlane.xlu1 %3424 }
 0xf2b   :  { %v6649_v43 = vpop.xlane.xlu0 %3427 }
 0xf2d   :  { %v3453_v27 = vpop.permute.xlu1 %3452 }
 0xf2e   :  { %v3457_v40 = vadd.f32 %v3453_v27, %v6649_v43 }
 0xf2f   :  { %v3446_v23 = vpop.permute.xlu0 %3445 }
 0xf30   :  { %v3456_v46 = vadd.f32 %v3446_v23, %v6647_v52  ;;  %3464 = vperm.xlu0 %5206, %v3457_v40  }
 0xf32   :  { %3461 = vperm.xlu1 %5205, %v3456_v46   ;;  %v3648_v46 = vrot.slane %v6456_v24, %v7100_v45 }
 0xf36   :  { %3287 = vperm.xlu1 %5205, %v3285_v44   ;;  %v3641_v44 = vrot.slane %v6456_v24, %v7101_v15  ;;  %v3169_v15 = vrot.slane %v6638_v28, 6 }
 0xf9a   :  { %v3158_v4 = vpop.f32.mrb[32].mxu1 }
 0xf9b   :  { %v4554_v13 = vpop.f32.mrb[33].mxu1  ;;  %5347 = vlog2.f32 %v3158_v4 }
 0xfaf   :  { %v3465_v8 = vpop.permute.xlu0 %3464 }
 0xfb0   :  { %v3473_v16 = vrot.slane %v3465_v8, %v6521_v58 }
 0xfb1   :  { %v3462_v26 = vpop.permute.xlu1 %3461 }
 0xfb2   :  { %v3469_v48 = vrot.slane %v3462_v26, %v6521_v58 }
 0xfb4   :  { %v3475_v57 = vsel %vm3474_vm5, %v3473_v16, %v3469_v48 }
 0xfb5   :  { %v6664_v12 = vpop.permute.xlu1 %3287 }
 0xfb6   :  { %vm3289_vm6 = vcmp.eq.s32.totalorder %v6664_v12, 1 }
 0xfb7   :  { %v3479_v39 = vsel %vm3289_vm6, %v3475_v57, %v3477_v14  ;;  %v5348_v57 = vpop.eup %5347 }
 0xfb8   :  { %v3594_v2 = vrot.slane %v3479_v39, %v6464_v30  ;;  %v3163_v45 = vmul.f32 0.6931472, %v5348_v57 }
 0xfba   :  { %v3602_v21 = vrot.slane %v3594_v2, %v6464_v30  ;;  %v3595_v51 = vcombine.high %v3594_v2, %v3594_v2  ;;  %v3165_v2 = vrot.slane %v3163_v45, 2 }
 0xfbc   :  { %v3613_v19 = vrot.slane %v3602_v21, %v5974_v11  ;;  %v3609_v5 = vrot.slane %v3595_v51, %v6464_v30  ;;  %v3167_v21 = vadd.f32 %v3165_v2, %v6461_v36 }
 0xfbe   :  { %v6675_v9 = vadd.f32 %v3613_v19, %v6477_v50  ;;  %v3617_v37 = vrot.slane %v3609_v5, %v5974_v11  ;;  %v3171_v51 = vadd.f32 %v3169_v15, %v3167_v21  ;;  %v3173_v19 = vrot.slane %v6610_v41, 6 }
 0xfc0   :  { %v3622_v27 = vsel %vm2547_vm9, %v6675_v9, -inf  ;;  %v6681_v40 = vadd.f32 %v3617_v37, %v6477_v50  ;;  %v6700_v4 = vsel %vm2677_vm15, %v3171_v51, %v3173_v19 }
 0xfc1   :  { %3623 = vmax.xlane.f32.xlu0 %v3622_v27  ;;  %v3294_v5 = vsel %vm3271_vm7, %v6700_v4, -inf  ;;  %v3382_v6 = vrot.slane %v6700_v4, 6 }
 0xfc2   :  { %v3625_v23 = vsel %vm2547_vm9, %v6681_v40, -inf }
 0xfc3   :  { %3626 = vmax.xlane.f32.xlu1 %v3625_v23 }
 0xfd4   :  { %3650 = vbcast.lane.b32.xlu1 %v3648_v46, 256 }
 0xfd7   :  { %3643 = vbcast.lane.b32.xlu0 %v3641_v44, 256  ;;  %v3674_v44 = vrot.slane %v3479_v39, 6 }
0x104e   :  { %v6689_v13 = vpop.xlane.xlu0 %3623 }
0x1050   :  { %v6691_v8 = vpop.xlane.xlu1 %3626 }
0x1052   :  { %v3644_v26 = vpop.permute.xlu0 %3643 }
0x1053   :  { %v3654_v48 = vadd.f32 %v3644_v26, %v6689_v13 }
0x1054   :  { %v3651_v16 = vpop.permute.xlu1 %3650 }
0x1055   :  { %v3655_v14 = vadd.f32 %v3651_v16, %v6691_v8  ;;  %3659 = vperm.xlu0 %5206, %v3654_v48  }
0x1057   :  { %3662 = vperm.xlu1 %5205, %v3655_v14  }
0x1074   :  { %3295 = vmax.xlane.f32.xlu0 %v3294_v5  ;;  %v3849_v5 = vrot.slane %v6456_v24, %v3035_v47 }
0x10d4   :  { %v3660_v37 = vpop.permute.xlu0 %3659 }
0x10d5   :  { %v3667_v23 = vrot.slane %v3660_v37, %v6521_v58  ;;  %v3842_v37 = vrot.slane %v6456_v24, %v3028_v25 }
0x10d6   :  { %v3663_v27 = vpop.permute.xlu1 %3662 }
0x10d7   :  { %v3671_v46 = vrot.slane %v3663_v27, %v6521_v58 }
0x10d9   :  { %v3672_v28 = vsel %vm2859_vm14, %v3671_v46, %v3667_v23 }
0x10da   :  { %v3676_v41 = vsel %vm3289_vm6, %v3672_v28, %v3674_v44 }
0x10db   :  { %v3793_v26 = vrot.slane %v3676_v41, %v6464_v30 }
0x10dd   :  { %v3801_v48 = vrot.slane %v3793_v26, %v6464_v30  ;;  %v3794_v16 = vcombine.high %v3793_v26, %v3793_v26 }
0x10df   :  { %v3809_v14 = vcombine.high %v3801_v48, %v3801_v48  ;;  %v3808_v57 = vrot.slane %v3794_v16, %v6464_v30 }
0x10e1   :  { %v3814_v45 = vrot.slane %v3809_v14, %v5974_v11  ;;  %v3810_v2 = vcombine.high %v3808_v57, %v3808_v57 }
0x10e3   :  { %v6714_v21 = vadd.f32 %v3814_v45, %v6477_v50  ;;  %v3818_v39 = vrot.slane %v3810_v2, %v5974_v11 }
0x10e5   :  { %v3823_v15 = vsel %vm2547_vm9, %v6714_v21, -inf  ;;  %v6720_v51 = vadd.f32 %v3818_v39, %v6477_v50 }
0x10e6   :  { %3824 = vmax.xlane.f32.xlu1 %v3823_v15 }
0x10e7   :  { %v3826_v19 = vsel %vm2547_vm9, %v6720_v51, -inf }
0x10e8   :  { %3827 = vmax.xlane.f32.xlu0 %v3826_v19 }
0x10f7   :  { %3851 = vbcast.lane.b32.xlu1 %v3849_v5, 256  ;;  %v3875_v5 = vrot.slane %v3676_v41, 6 }
0x10fe   :  { %3844 = vbcast.lane.b32.xlu0 %v3842_v37, 256 }
0x1101   :  { %v3296_v27 = vpop.xlane.xlu0 %3295 }
0x1102   :  { %v3297_v23 = vsub.f32 %v6700_v4, %v3296_v27 }
0x1104   :  { %v3298_v46 = vmul.f32 1.442695, %v3297_v23 }
0x1106   :  { %5349 = vpow2.f32 %v3298_v46 }
0x1110   :  { %v5350_v44 = vpop.eup %5349 }
0x1111   :  { %v3301_v28 = vrot.slane %v5350_v44, 6 }
0x1113   :  { %4558 = vmatmul.mubr.msk.f32.vlgmr.msra.gmra.mrb[34].mxu1 %vm2547_vm9, %v3301_v28 }
0x1114   :  { %4561 = vmatpush3.msra.mxu1 %v6443_v55  ;;  %4562 = vmatprep.mubr.msk.f32.mxu1 %vm5401_vm13, %v7095_v29 }
0x1115   :  { %4565 = vmatprep.subr.mxu1 %v7095_v29 }
0x1173   :  { %v6736_v47 = vpop.xlane.xlu1 %3824 }
0x1175   :  { %v6738_v25 = vpop.xlane.xlu0 %3827 }
0x1177   :  { %v3852_v26 = vpop.permute.xlu1 %3851 }
0x1178   :  { %v3856_v48 = vadd.f32 %v3852_v26, %v6738_v25 }
0x1179   :  { %v3845_v16 = vpop.permute.xlu0 %3844 }
0x117a   :  { %v3855_v14 = vadd.f32 %v3845_v16, %v6736_v47  ;;  %3863 = vperm.xlu0 %5206, %v3856_v48  }
0x117c   :  { %3860 = vperm.xlu1 %5205, %v3855_v14  }
0x11e6   :  { %v3370_v57 = vpop.f32.mrb[34].mxu1 }
0x11e7   :  { %v4559_v45 = vpop.f32.mrb[35].mxu1  ;;  %5351 = vlog2.f32 %v3370_v57 }
0x11f9   :  { %v3864_v2 = vpop.permute.xlu0 %3863 }
0x11fa   :  { %v3872_v15 = vrot.slane %v3864_v2, %v6521_v58 }
0x11fb   :  { %v3861_v39 = vpop.permute.xlu1 %3860 }
0x11fc   :  { %v3868_v19 = vrot.slane %v3861_v39, %v6521_v58 }
0x11fe   :  { %v3873_v37 = vsel %vm3060_vm1, %v3872_v15, %v3868_v19  ;;  %v4049_v15 = vrot.slane %v6456_v24, %v3237_v60  ;;  %v3378_v60 = vrot.slane %v3296_v27, 6 }
0x11ff   :  { %v3877_v23 = vsel %vm3289_vm6, %v3873_v37, %v3875_v5 }
0x1200   :  { %v3988_v46 = vcombine.high %v3877_v23, %v3877_v23 }
0x1202   :  { %v3995_v44 = vrot.slane %v3988_v46, %v6464_v30 }
0x1204   :  { %v4003_v28 = vrot.slane %v3995_v44, %v6464_v30  ;;  %v3996_v26 = vcombine.high %v3995_v44, %v3995_v44  ;;  %v5352_v44 = vpop.eup %5351 }
0x1206   :  { %v4014_v48 = vrot.slane %v4003_v28, %v5974_v11  ;;  %v4010_v16 = vrot.slane %v3996_v26, %v6464_v30  ;;  %v4042_v30 = vrot.slane %v6456_v24, %v3230_v61  ;;  %v3375_v28 = vmul.f32 0.6931472, %v5352_v44 }
0x1208   :  { %v4021_v14 = vadd.f32 %v4014_v48, %v6477_v50  ;;  %v4018_v45 = vrot.slane %v4010_v16, %v5974_v11  ;;  %v3376_v26 = vadd.f32 %v3375_v28, %v6456_v24  ;;  %v6769_v16 = vcvt.s32.f32 %v6435_v56  ;;  %v6781_v56 = vld [vmem:[%s7061_s17] ss:$0 sm:$0xff] }
0x120a   :  { %v4023_v41 = vsel %vm2547_vm9, %v4021_v14, -inf  ;;  %v4022_v2 = vadd.f32 %v4018_v45, %v6477_v50  ;;  %v3380_v48 = vadd.f32 %v3378_v60, %v3376_v26 }
0x120b   :  { %4024 = vmax.xlane.f32.xlu1 %v4023_v41 }
0x120c   :  { %v4026_v39 = vsel %vm2547_vm9, %v4022_v2, -inf  ;;  %v6766_v61 = vsel %vm3289_vm6, %v3380_v48, %v3382_v6 }
0x120d   :  { %4027 = vmax.xlane.f32.xlu0 %v4026_v39  ;;  %v3494_v45 = vsel %vm2651_vm12, %v6766_v61, -inf }
0x121c   :  { %4051 = vbcast.lane.b32.xlu1 %v4049_v15, 256 }
0x1223   :  { %4044 = vbcast.lane.b32.xlu0 %v4042_v30, 256  ;;  %v4075_v30 = vrot.slane %v3877_v23, 6 }
0x1298   :  { %v4025_v19 = vpop.xlane.xlu1 %4024 }
0x1299   :  { %vm4029_vm11 = vcmp.eq.f32.partialorder %v4021_v14, %v4025_v19 }
0x129a   :  { %v4028_v11 = vpop.xlane.xlu0 %4027 }
0x129b   :  { %vm4030_vm10 = vcmp.eq.f32.partialorder %v4022_v2, %v4028_v11 }
0x129c   :  { %v4052_v5 = vpop.permute.xlu1 %4051  ;;  %v4032_v57 = vsel %vm4030_vm10, %v6769_v16, 8.0  ;;  %vm3829_vm10 = vcmp.eq.f32.partialorder %v6714_v21, %v6736_v47 }
0x129d   :  { %v4056_v37 = vadd.f32 %v4052_v5, %v4028_v11  ;;  %v4036_v41 = vsel %vm2547_vm9, %v4032_v57, inf  ;;  %v3831_v48 = vsel %vm3829_vm10, %v6769_v16, 8.0  ;;  %vm3830_vm10 = vcmp.eq.f32.partialorder %v6720_v51, %v6738_v25 }
0x129e   :  { %v4045_v46 = vpop.permute.xlu0 %4044  ;;  %v3833_v6 = vsel %vm2547_vm9, %v3831_v48, inf }
0x129f   :  { %v4055_v50 = vadd.f32 %v4045_v46, %v4025_v19  ;;  %4063 = vperm.xlu0 %5206, %v4056_v37   ;;  %v4031_v46 = vsel %vm4029_vm11, %v6769_v16, 8.0 }
0x12a0   :  { %v4033_v23 = vsel %vm2547_vm9, %v4031_v46, inf }
0x12a1   :  { %4060 = vperm.xlu1 %5205, %v4055_v50  }
0x12c5   :  { %3495 = vmax.xlane.f32.xlu1 %v3494_v45 }
0x12c9   :  { %4037 = vmin.xlane.f32.xlu1 %v4036_v41 }
0x131e   :  { %v4064_v27 = vpop.permute.xlu0 %4063 }
0x131f   :  { %v4072_v4 = vrot.slane %v4064_v27, %v6521_v58 }
0x1320   :  { %v4061_v39 = vpop.permute.xlu1 %4060 }
0x1321   :  { %v4068_v15 = vrot.slane %v4061_v39, %v6521_v58 }
0x1323   :  { %v4073_v2 = vsel %vm3262_vm3, %v4072_v4, %v4068_v15 }
0x1324   :  { %v4077_v11 = vsel %vm3289_vm6, %v4073_v2, %v4075_v30 }
0x1325   :  { %v4111_v5 = vadd.f32 %v6781_v56, %v4077_v11 }
0x1327   :  { %v4112_v37 = vsel %vm3271_vm7, %v4111_v5, -inf }
0x1328   :  { %4113 = vmax.xlane.f32.xlu0 %v4112_v37 }
0x132c   :  { %4034 = vmin.xlane.f32.xlu0 %v4033_v23 }
0x1352   :  { %v3496_v50 = vpop.xlane.xlu1 %3495 }
0x1353   :  { %v3497_v44 = vsub.f32 %v6766_v61, %v3496_v50  ;;  %v3580_v15 = vrot.slane %v3496_v50, 6  ;;  %v3832_v50 = vsel %vm3830_vm10, %v6769_v16, 8.0  ;;  %vm3628_vm10 = vcmp.eq.f32.partialorder %v6675_v9, %v6689_v13 }
0x1355   :  { %v3498_v28 = vmul.f32 1.442695, %v3497_v44  ;;  %v3584_v44 = vrot.slane %v6766_v61, 6 }
0x1356   :  { %v4038_v4 = vpop.xlane.xlu1 %4037 }
0x1357   :  { %5353 = vpow2.f32 %v3498_v28  ;;  %v4130_v30 = vrot.slane %v4038_v4, %v6521_v58  ;;  %v3836_v28 = vsel %vm2547_vm9, %v3832_v50, inf }
0x1361   :  { %v5354_v26 = vpop.eup %5353 }
0x1362   :  { %4563 = vmatmul.mubr.msk.f32.vlgmr.msra.gmra.mrb[36].mxu1 %vm2547_vm9, %v5354_v26 }
0x1363   :  { %4566 = vmatpush3.msra.mxu1 %v6443_v55  ;;  %4567 = vmatprep.mubr.msk.f32.mxu1 %vm5401_vm13, %v7095_v29 }
0x1364   :  { %4570 = vmatprep.subr.mxu1 %v7095_v29 }
0x13b5   :  { %v4114_v14 = vpop.xlane.xlu0 %4113 }
0x13b6   :  { %vm4115_vm11 = vcmp.eq.f32.partialorder %v4111_v5, %v4114_v14 }
0x13b7   :  { %v4116_v19 = vsel %vm4115_vm11, %v6769_v16, 8.0 }
0x13b8   :  { %v4117_v60 = vsel %vm3271_vm7, %v4116_v19, inf }
0x13b9   :  { %4118 = vmin.xlane.f32.xlu0 %v4117_v60  ;;  %v4035_v27 = vpop.xlane.xlu0 %4034 }
0x13ba   :  { %v4126_v21 = vrot.slane %v4035_v27, %v6521_v58 }
0x13bc   :  { %v4131_v5 = vsel %vm3262_vm3, %v4130_v30, %v4126_v21 }
0x13bd   :  { %3834 = vmin.xlane.f32.xlu0 %v3833_v6 }
0x1435   :  { %v3569_v45 = vpop.f32.mrb[36].mxu1 }
0x1436   :  { %5355 = vlog2.f32 %v3569_v45  ;;  %v4564_v57 = vpop.f32.mrb[37].mxu1 }
0x1440   :  { %v5356_v41 = vpop.eup %5355 }
0x1441   :  { %v3574_v39 = vmul.f32 0.6931472, %v5356_v41 }
0x1443   :  { %v3576_v47 = vrot.slane %v3574_v39, 6 }
0x1445   :  { %v3578_v2 = vadd.f32 %v3576_v47, %v6456_v24 }
0x1446   :  { %v6804_v11 = vpop.xlane.xlu0 %4118 }
0x1447   :  { %vm4120_vm11 = vcmp.eq.f32.partialorder %v6769_v16, %v6804_v11  ;;  %v3582_v37 = vadd.f32 %v3580_v15, %v3578_v2 }
0x1448   :  { %v4133_v46 = vsel %vm4120_vm11, %v4131_v5, 0.0 }
0x1449   :  { %v4134_v23 = vsel %vm3271_vm7, %v4133_v46, 0.0  ;;  %v6817_v51 = vsel %vm3289_vm6, %v3582_v37, %v3584_v44 }
0x144a   :  { %4135 = vadd.xlane.f32.xlu1 %v4134_v23  ;;  %v3692_v25 = vsel %vm2863_vm0, %v6817_v51, -inf  ;;  %v3835_v57 = vpop.xlane.xlu0 %3834 }
0x144b   :  { %v4149_v27 = vrot.slane %v3835_v57, %v6521_v58 }
0x144e   :  { %3837 = vmin.xlane.f32.xlu1 %v3836_v28 }
0x1452   :  { %3693 = vmax.xlane.f32.xlu1 %v3692_v25 }
0x14d7   :  { %v4136_v26 = vpop.xlane.xlu1 %4135 }
0x14d8   :  { %v6824_v14 = vsel %vm3284_vm4, %v4136_v26, %v6804_v11 }
0x14d9   :  { %4140 = vperm.xlu0 %5206, %v6824_v14   ;;  %v4163_v5 = vrot.slane %v6824_v14, 2 }
0x14db   :  { %v3838_v61 = vpop.xlane.xlu1 %3837 }
0x14dc   :  { %v4153_v41 = vrot.slane %v3838_v61, %v6521_v58 }
0x14de   :  { %v4154_v4 = vsel %vm3262_vm3, %v4153_v41, %v4149_v27 }
0x14df   :  { %v6827_v19 = vpop.xlane.xlu1 %3693 }
0x14e0   :  { %v3695_v60 = vsub.f32 %v6817_v51, %v6827_v19 }
0x14e2   :  { %v3696_v48 = vmul.f32 1.442695, %v3695_v60 }
0x14e4   :  { %5357 = vpow2.f32 %v3696_v48 }
0x14ee   :  { %v5358_v6 = vpop.eup %5357 }
0x14ef   :  { %v3699_v45 = vrot.slane %v5358_v6, 2 }
0x14f1   :  { %4568 = vmatmul.mubr.msk.f32.vlgmr.msra.gmra.mrb[38].mxu1 %vm2547_vm9, %v3699_v45 }
0x14f2   :  { %4571 = vmatpush3.msra.mxu1 %v6443_v55  ;;  %4572 = vmatprep.mubr.msk.f32.mxu1 %vm5401_vm13, %v7095_v29  ;;  %v3630_v55 = vsel %vm3628_vm10, %v6769_v16, 8.0  ;;  %vm3629_vm13 = vcmp.eq.f32.partialorder %v6681_v40, %v6691_v8  ;;  %vm3429_vm10 = vcmp.eq.f32.partialorder %v6624_v54, %v6647_v52 }
0x14f3   :  { %v3632_v29 = vsel %vm2547_vm9, %v3630_v55, inf  ;;  %v3631_v15 = vsel %vm3629_vm13, %v6769_v16, 8.0  ;;  %v3431_v40 = vsel %vm3429_vm10, %v6769_v16, 8.0  ;;  %vm3219_vm10 = vcmp.eq.f32.partialorder %v6588_v35, %v6603_v32 }
0x14f4   :  { %v3635_v9 = vsel %vm2547_vm9, %v3631_v15, inf  ;;  %v3433_v8 = vsel %vm2547_vm9, %v3431_v40, inf }
0x1558   :  { %v4141_v39 = vpop.permute.xlu0 %4140 }
0x1559   :  { %vm4143_vm11 = vcmp.eq.f32.partialorder %v6769_v16, %v4141_v39 }
0x155a   :  { %v4156_v21 = vsel %vm4143_vm11, %v4154_v4, 0.0  ;;  %vm3430_vm11 = vcmp.eq.f32.partialorder %v6630_v62, %v6649_v43  ;;  %v3221_v43 = vsel %vm3219_vm10, %v6769_v16, 8.0 }
0x155b   :  { %v4157_v47 = vsel %vm3271_vm7, %v4156_v21, 0.0  ;;  %v3432_v61 = vsel %vm3430_vm11, %v6769_v16, 8.0  ;;  %vm3016_vm11 = vcmp.eq.f32.partialorder %v6534_v33, %v6563_v18  ;;  %v3225_v57 = vsel %vm2547_vm9, %v3221_v43, inf }
0x155c   :  { %4158 = vadd.xlane.f32.xlu1 %v4157_v47  ;;  %v3436_v60 = vsel %vm2547_vm9, %v3432_v61, inf  ;;  %v3018_v41 = vsel %vm3016_vm11, %v6769_v16, 8.0  ;;  %vm3218_vm11 = vcmp.eq.f32.partialorder %v6582_v42, %v6601_v22 }
0x155d   :  { %v3020_v27 = vsel %vm2547_vm9, %v3018_v41, inf }
0x1560   :  { %3633 = vmin.xlane.f32.xlu1 %v3632_v29 }
0x1564   :  { %3636 = vmin.xlane.f32.xlu1 %v3635_v9 }
0x15c4   :  { %v3768_v13 = vpop.f32.mrb[38].mxu1 }
0x15c5   :  { %v4569_v30 = vpop.f32.mrb[39].mxu1  ;;  %5359 = vlog2.f32 %v3768_v13  ;;  %v3783_v13 = vrot.slane %v6817_v51, 6 }
0x15cf   :  { %v5360_v32 = vpop.eup %5359 }
0x15d0   :  { %v3773_v4 = vmul.f32 0.6931472, %v5360_v32 }
0x15d2   :  { %v3775_v33 = vrot.slane %v3773_v4, 4 }
0x15d4   :  { %v3777_v21 = vadd.f32 %v3775_v33, %v6456_v24 }
0x15e9   :  { %v4159_v2 = vpop.xlane.xlu1 %4158 }
0x15ea   :  { %v4161_v37 = vrot.slane %v4159_v2, 2 }
0x15ec   :  { %v6851_v46 = vsel %vm3284_vm4, %v4161_v37, %v4163_v5  ;;  %v3220_v37 = vsel %vm3218_vm11, %v6769_v16, 8.0 }
0x15ed   :  { %4168 = vperm.xlu1 %5205, %v6851_v46   ;;  %v3634_v23 = vpop.xlane.xlu1 %3633  ;;  %v4191_v6 = vrot.slane %v6851_v46, 2  ;;  %v3222_v40 = vsel %vm2547_vm9, %v3220_v37, inf  ;;  %v3270_v37 = vmul.f32 %v3268_v0, %v6497_v17  ;;  %v5370_v46 = vld [vmem:[%s7097_s8] sm:$0xff]  ;;  %s5407_s8 = smov 6  }
0x15ee   :  { %v4177_v28 = vrot.slane %v3634_v23, %v6521_v58 }
0x15f1   :  { %v3637_v50 = vpop.xlane.xlu1 %3636 }
0x15f2   :  { %v4181_v44 = vrot.slane %v3637_v50, %v6521_v58 }
0x15f4   :  { %v4182_v26 = vsel %vm3060_vm1, %v4181_v44, %v4177_v28 }
0x1611   :  { %3434 = vmin.xlane.f32.xlu1 %v3433_v8 }
0x166c   :  { %v4169_v25 = vpop.permute.xlu1 %4168 }
0x166d   :  { %vm4171_vm13 = vcmp.eq.f32.partialorder %v6769_v16, %v4169_v25 }
0x166e   :  { %v4184_v54 = vsel %vm4171_vm13, %v4182_v26, 0.0  ;;  %vm3017_vm13 = vcmp.eq.f32.partialorder %v6552_v63, %v6561_v38  ;;  %v3779_v63 = vrot.slane %v6827_v19, 6 }
0x166f   :  { %v4185_v52 = vsel %vm3066_vm2, %v4184_v54, 0.0  ;;  %v3019_v39 = vsel %vm3017_vm13, %v6769_v16, 8.0  ;;  %vm2815_vm13 = vcmp.eq.f32.partialorder %v6488_v10, %v6510_v59 }
0x1670   :  { %4186 = vadd.xlane.f32.xlu0 %v4185_v52  ;;  %v3023_v35 = vsel %vm2547_vm9, %v3019_v39, inf  ;;  %v3781_v15 = vadd.f32 %v3779_v63, %v3777_v21 }
0x1672   :  { %v6897_v5 = vsel %vm3289_vm6, %v3781_v15, %v3783_v13  ;;  %v5369_v15 = vld [vmem:[%s7060_s16] ss:$0 sm:$0xff]  ;;  %s5402_s16 = smov 2  }
0x1673   :  { %v3893_v19 = vsel %vm3066_vm2, %v6897_v5, -inf }
0x1674   :  { %3437 = vmin.xlane.f32.xlu0 %v3436_v60 }
0x169e   :  { %v3435_v47 = vpop.xlane.xlu1 %3434 }
0x169f   :  { %v4205_v38 = vrot.slane %v3435_v47, %v6521_v58 }
0x16fd   :  { %v4187_v48 = vpop.xlane.xlu0 %4186 }
0x16fe   :  { %v4189_v45 = vrot.slane %v4187_v48, 2 }
0x1700   :  { %v6872_v62 = vsel %vm3284_vm4, %v4189_v45, %v4191_v6 }
0x1701   :  { %4196 = vperm.xlu0 %5206, %v6872_v62   ;;  %v3438_v18 = vpop.xlane.xlu0 %3437  ;;  %v4219_v8 = vrot.slane %v6872_v62, 2 }
0x1702   :  { %v4209_v55 = vrot.slane %v3438_v18, %v6521_v58 }
0x1704   :  { %v4210_v9 = vsel %vm2859_vm14, %v4209_v55, %v4205_v38  ;;  %v2657_v38 = vrot.slane %v6439_v20, 2 }
0x1706   :  { %v2659_v13 = vmul.f32 %v2657_v38, %v6497_v17 }
0x1720   :  { %3226 = vmin.xlane.f32.xlu0 %v3225_v57 }
0x1724   :  { %3021 = vmin.xlane.f32.xlu0 %v3020_v27 }
0x1728   :  { %3024 = vmin.xlane.f32.xlu0 %v3023_v35 }
0x1780   :  { %v4197_v29 = vpop.permute.xlu0 %4196 }
0x1781   :  { %vm4199_vm10 = vcmp.eq.f32.partialorder %v6769_v16, %v4197_v29 }
0x1782   :  { %v4212_v30 = vsel %vm4199_vm10, %v4210_v9, 0.0  ;;  %v2650_v9 = vmul.f32 %v5369_v15, %v6439_v20  ;;  %v3481_v15 = vsel %vm2651_vm12, %v6495_v7, 0.0  ;;  %vm4342_vm10 = vcmask 56320  }
0x1783   :  { %v4213_v2 = vsel %vm2863_vm0, %v4212_v30, 0.0 }
0x1784   :  { %4214 = vadd.xlane.f32.xlu1 %v4213_v2  ;;  %v2652_v30 = vsel %vm2651_vm12, %v2650_v9, 0.0  ;;  %v3067_v2 = vsel %vm3066_vm2, %v2659_v13, 0.0 }
0x1788   :  { %3894 = vmax.xlane.f32.xlu1 %v3893_v19  ;;  %v2546_v19 = vmul.f32 %v6447_v3, %v6456_v24 }
0x178c   :  { %3223 = vmin.xlane.f32.xlu1 %v3222_v40  ;;  %v2551_v40 = vsel %vm2547_vm9, %v2546_v19, 0.0 }
0x17ad   :  { %v3227_v54 = vpop.xlane.xlu0 %3226 }
0x17ae   :  { %v4237_v61 = vrot.slane %v3227_v54, %v6521_v58  ;;  %v2817_v54 = vsel %vm2815_vm13, %v6769_v16, 8.0 }
0x1811   :  { %v4215_v51 = vpop.xlane.xlu1 %4214 }
0x1812   :  { %v4217_v23 = vrot.slane %v4215_v51, 2  ;;  %v3272_v51 = vsel %vm3271_vm7, %v3270_v37, 0.0 }
0x1814   :  { %v6908_v50 = vsel %vm3284_vm4, %v4217_v23, %v4219_v8  ;;  %vm2814_vm4 = vcmp.eq.f32.partialorder %v6482_v1, %v6508_v53  ;;  %v2660_v1 = vsel %vm2651_vm12, %v2659_v13, 0.0  ;;  %v2864_v53 = vsel %vm2863_vm0, %v2659_v13, 0.0  ;;  %v3022_v8 = vpop.xlane.xlu0 %3021 }
0x1815   :  { %4224 = vperm.xlu1 %5205, %v6908_v50   ;;  %v3895_v42 = vpop.xlane.xlu1 %3894  ;;  %v4247_v21 = vrot.slane %v6908_v50, 2  ;;  %v2816_v63 = vsel %vm2814_vm4, %v6769_v16, 8.0  ;;  %v3677_v13 = vsel %vm2863_vm0, %v6495_v7, 0.0  ;;  %v4313_v19 = vrot.slane %v6908_v50, 6 }
0x1816   :  { %v3896_v22 = vsub.f32 %v6897_v5, %v3895_v42  ;;  %v3980_v32 = vrot.slane %v3895_v42, 6  ;;  %v2818_v29 = vsel %vm2547_vm9, %v2816_v63, inf }
0x1818   :  { %v3897_v44 = vmul.f32 1.442695, %v3896_v22  ;;  %v3025_v23 = vpop.xlane.xlu0 %3024  ;;  %v3984_v22 = vrot.slane %v6897_v5, 6 }
0x1819   :  { %v3224_v26 = vpop.xlane.xlu1 %3223  ;;  %v4265_v42 = vrot.slane %v3025_v23, %v6521_v58 }
0x181a   :  { %5361 = vpow2.f32 %v3897_v44  ;;  %v4233_v52 = vrot.slane %v3224_v26, %v6521_v58  ;;  %v4261_v44 = vrot.slane %v3022_v8, %v6521_v58 }
0x181c   :  { %v4238_v48 = vsel %vm3474_vm5, %v4237_v61, %v4233_v52  ;;  %v4266_v0 = vsel %vm3262_vm3, %v4265_v42, %v4261_v44  ;;  %v2821_v52 = vsel %vm2547_vm9, %v2817_v54, inf  ;;  %v2545_v61 = vmul.f32 %v6439_v20, %v6461_v36 }
0x181d   :  { %v2668_v44 = vrot.slane %v5370_v46, 2  ;;  %v4323_v54 = vrot.slane %v6824_v14, 4  ;;  %vm4336_vm3 = vcmask 31744  }
0x1824   :  { %v5362_v28 = vpop.eup %5361 }
0x1825   :  { %v3900_v25 = vrot.slane %v5362_v28, 4 }
0x1827   :  { %4573 = vmatmul.mubr.msk.f32.vlgmr.msra.gmra.mrb[40].mxu1 %vm2547_vm9, %v3900_v25 }
0x1894   :  { %v4225_v60 = vpop.permute.xlu1 %4224 }
0x1895   :  { %vm4227_vm14 = vcmp.eq.f32.partialorder %v6769_v16, %v4225_v60  ;;  %v2548_v60 = vsel %vm2547_vm9, %v2545_v61, 0.0 }
0x1896   :  { %v4240_v45 = vsel %vm4227_vm14, %v4238_v48, 0.0  ;;  %v2678_v48 = vrot.slane %v6439_v20, 6 }
0x1897   :  { %v4241_v43 = vsel %vm2651_vm12, %v4240_v45, 0.0  ;;  %vm4109_vm12 = vcmask 1024  }
0x1898   :  { %4242 = vadd.xlane.f32.xlu1 %v4241_v43  ;;  %v2680_v10 = vsel %vm2677_vm15, %v6439_v20, %v2678_v48 }
0x1899   :  { %v2876_v59 = vrot.slane %v2680_v10, 6 }
0x189b   :  { %v2878_v45 = vsel %vm2677_vm15, %v6439_v20, %v2876_v59 }
0x189c   :  { %v3079_v43 = vrot.slane %v2878_v45, 6  ;;  %v3277_v45 = vrot.slane %v6654_v31, 2 }
0x189e   :  { %v3081_v36 = vsel %vm2677_vm15, %v6439_v20, %v3079_v43  ;;  %vm4330_vm15 = vcmask 7168  }
0x18fa   :  { %v3969_v57 = vpop.f32.mrb[40].mxu1 }
0x18fb   :  { %5363 = vlog2.f32 %v3969_v57  ;;  %v4574_v41 = vpop.f32.mrb[41].mxu1 }
0x1905   :  { %v5364_v27 = vpop.eup %5363 }
0x1906   :  { %v3974_v39 = vmul.f32 0.6931472, %v5364_v27 }
0x1908   :  { %v3976_v35 = vrot.slane %v3974_v39, 2  ;;  %v3291_v39 = vrot.slane %v3081_v36, 6 }
0x190a   :  { %v3978_v4 = vadd.f32 %v3976_v35, %v6456_v24 }
0x190c   :  { %v3982_v33 = vadd.f32 %v3980_v32, %v3978_v4  ;;  %v3293_v4 = vsel %vm3289_vm6, %v6447_v3, %v3291_v39 }
0x190e   :  { %v3986_v28 = vsel %vm3289_vm6, %v3982_v33, %v3984_v22  ;;  %v3491_v33 = vrot.slane %v3293_v4, 6 }
0x190f   :  { %v4092_v26 = vadd.f32 %v6781_v56, %v3986_v28 }
0x1911   :  { %v4093_v5 = vsel %vm3271_vm7, %v4092_v26, -inf }
0x1925   :  { %v4243_v18 = vpop.xlane.xlu1 %4242 }
0x1926   :  { %v4245_v47 = vrot.slane %v4243_v18, 2  ;;  %v3493_v18 = vsel %vm3289_vm6, %v6447_v3, %v3491_v33 }
0x1928   :  { %v6922_v55 = vsel %vm2672_vm8, %v4245_v47, %v4247_v21  ;;  %v3689_v21 = vrot.slane %v3493_v18, 6 }
0x1929   :  { %4252 = vperm.xlu0 %5206, %v6922_v55   ;;  %v4275_v41 = vrot.slane %v6922_v55, 2 }
0x192a   :  { %v3691_v47 = vsel %vm3289_vm6, %v6447_v3, %v3689_v21 }
0x1948   :  { %2819 = vmin.xlane.f32.xlu0 %v2818_v29  ;;  %v3890_v29 = vrot.slane %v3691_v47, 6 }
0x194a   :  { %v3892_v9 = vsel %vm3289_vm6, %v6447_v3, %v3890_v29  ;;  %vm4338_vm6 = vcmask 39936  }
0x194c   :  { %2653 = vadd.xlane.f32.xlu0 %v2652_v30  ;;  %v4084_v30 = vmul.f32 %v6781_v56, %v3892_v9 }
0x1950   :  { %2661 = vadd.xlane.f32.xlu0 %v2660_v1  ;;  %v4085_v1 = vsel %vm3271_vm7, %v4084_v30, 0.0 }
0x1954   :  { %2865 = vadd.xlane.f32.xlu0 %v2864_v53  ;;  %v3878_v53 = vsel %vm3066_vm2, %v6495_v7, 0.0 }
0x1958   :  { %3068 = vadd.xlane.f32.xlu0 %v3067_v2  ;;  %v4309_v2 = vrot.slane %v6922_v55, 4 }
0x195c   :  { %2552 = vadd.xlane.f32.xlu0 %v2551_v40 }
0x1960   :  { %3273 = vadd.xlane.f32.xlu0 %v3272_v51 }
0x19a8   :  { %v4253_v24 = vpop.permute.xlu0 %4252 }
0x19a9   :  { %vm4255_vm5 = vcmp.eq.f32.partialorder %v6769_v16, %v4253_v24 }
0x19aa   :  { %v4268_v17 = vsel %vm4255_vm5, %v4266_v0, 0.0 }
0x19ab   :  { %v4269_v25 = vsel %vm3271_vm7, %v4268_v17, 0.0 }
0x19ac   :  { %4270 = vadd.xlane.f32.xlu1 %v4269_v25 }
0x19b0   :  { %4094 = vmax.xlane.f32.xlu1 %v4093_v5 }
0x19b4   :  { %2822 = vmin.xlane.f32.xlu1 %v2821_v52 }
0x19b8   :  { %2549 = vadd.xlane.f32.xlu1 %v2548_v60 }
0x19d5   :  { %v2820_v12 = vpop.xlane.xlu0 %2819 }
0x19d6   :  { %v4289_v37 = vrot.slane %v2820_v12, %v6521_v58 }
0x19d9   :  { %v2654_v50 = vpop.xlane.xlu0 %2653 }
0x19dd   :  { %v2662_v8 = vpop.xlane.xlu0 %2661 }
0x19de   :  { %v2670_v28 = vmul.f32 %v2668_v44, %v2662_v8 }
0x19e1   :  { %v2866_v24 = vpop.xlane.xlu0 %2865 }
0x19e2   :  { %v2870_v17 = vmul.f32 %v2866_v24, %v2668_v44 }
0x19e4   :  { %v2872_v52 = vrot.slane %v2870_v17, 2 }
0x19e5   :  { %v3069_v25 = vpop.xlane.xlu0 %3068 }
0x19e6   :  { %v3073_v60 = vmul.f32 %v3069_v25, %v2668_v44 }
0x19e8   :  { %v3075_v59 = vrot.slane %v3073_v60, 4 }
0x1a39   :  { %v4271_v57 = vpop.xlane.xlu1 %4270 }
0x1a3a   :  { %v4273_v27 = vrot.slane %v4271_v57, 2 }
0x1a3c   :  { %v6976_v35 = vsel %vm2672_vm8, %v4273_v27, %v4275_v41 }
0x1a3d   :  { %v6978_v32 = vpop.xlane.xlu1 %4094  ;;  %4280 = vperm.xlu1 %5205, %v6976_v35   ;;  %v4303_v3 = vrot.slane %v6976_v35, 2 }
0x1a3e   :  { %v4096_v49 = vsub.f32 %v4092_v26, %v6978_v32 }
0x1a40   :  { %v4097_v20 = vmul.f32 1.442695, %v4096_v49 }
0x1a41   :  { %v2823_v7 = vpop.xlane.xlu1 %2822 }
0x1a42   :  { %5365 = vpow2.f32 %v4097_v20  ;;  %v4293_v55 = vrot.slane %v2823_v7, %v6521_v58 }
0x1a45   :  { %v2550_v56 = vpop.xlane.xlu1 %2549 }
0x1a4c   :  { %v5366_v63 = vpop.eup %5365 }
0x1a4d   :  { %v4099_v38 = vsel %vm3271_vm7, %v5366_v63, 0.0  ;;  %vm4340_vm7 = vcmask 48128  }
0x1a4e   :  { %4100 = vadd.xlane.f32.xlu0 %v4099_v38 }
0x1a52   :  { %3482 = vadd.xlane.f32.xlu0 %v3481_v15 }
0x1a56   :  { %3678 = vadd.xlane.f32.xlu0 %v3677_v13 }
0x1a5a   :  { %4086 = vadd.xlane.f32.xlu0 %v4085_v1 }
0x1a61   :  { %3879 = vadd.xlane.f32.xlu1 %v3878_v53 }
0x1a70   :  { %4310 = vrot.lane.b32.xlu0 %v4309_v2, %s5402_s16 }
0x1a72   :  { %4314 = vrot.lane.b32.xlu1 %v4313_v19, %s5403_s23 }
0x1a74   :  { %4320 = vrot.lane.b32.xlu0 %v4191_v6, %s5404_s24  ;;  %v2554_v6 = vmul.f32 %v5370_v46, %v2550_v56 }
0x1a76   :  { %4317 = vrot.lane.b32.xlu1 %v6872_v62, %s5405_s12  ;;  %v4294_v62 = vsel %vm3060_vm1, %v4293_v55, %v4289_v37  ;;  %v2655_v42 = vadd.f32 %v2654_v50, %v2554_v6  ;;  %v2664_v22 = vrot.slane %v2554_v6, 2  ;;  %v2867_v26 = vrot.slane %v2554_v6, 4 }
0x1a77   :  { %v3070_v48 = vrot.slane %v2554_v6, 6  ;;  %vm4332_vm1 = vcmask 15360  }
0x1a78   :  { %v2666_v58 = vadd.f32 %v2664_v22, %v2655_v42 }
0x1a7a   :  { %4306 = vrot.lane.b32.xlu1 %v4303_v3, %s5406_s6  ;;  %v2671_v0 = vadd.f32 %v2670_v28, %v2666_v58  ;;  %v4328_v28 = vrot.slane %v6804_v11, 4 }
0x1a7c   :  { %v2869_v5 = vadd.f32 %v2867_v26, %v2671_v0 }
0x1a7e   :  { %v2874_v61 = vadd.f32 %v2872_v52, %v2869_v5 }
0x1a80   :  { %v3072_v10 = vadd.f32 %v3070_v48, %v2874_v61 }
0x1a82   :  { %v3077_v36 = vadd.f32 %v3075_v59, %v3072_v10 }
0x1abc   :  { %v4281_v40 = vpop.permute.xlu1 %4280 }
0x1abd   :  { %vm4283_vm9 = vcmp.eq.f32.partialorder %v6769_v16, %v4281_v40  ;;  %v2553_v16 = vpop.xlane.xlu0 %2552 }
0x1abe   :  { %v4296_v51 = vsel %vm4283_vm9, %v4294_v62, 0.0  ;;  %v2555_v57 = vmul.f32 %v2553_v16, %v6654_v31 }
0x1abf   :  { %v4297_v23 = vsel %vm3066_vm2, %v4296_v51, 0.0  ;;  %vm4334_vm2 = vcmask 23552  }
0x1ac0   :  { %4298 = vadd.xlane.f32.xlu1 %v4297_v23  ;;  %v3275_v39 = vadd.f32 %v3077_v36, %v2555_v57  ;;  %v3485_v20 = vrot.slane %v2555_v57, 2  ;;  %v3680_v38 = vrot.slane %v2555_v57, 4  ;;  %v3881_v1 = vrot.slane %v2555_v57, 6 }
0x1ac1   :  { %v3274_v43 = vpop.xlane.xlu0 %3273 }
0x1ac2   :  { %v3279_v41 = vmul.f32 %v3277_v45, %v3274_v43 }
0x1ac4   :  { %v3281_v4 = vrot.slane %v3279_v41, 6 }
0x1ac6   :  { %v3283_v49 = vadd.f32 %v3281_v4, %v3275_v39 }
0x1ac8   :  { %v3487_v21 = vadd.f32 %v3485_v20, %v3283_v49 }
0x1ad1   :  { %4324 = vrot.lane.b32.xlu1 %v4323_v54, %s5407_s8 }
0x1adb   :  { %v4101_v27 = vpop.xlane.xlu0 %4100 }
0x1adc   :  { %5367 = vlog2.f32 %v4101_v27 }
0x1adf   :  { %v3483_v14 = vpop.xlane.xlu0 %3482 }
0x1ae0   :  { %v3488_v33 = vmul.f32 %v3483_v14, %v3277_v45 }
0x1ae2   :  { %v3489_v63 = vadd.f32 %v3488_v33, %v3487_v21 }
0x1ae3   :  { %v3679_v18 = vpop.xlane.xlu0 %3678 }
0x1ae4   :  { %v3683_v47 = vmul.f32 %v3679_v18, %v3277_v45  ;;  %v3682_v9 = vadd.f32 %v3680_v38, %v3489_v63 }
0x1ae6   :  { %v3685_v29 = vrot.slane %v3683_v47, 2  ;;  %v5368_v15 = vpop.eup %5367 }
0x1ae7   :  { %v4103_v13 = vmul.f32 0.6931472, %v5368_v15  ;;  %v4087_v2 = vpop.xlane.xlu0 %4086 }
0x1ae8   :  { %v3687_v30 = vadd.f32 %v3685_v29, %v3682_v9  ;;  %v4089_v56 = vrot.slane %v4087_v2, 6 }
0x1ae9   :  { %v4104_v19 = vadd.f32 %v4103_v13, %v6978_v32 }
0x1aea   :  { %v3883_v7 = vadd.f32 %v3881_v1, %v3687_v30 }
0x1aeb   :  { %v4106_v55 = vrot.slane %v4104_v19, 6  ;;  %v4311_v8 = vpop.permute.xlu0 %4310 }
0x1aee   :  { %v3880_v31 = vpop.xlane.xlu1 %3879 }
0x1aef   :  { %v3884_v53 = vmul.f32 %v3880_v31, %v3277_v45  ;;  %v4321_v24 = vpop.permute.xlu0 %4320 }
0x1af1   :  { %v3886_v12 = vrot.slane %v3884_v53, 4 }
0x1af2   :  { %v4315_v46 = vpop.permute.xlu1 %4314 }
0x1af3   :  { %v3888_v50 = vadd.f32 %v3886_v12, %v3883_v7 }
0x1af5   :  { %v4091_v37 = vadd.f32 %v4089_v56, %v3888_v50 }
0x1af6   :  { %v4318_v6 = vpop.permute.xlu1 %4317 }
0x1af7   :  { %v4108_v40 = vsub.f32 %v4091_v37, %v4106_v55 }
0x1af9   :  { %4110 = vst.msk [vmem:[%s7062_s18] sm:$0x3] %vm4109_vm12, %v4108_v40  ;;  %s5408_s18 = smov [#allocation5]  }
0x1afa   :  { %v4307_v62 = vpop.permute.xlu1 %4306  ;;  %s4354_s26 = sshll.u32 %s5408_s18, 4  ;;  %s4355_s26 = int_to_ptr.vmem [resolvable:$true] %s4354_s26 }
0x1afb   :  { %s5371_s27 = scalar_lea.vmem %s4355_s26, 32  ;;  %p5376_p1 = scmp.lt.s32.totalorder %s4355_s26, %s4355_s26 }
0x1afc   :  { %p5372_p0 = scmp.ne.s32.totalorder %s4355_s26, %s5371_s27  ;;  %p5377_p2 = scmp.lt.s32.totalorder %s5371_s27, %s5371_s27 }
0x1afe   :  { %p5378_p3 = por %p5377_p2, %p5376_p1 }
0x1b00   :  { %p5379_p4 = pnand %p5378_p3, %p5372_p0 }
0x1b4d   :  { %v4299_v51 = vpop.xlane.xlu1 %4298 }
0x1b4e   :  { %v4301_v23 = vrot.slane %v4299_v51, 2 }
0x1b50   :  { %v4305_v32 = vsel %vm2672_vm8, %v4301_v23, %v4303_v3 }
0x1b51   :  { %v4331_v42 = vsel %vm4330_vm15, %v4305_v32, %v4307_v62  ;;  %v4325_v17 = vpop.permute.xlu1 %4324 }
0x1b52   :  { %v4333_v22 = vsel %vm4332_vm1, %v4331_v42, %v4311_v8 }
0x1b53   :  { %v4335_v44 = vsel %vm4334_vm2, %v4333_v22, %v4315_v46 }
0x1b54   :  { %v4337_v58 = vsel %vm4336_vm3, %v4335_v44, %v4318_v6 }
0x1b55   :  { %v4339_v0 = vsel %vm4338_vm6, %v4337_v58, %v4321_v24 }
0x1b56   :  { %v4341_v25 = vsel %vm4340_vm7, %v4339_v0, %v4325_v17 }
0x1b57   :  { %v4343_v26 = vsel %vm4342_vm10, %v4341_v25, %v4328_v28 }
0x1b58   :  { %v5189_v34 = vtrunc.f32 %v4343_v26 }
0x1b5a   :  { %v5190_v35 = vcvt.f32.s32 %v5189_v34 }
0x1b5c   :  { %4345 = vst.msk [vmem:[#allocation5 - $0x2] sm:$0xc] %vm2863_vm0, %v5190_v35 }
0x1b5d   :  { %5382 = shalt.err (!%p5379_p4)
}
0x1b5e   :  { %s5383_s28 = scalar_lea.hbm %s7063_s19, 32 }
0x1b5f   :  { %p5384_p5 = scmp.ne.s32.totalorder %s7063_s19, %s5383_s28  ;;  %p5387_p6 = scmp.lt.u32.totalorder %s5383_s28, %s7063_s19 }
0x1b61   :  { %p5389_p7 = pnand %p5387_p6, %p5384_p5 }
0x1b63   :  { %5392 = shalt.err (!%p5389_p7)
}
0x1b64   :  { %4357 = dma.vmem_to_hbm [thread:$0]  %s4355_s26, 32, %s7063_s19, [#allocation6]  }
0x1b65   :  { %5393 = dma.done.wait [#allocation6], 32  }
0x1b66   :  { %5394 = vsyncadd [#allocation6], 4294967264 }
0x1b67   :  { %4363 = vsyncpa [#allocation6], 1 }

</bundles_post_ra>
